<compile_context>
chip_gen: v7x
topology: tpu7x:2x2x1
jax: 0.10.0
libtpu: 0.0.40
codegen_flags: <defaults>
</compile_context>

<pallas_src>
import functools
import math

import jax
import jax.numpy as jnp
from jax import lax
from jax.experimental import pallas as pl
from jax.experimental.pallas import tpu as pltpu


SUBLANE = 8    # f32 sublane width
LANE = 128     # lane width


# ---------------------------------------------------------------------------
# Fused kernel: 3 x (bidirectional LSTM layer) + fc1
# ---------------------------------------------------------------------------
def _fused_kernel(H, T, B, n_layers, unroll, *args):
    # args layout: x, mask, (wih, whh, b) * n_layers, wfc, bfc,
    #              out_ref, gx_ref, act_a, act_b
    x_ref, mask_ref = args[0], args[1]
    lw = args[2:2 + 3 * n_layers]
    wfc_ref, bfc_ref = args[2 + 3 * n_layers], args[3 + 3 * n_layers]
    out_ref = args[4 + 3 * n_layers]
    gx_ref, act_a, act_b = args[5 + 3 * n_layers:]

    H2, H4, H8 = 2 * H, 4 * H, 8 * H

    # Static lane mask selecting the "g" (cell candidate) gate lanes
    # ([2H:3H] within each direction's 4H block). Hoisted once, shared by all
    # layers and all (possibly unrolled) steps.
    col = lax.broadcasted_iota(jnp.int32, (B, H8), 1) % H4
    is_g = jnp.logical_and(col >= H2, col < 3 * H)

    def run_layer(in_ref, wih_ref, whh_ref, b_ref, dst_ref):
        # Input projection for BOTH directions in one big MXU matmul (bias
        # fused), written straight into the (T*B, 8H) gates scratch.
        gx_ref[...] = (jnp.dot(in_ref[...], wih_ref[...],
                               preferred_element_type=jnp.float32)
                       + b_ref[...])
        whh = whh_ref[...]                                   # (2H, 8H) block-diag

        def step(i, carry):
            h, c = carry                                     # (B, 2H): [fwd | bwd]
            row_f = pl.multiple_of(i * B, B)                 # fwd time t = i
            row_b = pl.multiple_of((T - 1 - i) * B, B)       # bwd time t = T-1-i
            gates = jnp.concatenate(
                [gx_ref[pl.ds(row_f, B), 0:H4],              # fwd x-gates @ t=i
                 gx_ref[pl.ds(row_b, B), H4:H8]],            # bwd x-gates @ t=T-1-i
                axis=-1) + jnp.dot(h, whh,
                                   preferred_element_type=jnp.float32)
            # Two full-width EUP passes + one select instead of per-gate
            # quarter-filled transcendentals.
            act = jnp.where(is_g, jnp.tanh(gates), jax.nn.sigmoid(gates))
            i_g = jnp.concatenate([act[:, 0:H], act[:, H4:H4 + H]], axis=-1)
            f_g = jnp.concatenate([act[:, H:H2], act[:, H4 + H:H4 + H2]],
                                  axis=-1)
            g_g = jnp.concatenate([act[:, H2:3 * H],
                                   act[:, H4 + H2:H4 + 3 * H]], axis=-1)
            o_g = jnp.concatenate([act[:, 3 * H:H4], act[:, H4 + 3 * H:H8]],
                                  axis=-1)
            c_new = f_g * c + i_g * g_g
            h_new = o_g * jnp.tanh(c_new)
            # Packed-sequence semantics: per-direction state update only while
            # t < length; padded outputs are exactly zero.
            m = mask_ref[pl.ds(row_f, B), :]                 # (B, 2H) 0/1 f32
            keep = m > 0.0
            h = jnp.where(keep, h_new, h)
            c = jnp.where(keep, c_new, c)
            h_out = m * h_new
            dst_ref[pl.ds(row_f, B), 0:H] = h_out[:, 0:H]    # fwd half, row t
            dst_ref[pl.ds(row_b, B), H:H2] = h_out[:, H:H2]  # bwd half, row T-1-t
            return h, c

        z = jnp.zeros((B, H2), jnp.float32)
        lax.fori_loop(0, T, step, (z, z), unroll=unroll)

    src = x_ref
    dsts = (act_a, act_b)
    for l in range(n_layers):
        dst = dsts[l % 2]
        run_layer(src, lw[3 * l], lw[3 * l + 1], lw[3 * l + 2], dst)
        src = dst

    # Fused fc1 epilogue (lane-padded to 128 columns -> lane-dense store).
    # Padded positions have zero hidden state -> score = b_fc there, matching
    # PyTorch's fc1(zero-padded output).
    out_ref[...] = (jnp.dot(src[...], wfc_ref[...],
                            preferred_element_type=jnp.float32) + bfc_ref[...])


# ---------------------------------------------------------------------------
# pallas_call wrapper
# ---------------------------------------------------------------------------
def _fused_call(x, mask, layers, w_fc, b_fc, *, H, T, B, unroll):
    E = x.shape[1]
    C_pad = w_fc.shape[1]
    n_layers = len(layers)

    operands = [x, mask]
    for layer in layers:
        operands += [layer["wih"], layer["whh"], layer["b"]]
    operands += [w_fc, b_fc]

    vmem = pl.BlockSpec(memory_space=pltpu.MemorySpace.VMEM)

    flops = 2 * T * B * 2 * H * C_pad
    d = E
    for _ in range(n_layers):
        flops += 2 * T * B * d * 8 * H            # input projection (both dirs)
        flops += 2 * T * B * 2 * H * 8 * H        # fused recurrent matmul
        d = 2 * H
    weight_bytes = 4 * (sum(l["wih"].size + l["whh"].size + l["b"].size
                            for l in layers) + w_fc.size + b_fc.size)
    cost = pl.CostEstimate(
        flops=flops,
        transcendentals=n_layers * T * B * 18 * H,
        bytes_accessed=4 * T * B * (E + 2 * H + C_pad) + weight_bytes)

    return pl.pallas_call(
        functools.partial(_fused_kernel, H, T, B, n_layers, unroll),
        out_shape=jax.ShapeDtypeStruct((T * B, C_pad), jnp.float32),
        in_specs=[vmem] * len(operands),
        out_specs=vmem,
        scratch_shapes=[
            pltpu.VMEM((T * B, 8 * H), jnp.float32),   # x @ W_ih + b (both dirs)
            pltpu.VMEM((T * B, 2 * H), jnp.float32),   # activation ping
            pltpu.VMEM((T * B, 2 * H), jnp.float32),   # activation pong
        ],
        cost_estimate=cost,
    )(*operands)


# ---------------------------------------------------------------------------
# Parameters (deterministic, PyTorch-style default init)
# ---------------------------------------------------------------------------
def init_params(key, num_embeddings, embedding_dim, hidden_size, lstm_layers,
                num_class):
    H = hidden_size
    k_emb, k_lstm, k_fc = jax.random.split(key, 3)
    params = {"embedding": jax.random.normal(
        k_emb, (num_embeddings, embedding_dim), jnp.float32)}

    bound = 1.0 / math.sqrt(H)
    layer_keys = jax.random.split(k_lstm, lstm_layers * 2)
    layers = []
    for l in range(lstm_layers):
        d_in = embedding_dim if l == 0 else 2 * H
        per_dir = []
        for d in range(2):
            kk = jax.random.split(layer_keys[l * 2 + d], 4)
            wih = jax.random.uniform(kk[0], (4 * H, d_in), jnp.float32,
                                     -bound, bound)
            whh = jax.random.uniform(kk[1], (4 * H, H), jnp.float32,
                                     -bound, bound)
            bih = jax.random.uniform(kk[2], (4 * H,), jnp.float32,
                                     -bound, bound)
            bhh = jax.random.uniform(kk[3], (4 * H,), jnp.float32,
                                     -bound, bound)
            # pre-transpose for (rows, D) @ (D, 4H) MXU matmuls; fuse biases
            per_dir.append((wih.T, whh.T, bih + bhh))
        (wih_f, whh_f, b_f), (wih_b, whh_b, b_b) = per_dir
        zeros = jnp.zeros((H, 4 * H), jnp.float32)
        whh_blk = jnp.concatenate(
            [jnp.concatenate([whh_f, zeros], axis=1),
             jnp.concatenate([zeros, whh_b], axis=1)], axis=0)   # (2H, 8H)
        layers.append({
            "wih": jnp.concatenate([wih_f, wih_b], axis=1),      # (D, 8H)
            "whh": whh_blk,                                      # (2H, 8H)
            "b": jnp.concatenate([b_f, b_b]).reshape(1, -1),     # (1, 8H)
        })
    params["lstm"] = layers

    fc_in = 2 * H
    kb = 1.0 / math.sqrt(fc_in)
    kf = jax.random.split(k_fc, 2)
    w_fc = jax.random.uniform(kf[0], (num_class, fc_in), jnp.float32, -kb, kb)
    b_fc = jax.random.uniform(kf[1], (num_class,), jnp.float32, -kb, kb)
    c_pad = max(LANE, ((num_class + LANE - 1) // LANE) * LANE)
    w_fc_p = jnp.zeros((fc_in, c_pad), jnp.float32).at[:, :num_class].set(w_fc.T)
    b_fc_p = jnp.zeros((1, c_pad), jnp.float32).at[0, :num_class].set(b_fc)
    params["fc"] = (w_fc_p, b_fc_p)                     # (2H, C_pad), (1, C_pad)
    params["num_class"] = num_class
    return params


# ---------------------------------------------------------------------------
# Forward pass (matches BIG_PUNC_LSTM.forward)
# ---------------------------------------------------------------------------
def _pick_unroll(T):
    if T <= 32:
        return True
    for u in (8, 4, 2):
        if T % u == 0:
            return u
    return 1


def big_punc_lstm_forward(params, padded_input, input_lengths, hidden_size):
    H = hidden_size
    B, T = padded_input.shape
    B_pad = ((B + SUBLANE - 1) // SUBLANE) * SUBLANE

    # Time-major, batch-padded, flattened token ids -> (T*B_pad, E) embedding
    # gather: avoids the full-tensor (B,T,E)->(T,B,E) transpose in XLA.
    idx_tb = jnp.pad(padded_input.T.astype(jnp.int32),
                     ((0, 0), (0, B_pad - B)))
    x = jnp.take(params["embedding"], idx_tb.reshape(-1),
                 axis=0).astype(jnp.float32)                       # (T*B_pad, E)

    # Precompute per-step / per-direction length masks once.  Row block i
    # holds [lens > i (fwd lanes 0:H) | lens > T-1-i (bwd lanes H:2H)].
    # Batch padding rows get length 0 -> fully masked inside the kernel.
    lens = jnp.pad(input_lengths.astype(jnp.int32), (0, B_pad - B))
    step_ids = jnp.arange(T, dtype=jnp.int32).reshape(T, 1, 1)
    lens_b = lens.reshape(1, B_pad, 1)
    m_f = jnp.broadcast_to(lens_b > step_ids, (T, B_pad, H))
    m_b = jnp.broadcast_to(lens_b > (T - 1 - step_ids), (T, B_pad, H))
    mask = jnp.concatenate([m_f, m_b], axis=-1).astype(
        jnp.float32).reshape(T * B_pad, 2 * H)

    w_fc, b_fc = params["fc"]
    out = _fused_call(x, mask, params["lstm"], w_fc, b_fc,
                      H=H, T=T, B=B_pad, unroll=_pick_unroll(T))

    C = params["num_class"]
    score = out[:, :C].reshape(T, B_pad, C)[:, :B, :]              # (T, B, C)
    # note: self.dropout / self.activation_func are never used in forward
    return jnp.transpose(score, (1, 0, 2))                         # (B, T, C)


# ---------------------------------------------------------------------------
if __name__ == "__main__":
    num_embeddings = 50
    embedding_dim = 32
    hidden_size = 32
    lstm_layers = 3
    num_class = 2
    B, T = 2, 8

    key = jax.random.PRNGKey(0)
    pkey, tkey = jax.random.split(key)
    params = init_params(pkey, num_embeddings, embedding_dim, hidden_size,
                         lstm_layers, num_class)

    padded_input = jax.random.randint(tkey, (B, T), 0, num_embeddings,
                                      dtype=jnp.int32)
    # pack_padded_sequence(enforce_sorted=True) requires descending lengths
    input_lengths = jnp.array([8, 5], dtype=jnp.int32)

    score = big_punc_lstm_forward(params, padded_input, input_lengths,
                                  hidden_size)
    score = jax.block_until_ready(score)
    assert score.shape == (B, T, num_class)
    assert score.dtype == jnp.float32
    print("KERNEL_OK")
</pallas_src>

<mosaic_0001>
module attributes {stable_mosaic.version = 11 : i64} {
  func.func @_fused_kernel(%arg0: memref<64x32xf32, #tpu.memory_space<vmem>>, %arg1: memref<64x64xf32, #tpu.memory_space<vmem>>, %arg2: memref<32x256xf32, #tpu.memory_space<vmem>>, %arg3: memref<64x256xf32, #tpu.memory_space<vmem>>, %arg4: memref<1x256xf32, #tpu.memory_space<vmem>>, %arg5: memref<64x256xf32, #tpu.memory_space<vmem>>, %arg6: memref<64x256xf32, #tpu.memory_space<vmem>>, %arg7: memref<1x256xf32, #tpu.memory_space<vmem>>, %arg8: memref<64x256xf32, #tpu.memory_space<vmem>>, %arg9: memref<64x256xf32, #tpu.memory_space<vmem>>, %arg10: memref<1x256xf32, #tpu.memory_space<vmem>>, %arg11: memref<64x128xf32, #tpu.memory_space<vmem>>, %arg12: memref<1x128xf32, #tpu.memory_space<vmem>>, %arg13: memref<64x128xf32, #tpu.memory_space<vmem>>, %arg14: memref<64x256xf32, #tpu.memory_space<vmem>>, %arg15: memref<64x64xf32, #tpu.memory_space<vmem>>, %arg16: memref<64x64xf32, #tpu.memory_space<vmem>>) attributes {dimension_semantics = [], scalar_prefetch = 0 : i64, scratch_operands = 3 : i64, tpu.core_type = #tpu.core_type<tc>} {
    %0 = tpu.iota {dimensions = array<i32: 1>} : vector<8x256xi32>
    %c128_i32 = arith.constant 128 : i32
    %c0_i32 = arith.constant 0 : i32
    %1 = arith.cmpi eq, %c128_i32, %c0_i32 : i32
    %c1_i32 = arith.constant 1 : i32
    %2 = arith.select %1, %c1_i32, %c128_i32 : i32
    %3 = vector.broadcast %2 : i32 to vector<8x256xi32>
    %4 = arith.remsi %0, %3 : vector<8x256xi32>
    %c0_i32_0 = arith.constant 0 : i32
    %5 = vector.broadcast %c0_i32_0 : i32 to vector<8x256xi32>
    %6 = arith.cmpi ne, %4, %5 : vector<8x256xi32>
    %c0_i32_1 = arith.constant 0 : i32
    %7 = vector.broadcast %c0_i32_1 : i32 to vector<8x256xi32>
    %8 = arith.cmpi slt, %4, %7 : vector<8x256xi32>
    %c0_i32_2 = arith.constant 0 : i32
    %9 = arith.cmpi slt, %2, %c0_i32_2 : i32
    %10 = vector.broadcast %9 : i1 to vector<8x256xi1>
    %11 = vector.broadcast %10 : vector<8x256xi1> to vector<8x256xi1>
    %12 = arith.xori %8, %11 : vector<8x256xi1>
    %13 = arith.andi %12, %6 : vector<8x256xi1>
    %14 = vector.broadcast %2 : i32 to vector<8x256xi32>
    %15 = arith.addi %4, %14 : vector<8x256xi32>
    %16 = arith.select %13, %15, %4 : vector<8x256xi1>, vector<8x256xi32>
    %c64_i32 = arith.constant 64 : i32
    %17 = vector.broadcast %c64_i32 : i32 to vector<8x256xi32>
    %18 = arith.cmpi sge, %16, %17 : vector<8x256xi32>
    %c96_i32 = arith.constant 96 : i32
    %19 = vector.broadcast %c96_i32 : i32 to vector<8x256xi32>
    %20 = arith.cmpi slt, %16, %19 : vector<8x256xi32>
    %21 = arith.andi %18, %20 : vector<8x256xi1>
    %c0 = arith.constant 0 : index
    %c0_3 = arith.constant 0 : index
    %22 = vector.load %arg0[%c0, %c0_3] : memref<64x32xf32, #tpu.memory_space<vmem>>, vector<64x32xf32>
    %c0_4 = arith.constant 0 : index
    %c0_5 = arith.constant 0 : index
    %23 = vector.load %arg2[%c0_4, %c0_5] : memref<32x256xf32, #tpu.memory_space<vmem>>, vector<32x256xf32>
    %cst = arith.constant dense<0.000000e+00> : vector<64x256xf32>
    %24 = tpu.matmul %22, %23, %cst {dimension_numbers = #tpu.dot_dimension_numbers<[1], [0], [0], [1], [0, 0, 1, 1], [], []>} : vector<64x32xf32>, vector<32x256xf32>, vector<64x256xf32> -> vector<64x256xf32>
    %c0_6 = arith.constant 0 : index
    %c0_7 = arith.constant 0 : index
    %25 = vector.load %arg4[%c0_6, %c0_7] : memref<1x256xf32, #tpu.memory_space<vmem>>, vector<1x256xf32>
    %26 = vector.broadcast %25 : vector<1x256xf32> to vector<64x256xf32>
    %27 = arith.addf %24, %26 : vector<64x256xf32>
    %c0_8 = arith.constant 0 : index
    %c0_9 = arith.constant 0 : index
    %28 = vector.load %arg14[%c0_8, %c0_9] : memref<64x256xf32, #tpu.memory_space<vmem>>, vector<64x256xf32>
    tpu.vector_store %arg14[%c0_8, %c0_9], %27 {strides = array<i32>} : memref<64x256xf32, #tpu.memory_space<vmem>>, vector<64x256xf32>,
    %c0_10 = arith.constant 0 : index
    %c0_11 = arith.constant 0 : index
    %29 = vector.load %arg3[%c0_10, %c0_11] : memref<64x256xf32, #tpu.memory_space<vmem>>, vector<64x256xf32>
    %cst_12 = arith.constant 0.000000e+00 : f32
    %30 = vector.broadcast %cst_12 : f32 to vector<8x64xf32>
    %c0_i32_13 = arith.constant 0 : i32
    %c8_i32 = arith.constant 8 : i32
    %31 = arith.muli %c0_i32_13, %c8_i32 : i32
    %32 = tpu.assume_multiple %31, 8 : i32
    %c7_i32 = arith.constant 7 : i32
    %33 = arith.subi %c7_i32, %c0_i32_13 : i32
    %c8_i32_14 = arith.constant 8 : i32
    %34 = arith.muli %33, %c8_i32_14 : i32
    %35 = tpu.assume_multiple %34, 8 : i32
    %36 = arith.index_cast %32 : i32 to index
    %c0_15 = arith.constant 0 : index
    %37 = vector.load %arg14[%36, %c0_15] : memref<64x256xf32, #tpu.memory_space<vmem>>, vector<8x128xf32>
    %38 = arith.index_cast %35 : i32 to index
    %c128 = arith.constant 128 : index
    %39 = vector.load %arg14[%38, %c128] : memref<64x256xf32, #tpu.memory_space<vmem>>, vector<8x128xf32>
    %40 = tpu.concatenate %37, %39 in 1 : vector<8x128xf32>, vector<8x128xf32> -> vector<8x256xf32>
    %cst_16 = arith.constant dense<0.000000e+00> : vector<8x256xf32>
    %41 = tpu.matmul %30, %29, %cst_16 {dimension_numbers = #tpu.dot_dimension_numbers<[1], [0], [0], [1], [0, 0, 1, 1], [], []>} : vector<8x64xf32>, vector<64x256xf32>, vector<8x256xf32> -> vector<8x256xf32>
    %42 = arith.addf %40, %41 : vector<8x256xf32>
    %43 = math.tanh %42 : vector<8x256xf32>
    %44 = arith.negf %42 : vector<8x256xf32>
    %45 = math.exp %44 : vector<8x256xf32>
    %cst_17 = arith.constant 1.000000e+00 : f32
    %46 = vector.broadcast %cst_17 : f32 to vector<8x256xf32>
    %47 = arith.addf %46, %45 : vector<8x256xf32>
    %48 = arith.divf %46, %47 : vector<8x256xf32>
    %49 = arith.select %21, %43, %48 : vector<8x256xi1>, vector<8x256xf32>
    %50 = vector.extract_strided_slice %49 {offsets = [0, 0], sizes = [8, 32], strides = [1, 1]} : vector<8x256xf32> to vector<8x32xf32>
    %51 = vector.extract_strided_slice %49 {offsets = [0, 128], sizes = [8, 32], strides = [1, 1]} : vector<8x256xf32> to vector<8x32xf32>
    %52 = tpu.concatenate %50, %51 in 1 : vector<8x32xf32>, vector<8x32xf32> -> vector<8x64xf32>
    %53 = vector.extract_strided_slice %49 {offsets = [0, 32], sizes = [8, 32], strides = [1, 1]} : vector<8x256xf32> to vector<8x32xf32>
    %54 = vector.extract_strided_slice %49 {offsets = [0, 160], sizes = [8, 32], strides = [1, 1]} : vector<8x256xf32> to vector<8x32xf32>
    %55 = tpu.concatenate %53, %54 in 1 : vector<8x32xf32>, vector<8x32xf32> -> vector<8x64xf32>
    %56 = vector.extract_strided_slice %49 {offsets = [0, 64], sizes = [8, 32], strides = [1, 1]} : vector<8x256xf32> to vector<8x32xf32>
    %57 = vector.extract_strided_slice %49 {offsets = [0, 192], sizes = [8, 32], strides = [1, 1]} : vector<8x256xf32> to vector<8x32xf32>
    %58 = tpu.concatenate %56, %57 in 1 : vector<8x32xf32>, vector<8x32xf32> -> vector<8x64xf32>
    %59 = vector.extract_strided_slice %49 {offsets = [0, 96], sizes = [8, 32], strides = [1, 1]} : vector<8x256xf32> to vector<8x32xf32>
    %60 = vector.extract_strided_slice %49 {offsets = [0, 224], sizes = [8, 32], strides = [1, 1]} : vector<8x256xf32> to vector<8x32xf32>
    %61 = tpu.concatenate %59, %60 in 1 : vector<8x32xf32>, vector<8x32xf32> -> vector<8x64xf32>
    %62 = arith.mulf %55, %30 : vector<8x64xf32>
    %63 = arith.mulf %52, %58 : vector<8x64xf32>
    %64 = arith.addf %62, %63 : vector<8x64xf32>
    %65 = math.tanh %64 : vector<8x64xf32>
    %66 = arith.mulf %61, %65 : vector<8x64xf32>
    %67 = arith.index_cast %32 : i32 to index
    %c0_18 = arith.constant 0 : index
    %68 = vector.load %arg1[%67, %c0_18] : memref<64x64xf32, #tpu.memory_space<vmem>>, vector<8x64xf32>
    %cst_19 = arith.constant 0.000000e+00 : f32
    %69 = vector.broadcast %cst_19 : f32 to vector<8x64xf32>
    %70 = arith.cmpf ogt, %68, %69 : vector<8x64xf32>
    %71 = arith.select %70, %66, %30 : vector<8x64xi1>, vector<8x64xf32>
    %72 = arith.select %70, %64, %30 : vector<8x64xi1>, vector<8x64xf32>
    %73 = arith.mulf %68, %66 : vector<8x64xf32>
    %74 = vector.extract_strided_slice %73 {offsets = [0, 0], sizes = [8, 32], strides = [1, 1]} : vector<8x64xf32> to vector<8x32xf32>
    %75 = arith.index_cast %32 : i32 to index
    %c0_20 = arith.constant 0 : index
    %76 = vector.load %arg15[%75, %c0_20] : memref<64x64xf32, #tpu.memory_space<vmem>>, vector<8x32xf32>
    tpu.vector_store %arg15[%75, %c0_20], %74 {strides = array<i32>} : memref<64x64xf32, #tpu.memory_space<vmem>>, vector<8x32xf32>,
    %77 = vector.extract_strided_slice %73 {offsets = [0, 32], sizes = [8, 32], strides = [1, 1]} : vector<8x64xf32> to vector<8x32xf32>
    %78 = arith.index_cast %35 : i32 to index
    %c32 = arith.constant 32 : index
    %79 = vector.load %arg15[%78, %c32] : memref<64x64xf32, #tpu.memory_space<vmem>>, vector<8x32xf32>
    tpu.vector_store %arg15[%78, %c32], %77 {strides = array<i32>} : memref<64x64xf32, #tpu.memory_space<vmem>>, vector<8x32xf32>,
    %c1_i32_21 = arith.constant 1 : i32
    %c8_i32_22 = arith.constant 8 : i32
    %80 = arith.muli %c1_i32_21, %c8_i32_22 : i32
    %81 = tpu.assume_multiple %80, 8 : i32
    %c7_i32_23 = arith.constant 7 : i32
    %82 = arith.subi %c7_i32_23, %c1_i32_21 : i32
    %c8_i32_24 = arith.constant 8 : i32
    %83 = arith.muli %82, %c8_i32_24 : i32
    %84 = tpu.assume_multiple %83, 8 : i32
    %85 = arith.index_cast %81 : i32 to index
    %c0_25 = arith.constant 0 : index
    %86 = vector.load %arg14[%85, %c0_25] : memref<64x256xf32, #tpu.memory_space<vmem>>, vector<8x128xf32>
    %87 = arith.index_cast %84 : i32 to index
    %c128_26 = arith.constant 128 : index
    %88 = vector.load %arg14[%87, %c128_26] : memref<64x256xf32, #tpu.memory_space<vmem>>, vector<8x128xf32>
    %89 = tpu.concatenate %86, %88 in 1 : vector<8x128xf32>, vector<8x128xf32> -> vector<8x256xf32>
    %cst_27 = arith.constant dense<0.000000e+00> : vector<8x256xf32>
    %90 = tpu.matmul %71, %29, %cst_27 {dimension_numbers = #tpu.dot_dimension_numbers<[1], [0], [0], [1], [0, 0, 1, 1], [], []>} : vector<8x64xf32>, vector<64x256xf32>, vector<8x256xf32> -> vector<8x256xf32>
    %91 = arith.addf %89, %90 : vector<8x256xf32>
    %92 = math.tanh %91 : vector<8x256xf32>
    %93 = arith.negf %91 : vector<8x256xf32>
    %94 = math.exp %93 : vector<8x256xf32>
    %cst_28 = arith.constant 1.000000e+00 : f32
    %95 = vector.broadcast %cst_28 : f32 to vector<8x256xf32>
    %96 = arith.addf %95, %94 : vector<8x256xf32>
    %97 = arith.divf %95, %96 : vector<8x256xf32>
    %98 = arith.select %21, %92, %97 : vector<8x256xi1>, vector<8x256xf32>
    %99 = vector.extract_strided_slice %98 {offsets = [0, 0], sizes = [8, 32], strides = [1, 1]} : vector<8x256xf32> to vector<8x32xf32>
    %100 = vector.extract_strided_slice %98 {offsets = [0, 128], sizes = [8, 32], strides = [1, 1]} : vector<8x256xf32> to vector<8x32xf32>
    %101 = tpu.concatenate %99, %100 in 1 : vector<8x32xf32>, vector<8x32xf32> -> vector<8x64xf32>
    %102 = vector.extract_strided_slice %98 {offsets = [0, 32], sizes = [8, 32], strides = [1, 1]} : vector<8x256xf32> to vector<8x32xf32>
    %103 = vector.extract_strided_slice %98 {offsets = [0, 160], sizes = [8, 32], strides = [1, 1]} : vector<8x256xf32> to vector<8x32xf32>
    %104 = tpu.concatenate %102, %103 in 1 : vector<8x32xf32>, vector<8x32xf32> -> vector<8x64xf32>
    %105 = vector.extract_strided_slice %98 {offsets = [0, 64], sizes = [8, 32], strides = [1, 1]} : vector<8x256xf32> to vector<8x32xf32>
    %106 = vector.extract_strided_slice %98 {offsets = [0, 192], sizes = [8, 32], strides = [1, 1]} : vector<8x256xf32> to vector<8x32xf32>
    %107 = tpu.concatenate %105, %106 in 1 : vector<8x32xf32>, vector<8x32xf32> -> vector<8x64xf32>
    %108 = vector.extract_strided_slice %98 {offsets = [0, 96], sizes = [8, 32], strides = [1, 1]} : vector<8x256xf32> to vector<8x32xf32>
    %109 = vector.extract_strided_slice %98 {offsets = [0, 224], sizes = [8, 32], strides = [1, 1]} : vector<8x256xf32> to vector<8x32xf32>
    %110 = tpu.concatenate %108, %109 in 1 : vector<8x32xf32>, vector<8x32xf32> -> vector<8x64xf32>
    %111 = arith.mulf %104, %72 : vector<8x64xf32>
    %112 = arith.mulf %101, %107 : vector<8x64xf32>
    %113 = arith.addf %111, %112 : vector<8x64xf32>
    %114 = math.tanh %113 : vector<8x64xf32>
    %115 = arith.mulf %110, %114 : vector<8x64xf32>
    %116 = arith.index_cast %81 : i32 to index
    %c0_29 = arith.constant 0 : index
    %117 = vector.load %arg1[%116, %c0_29] : memref<64x64xf32, #tpu.memory_space<vmem>>, vector<8x64xf32>
    %cst_30 = arith.constant 0.000000e+00 : f32
    %118 = vector.broadcast %cst_30 : f32 to vector<8x64xf32>
    %119 = arith.cmpf ogt, %117, %118 : vector<8x64xf32>
    %120 = arith.select %119, %115, %71 : vector<8x64xi1>, vector<8x64xf32>
    %121 = arith.select %119, %113, %72 : vector<8x64xi1>, vector<8x64xf32>
    %122 = arith.mulf %117, %115 : vector<8x64xf32>
    %123 = vector.extract_strided_slice %122 {offsets = [0, 0], sizes = [8, 32], strides = [1, 1]} : vector<8x64xf32> to vector<8x32xf32>
    %124 = arith.index_cast %81 : i32 to index
    %c0_31 = arith.constant 0 : index
    %125 = vector.load %arg15[%124, %c0_31] : memref<64x64xf32, #tpu.memory_space<vmem>>, vector<8x32xf32>
    tpu.vector_store %arg15[%124, %c0_31], %123 {strides = array<i32>} : memref<64x64xf32, #tpu.memory_space<vmem>>, vector<8x32xf32>,
    %126 = vector.extract_strided_slice %122 {offsets = [0, 32], sizes = [8, 32], strides = [1, 1]} : vector<8x64xf32> to vector<8x32xf32>
    %127 = arith.index_cast %84 : i32 to index
    %c32_32 = arith.constant 32 : index
    %128 = vector.load %arg15[%127, %c32_32] : memref<64x64xf32, #tpu.memory_space<vmem>>, vector<8x32xf32>
    tpu.vector_store %arg15[%127, %c32_32], %126 {strides = array<i32>} : memref<64x64xf32, #tpu.memory_space<vmem>>, vector<8x32xf32>,
    %c2_i32 = arith.constant 2 : i32
    %c8_i32_33 = arith.constant 8 : i32
    %129 = arith.muli %c2_i32, %c8_i32_33 : i32
    %130 = tpu.assume_multiple %129, 8 : i32
    %c7_i32_34 = arith.constant 7 : i32
    %131 = arith.subi %c7_i32_34, %c2_i32 : i32
    %c8_i32_35 = arith.constant 8 : i32
    %132 = arith.muli %131, %c8_i32_35 : i32
    %133 = tpu.assume_multiple %132, 8 : i32
    %134 = arith.index_cast %130 : i32 to index
    %c0_36 = arith.constant 0 : index
    %135 = vector.load %arg14[%134, %c0_36] : memref<64x256xf32, #tpu.memory_space<vmem>>, vector<8x128xf32>
    %136 = arith.index_cast %133 : i32 to index
    %c128_37 = arith.constant 128 : index
    %137 = vector.load %arg14[%136, %c128_37] : memref<64x256xf32, #tpu.memory_space<vmem>>, vector<8x128xf32>
    %138 = tpu.concatenate %135, %137 in 1 : vector<8x128xf32>, vector<8x128xf32> -> vector<8x256xf32>
    %cst_38 = arith.constant dense<0.000000e+00> : vector<8x256xf32>
    %139 = tpu.matmul %120, %29, %cst_38 {dimension_numbers = #tpu.dot_dimension_numbers<[1], [0], [0], [1], [0, 0, 1, 1], [], []>} : vector<8x64xf32>, vector<64x256xf32>, vector<8x256xf32> -> vector<8x256xf32>
    %140 = arith.addf %138, %139 : vector<8x256xf32>
    %141 = math.tanh %140 : vector<8x256xf32>
    %142 = arith.negf %140 : vector<8x256xf32>
    %143 = math.exp %142 : vector<8x256xf32>
    %cst_39 = arith.constant 1.000000e+00 : f32
    %144 = vector.broadcast %cst_39 : f32 to vector<8x256xf32>
    %145 = arith.addf %144, %143 : vector<8x256xf32>
    %146 = arith.divf %144, %145 : vector<8x256xf32>
    %147 = arith.select %21, %141, %146 : vector<8x256xi1>, vector<8x256xf32>
    %148 = vector.extract_strided_slice %147 {offsets = [0, 0], sizes = [8, 32], strides = [1, 1]} : vector<8x256xf32> to vector<8x32xf32>
    %149 = vector.extract_strided_slice %147 {offsets = [0, 128], sizes = [8, 32], strides = [1, 1]} : vector<8x256xf32> to vector<8x32xf32>
    %150 = tpu.concatenate %148, %149 in 1 : vector<8x32xf32>, vector<8x32xf32> -> vector<8x64xf32>
    %151 = vector.extract_strided_slice %147 {offsets = [0, 32], sizes = [8, 32], strides = [1, 1]} : vector<8x256xf32> to vector<8x32xf32>
    %152 = vector.extract_strided_slice %147 {offsets = [0, 160], sizes = [8, 32], strides = [1, 1]} : vector<8x256xf32> to vector<8x32xf32>
    %153 = tpu.concatenate %151, %152 in 1 : vector<8x32xf32>, vector<8x32xf32> -> vector<8x64xf32>
    %154 = vector.extract_strided_slice %147 {offsets = [0, 64], sizes = [8, 32], strides = [1, 1]} : vector<8x256xf32> to vector<8x32xf32>
    %155 = vector.extract_strided_slice %147 {offsets = [0, 192], sizes = [8, 32], strides = [1, 1]} : vector<8x256xf32> to vector<8x32xf32>
    %156 = tpu.concatenate %154, %155 in 1 : vector<8x32xf32>, vector<8x32xf32> -> vector<8x64xf32>
    %157 = vector.extract_strided_slice %147 {offsets = [0, 96], sizes = [8, 32], strides = [1, 1]} : vector<8x256xf32> to vector<8x32xf32>
    %158 = vector.extract_strided_slice %147 {offsets = [0, 224], sizes = [8, 32], strides = [1, 1]} : vector<8x256xf32> to vector<8x32xf32>
    %159 = tpu.concatenate %157, %158 in 1 : vector<8x32xf32>, vector<8x32xf32> -> vector<8x64xf32>
    %160 = arith.mulf %153, %121 : vector<8x64xf32>
    %161 = arith.mulf %150, %156 : vector<8x64xf32>
    %162 = arith.addf %160, %161 : vector<8x64xf32>
    %163 = math.tanh %162 : vector<8x64xf32>
    %164 = arith.mulf %159, %163 : vector<8x64xf32>
    %165 = arith.index_cast %130 : i32 to index
    %c0_40 = arith.constant 0 : index
    %166 = vector.load %arg1[%165, %c0_40] : memref<64x64xf32, #tpu.memory_space<vmem>>, vector<8x64xf32>
    %cst_41 = arith.constant 0.000000e+00 : f32
    %167 = vector.broadcast %cst_41 : f32 to vector<8x64xf32>
    %168 = arith.cmpf ogt, %166, %167 : vector<8x64xf32>
    %169 = arith.select %168, %164, %120 : vector<8x64xi1>, vector<8x64xf32>
    %170 = arith.select %168, %162, %121 : vector<8x64xi1>, vector<8x64xf32>
    %171 = arith.mulf %166, %164 : vector<8x64xf32>
    %172 = vector.extract_strided_slice %171 {offsets = [0, 0], sizes = [8, 32], strides = [1, 1]} : vector<8x64xf32> to vector<8x32xf32>
    %173 = arith.index_cast %130 : i32 to index
    %c0_42 = arith.constant 0 : index
    %174 = vector.load %arg15[%173, %c0_42] : memref<64x64xf32, #tpu.memory_space<vmem>>, vector<8x32xf32>
    tpu.vector_store %arg15[%173, %c0_42], %172 {strides = array<i32>} : memref<64x64xf32, #tpu.memory_space<vmem>>, vector<8x32xf32>,
    %175 = vector.extract_strided_slice %171 {offsets = [0, 32], sizes = [8, 32], strides = [1, 1]} : vector<8x64xf32> to vector<8x32xf32>
    %176 = arith.index_cast %133 : i32 to index
    %c32_43 = arith.constant 32 : index
    %177 = vector.load %arg15[%176, %c32_43] : memref<64x64xf32, #tpu.memory_space<vmem>>, vector<8x32xf32>
    tpu.vector_store %arg15[%176, %c32_43], %175 {strides = array<i32>} : memref<64x64xf32, #tpu.memory_space<vmem>>, vector<8x32xf32>,
    %c3_i32 = arith.constant 3 : i32
    %c8_i32_44 = arith.constant 8 : i32
    %178 = arith.muli %c3_i32, %c8_i32_44 : i32
    %179 = tpu.assume_multiple %178, 8 : i32
    %c7_i32_45 = arith.constant 7 : i32
    %180 = arith.subi %c7_i32_45, %c3_i32 : i32
    %c8_i32_46 = arith.constant 8 : i32
    %181 = arith.muli %180, %c8_i32_46 : i32
    %182 = tpu.assume_multiple %181, 8 : i32
    %183 = arith.index_cast %179 : i32 to index
    %c0_47 = arith.constant 0 : index
    %184 = vector.load %arg14[%183, %c0_47] : memref<64x256xf32, #tpu.memory_space<vmem>>, vector<8x128xf32>
    %185 = arith.index_cast %182 : i32 to index
    %c128_48 = arith.constant 128 : index
    %186 = vector.load %arg14[%185, %c128_48] : memref<64x256xf32, #tpu.memory_space<vmem>>, vector<8x128xf32>
    %187 = tpu.concatenate %184, %186 in 1 : vector<8x128xf32>, vector<8x128xf32> -> vector<8x256xf32>
    %cst_49 = arith.constant dense<0.000000e+00> : vector<8x256xf32>
    %188 = tpu.matmul %169, %29, %cst_49 {dimension_numbers = #tpu.dot_dimension_numbers<[1], [0], [0], [1], [0, 0, 1, 1], [], []>} : vector<8x64xf32>, vector<64x256xf32>, vector<8x256xf32> -> vector<8x256xf32>
    %189 = arith.addf %187, %188 : vector<8x256xf32>
    %190 = math.tanh %189 : vector<8x256xf32>
    %191 = arith.negf %189 : vector<8x256xf32>
    %192 = math.exp %191 : vector<8x256xf32>
    %cst_50 = arith.constant 1.000000e+00 : f32
    %193 = vector.broadcast %cst_50 : f32 to vector<8x256xf32>
    %194 = arith.addf %193, %192 : vector<8x256xf32>
    %195 = arith.divf %193, %194 : vector<8x256xf32>
    %196 = arith.select %21, %190, %195 : vector<8x256xi1>, vector<8x256xf32>
    %197 = vector.extract_strided_slice %196 {offsets = [0, 0], sizes = [8, 32], strides = [1, 1]} : vector<8x256xf32> to vector<8x32xf32>
    %198 = vector.extract_strided_slice %196 {offsets = [0, 128], sizes = [8, 32], strides = [1, 1]} : vector<8x256xf32> to vector<8x32xf32>
    %199 = tpu.concatenate %197, %198 in 1 : vector<8x32xf32>, vector<8x32xf32> -> vector<8x64xf32>
    %200 = vector.extract_strided_slice %196 {offsets = [0, 32], sizes = [8, 32], strides = [1, 1]} : vector<8x256xf32> to vector<8x32xf32>
    %201 = vector.extract_strided_slice %196 {offsets = [0, 160], sizes = [8, 32], strides = [1, 1]} : vector<8x256xf32> to vector<8x32xf32>
    %202 = tpu.concatenate %200, %201 in 1 : vector<8x32xf32>, vector<8x32xf32> -> vector<8x64xf32>
    %203 = vector.extract_strided_slice %196 {offsets = [0, 64], sizes = [8, 32], strides = [1, 1]} : vector<8x256xf32> to vector<8x32xf32>
    %204 = vector.extract_strided_slice %196 {offsets = [0, 192], sizes = [8, 32], strides = [1, 1]} : vector<8x256xf32> to vector<8x32xf32>
    %205 = tpu.concatenate %203, %204 in 1 : vector<8x32xf32>, vector<8x32xf32> -> vector<8x64xf32>
    %206 = vector.extract_strided_slice %196 {offsets = [0, 96], sizes = [8, 32], strides = [1, 1]} : vector<8x256xf32> to vector<8x32xf32>
    %207 = vector.extract_strided_slice %196 {offsets = [0, 224], sizes = [8, 32], strides = [1, 1]} : vector<8x256xf32> to vector<8x32xf32>
    %208 = tpu.concatenate %206, %207 in 1 : vector<8x32xf32>, vector<8x32xf32> -> vector<8x64xf32>
    %209 = arith.mulf %202, %170 : vector<8x64xf32>
    %210 = arith.mulf %199, %205 : vector<8x64xf32>
    %211 = arith.addf %209, %210 : vector<8x64xf32>
    %212 = math.tanh %211 : vector<8x64xf32>
    %213 = arith.mulf %208, %212 : vector<8x64xf32>
    %214 = arith.index_cast %179 : i32 to index
    %c0_51 = arith.constant 0 : index
    %215 = vector.load %arg1[%214, %c0_51] : memref<64x64xf32, #tpu.memory_space<vmem>>, vector<8x64xf32>
    %cst_52 = arith.constant 0.000000e+00 : f32
    %216 = vector.broadcast %cst_52 : f32 to vector<8x64xf32>
    %217 = arith.cmpf ogt, %215, %216 : vector<8x64xf32>
    %218 = arith.select %217, %213, %169 : vector<8x64xi1>, vector<8x64xf32>
    %219 = arith.select %217, %211, %170 : vector<8x64xi1>, vector<8x64xf32>
    %220 = arith.mulf %215, %213 : vector<8x64xf32>
    %221 = vector.extract_strided_slice %220 {offsets = [0, 0], sizes = [8, 32], strides = [1, 1]} : vector<8x64xf32> to vector<8x32xf32>
    %222 = arith.index_cast %179 : i32 to index
    %c0_53 = arith.constant 0 : index
    %223 = vector.load %arg15[%222, %c0_53] : memref<64x64xf32, #tpu.memory_space<vmem>>, vector<8x32xf32>
    tpu.vector_store %arg15[%222, %c0_53], %221 {strides = array<i32>} : memref<64x64xf32, #tpu.memory_space<vmem>>, vector<8x32xf32>,
    %224 = vector.extract_strided_slice %220 {offsets = [0, 32], sizes = [8, 32], strides = [1, 1]} : vector<8x64xf32> to vector<8x32xf32>
    %225 = arith.index_cast %182 : i32 to index
    %c32_54 = arith.constant 32 : index
    %226 = vector.load %arg15[%225, %c32_54] : memref<64x64xf32, #tpu.memory_space<vmem>>, vector<8x32xf32>
    tpu.vector_store %arg15[%225, %c32_54], %224 {strides = array<i32>} : memref<64x64xf32, #tpu.memory_space<vmem>>, vector<8x32xf32>,
    %c4_i32 = arith.constant 4 : i32
    %c8_i32_55 = arith.constant 8 : i32
    %227 = arith.muli %c4_i32, %c8_i32_55 : i32
    %228 = tpu.assume_multiple %227, 8 : i32
    %c7_i32_56 = arith.constant 7 : i32
    %229 = arith.subi %c7_i32_56, %c4_i32 : i32
    %c8_i32_57 = arith.constant 8 : i32
    %230 = arith.muli %229, %c8_i32_57 : i32
    %231 = tpu.assume_multiple %230, 8 : i32
    %232 = arith.index_cast %228 : i32 to index
    %c0_58 = arith.constant 0 : index
    %233 = vector.load %arg14[%232, %c0_58] : memref<64x256xf32, #tpu.memory_space<vmem>>, vector<8x128xf32>
    %234 = arith.index_cast %231 : i32 to index
    %c128_59 = arith.constant 128 : index
    %235 = vector.load %arg14[%234, %c128_59] : memref<64x256xf32, #tpu.memory_space<vmem>>, vector<8x128xf32>
    %236 = tpu.concatenate %233, %235 in 1 : vector<8x128xf32>, vector<8x128xf32> -> vector<8x256xf32>
    %cst_60 = arith.constant dense<0.000000e+00> : vector<8x256xf32>
    %237 = tpu.matmul %218, %29, %cst_60 {dimension_numbers = #tpu.dot_dimension_numbers<[1], [0], [0], [1], [0, 0, 1, 1], [], []>} : vector<8x64xf32>, vector<64x256xf32>, vector<8x256xf32> -> vector<8x256xf32>
    %238 = arith.addf %236, %237 : vector<8x256xf32>
    %239 = math.tanh %238 : vector<8x256xf32>
    %240 = arith.negf %238 : vector<8x256xf32>
    %241 = math.exp %240 : vector<8x256xf32>
    %cst_61 = arith.constant 1.000000e+00 : f32
    %242 = vector.broadcast %cst_61 : f32 to vector<8x256xf32>
    %243 = arith.addf %242, %241 : vector<8x256xf32>
    %244 = arith.divf %242, %243 : vector<8x256xf32>
    %245 = arith.select %21, %239, %244 : vector<8x256xi1>, vector<8x256xf32>
    %246 = vector.extract_strided_slice %245 {offsets = [0, 0], sizes = [8, 32], strides = [1, 1]} : vector<8x256xf32> to vector<8x32xf32>
    %247 = vector.extract_strided_slice %245 {offsets = [0, 128], sizes = [8, 32], strides = [1, 1]} : vector<8x256xf32> to vector<8x32xf32>
    %248 = tpu.concatenate %246, %247 in 1 : vector<8x32xf32>, vector<8x32xf32> -> vector<8x64xf32>
    %249 = vector.extract_strided_slice %245 {offsets = [0, 32], sizes = [8, 32], strides = [1, 1]} : vector<8x256xf32> to vector<8x32xf32>
    %250 = vector.extract_strided_slice %245 {offsets = [0, 160], sizes = [8, 32], strides = [1, 1]} : vector<8x256xf32> to vector<8x32xf32>
    %251 = tpu.concatenate %249, %250 in 1 : vector<8x32xf32>, vector<8x32xf32> -> vector<8x64xf32>
    %252 = vector.extract_strided_slice %245 {offsets = [0, 64], sizes = [8, 32], strides = [1, 1]} : vector<8x256xf32> to vector<8x32xf32>
    %253 = vector.extract_strided_slice %245 {offsets = [0, 192], sizes = [8, 32], strides = [1, 1]} : vector<8x256xf32> to vector<8x32xf32>
    %254 = tpu.concatenate %252, %253 in 1 : vector<8x32xf32>, vector<8x32xf32> -> vector<8x64xf32>
    %255 = vector.extract_strided_slice %245 {offsets = [0, 96], sizes = [8, 32], strides = [1, 1]} : vector<8x256xf32> to vector<8x32xf32>
    %256 = vector.extract_strided_slice %245 {offsets = [0, 224], sizes = [8, 32], strides = [1, 1]} : vector<8x256xf32> to vector<8x32xf32>
    %257 = tpu.concatenate %255, %256 in 1 : vector<8x32xf32>, vector<8x32xf32> -> vector<8x64xf32>
    %258 = arith.mulf %251, %219 : vector<8x64xf32>
    %259 = arith.mulf %248, %254 : vector<8x64xf32>
    %260 = arith.addf %258, %259 : vector<8x64xf32>
    %261 = math.tanh %260 : vector<8x64xf32>
    %262 = arith.mulf %257, %261 : vector<8x64xf32>
    %263 = arith.index_cast %228 : i32 to index
    %c0_62 = arith.constant 0 : index
    %264 = vector.load %arg1[%263, %c0_62] : memref<64x64xf32, #tpu.memory_space<vmem>>, vector<8x64xf32>
    %cst_63 = arith.constant 0.000000e+00 : f32
    %265 = vector.broadcast %cst_63 : f32 to vector<8x64xf32>
    %266 = arith.cmpf ogt, %264, %265 : vector<8x64xf32>
    %267 = arith.select %266, %262, %218 : vector<8x64xi1>, vector<8x64xf32>
    %268 = arith.select %266, %260, %219 : vector<8x64xi1>, vector<8x64xf32>
    %269 = arith.mulf %264, %262 : vector<8x64xf32>
    %270 = vector.extract_strided_slice %269 {offsets = [0, 0], sizes = [8, 32], strides = [1, 1]} : vector<8x64xf32> to vector<8x32xf32>
    %271 = arith.index_cast %228 : i32 to index
    %c0_64 = arith.constant 0 : index
    %272 = vector.load %arg15[%271, %c0_64] : memref<64x64xf32, #tpu.memory_space<vmem>>, vector<8x32xf32>
    tpu.vector_store %arg15[%271, %c0_64], %270 {strides = array<i32>} : memref<64x64xf32, #tpu.memory_space<vmem>>, vector<8x32xf32>,
    %273 = vector.extract_strided_slice %269 {offsets = [0, 32], sizes = [8, 32], strides = [1, 1]} : vector<8x64xf32> to vector<8x32xf32>
    %274 = arith.index_cast %231 : i32 to index
    %c32_65 = arith.constant 32 : index
    %275 = vector.load %arg15[%274, %c32_65] : memref<64x64xf32, #tpu.memory_space<vmem>>, vector<8x32xf32>
    tpu.vector_store %arg15[%274, %c32_65], %273 {strides = array<i32>} : memref<64x64xf32, #tpu.memory_space<vmem>>, vector<8x32xf32>,
    %c5_i32 = arith.constant 5 : i32
    %c8_i32_66 = arith.constant 8 : i32
    %276 = arith.muli %c5_i32, %c8_i32_66 : i32
    %277 = tpu.assume_multiple %276, 8 : i32
    %c7_i32_67 = arith.constant 7 : i32
    %278 = arith.subi %c7_i32_67, %c5_i32 : i32
    %c8_i32_68 = arith.constant 8 : i32
    %279 = arith.muli %278, %c8_i32_68 : i32
    %280 = tpu.assume_multiple %279, 8 : i32
    %281 = arith.index_cast %277 : i32 to index
    %c0_69 = arith.constant 0 : index
    %282 = vector.load %arg14[%281, %c0_69] : memref<64x256xf32, #tpu.memory_space<vmem>>, vector<8x128xf32>
    %283 = arith.index_cast %280 : i32 to index
    %c128_70 = arith.constant 128 : index
    %284 = vector.load %arg14[%283, %c128_70] : memref<64x256xf32, #tpu.memory_space<vmem>>, vector<8x128xf32>
    %285 = tpu.concatenate %282, %284 in 1 : vector<8x128xf32>, vector<8x128xf32> -> vector<8x256xf32>
    %cst_71 = arith.constant dense<0.000000e+00> : vector<8x256xf32>
    %286 = tpu.matmul %267, %29, %cst_71 {dimension_numbers = #tpu.dot_dimension_numbers<[1], [0], [0], [1], [0, 0, 1, 1], [], []>} : vector<8x64xf32>, vector<64x256xf32>, vector<8x256xf32> -> vector<8x256xf32>
    %287 = arith.addf %285, %286 : vector<8x256xf32>
    %288 = math.tanh %287 : vector<8x256xf32>
    %289 = arith.negf %287 : vector<8x256xf32>
    %290 = math.exp %289 : vector<8x256xf32>
    %cst_72 = arith.constant 1.000000e+00 : f32
    %291 = vector.broadcast %cst_72 : f32 to vector<8x256xf32>
    %292 = arith.addf %291, %290 : vector<8x256xf32>
    %293 = arith.divf %291, %292 : vector<8x256xf32>
    %294 = arith.select %21, %288, %293 : vector<8x256xi1>, vector<8x256xf32>
    %295 = vector.extract_strided_slice %294 {offsets = [0, 0], sizes = [8, 32], strides = [1, 1]} : vector<8x256xf32> to vector<8x32xf32>
    %296 = vector.extract_strided_slice %294 {offsets = [0, 128], sizes = [8, 32], strides = [1, 1]} : vector<8x256xf32> to vector<8x32xf32>
    %297 = tpu.concatenate %295, %296 in 1 : vector<8x32xf32>, vector<8x32xf32> -> vector<8x64xf32>
    %298 = vector.extract_strided_slice %294 {offsets = [0, 32], sizes = [8, 32], strides = [1, 1]} : vector<8x256xf32> to vector<8x32xf32>
    %299 = vector.extract_strided_slice %294 {offsets = [0, 160], sizes = [8, 32], strides = [1, 1]} : vector<8x256xf32> to vector<8x32xf32>
    %300 = tpu.concatenate %298, %299 in 1 : vector<8x32xf32>, vector<8x32xf32> -> vector<8x64xf32>
    %301 = vector.extract_strided_slice %294 {offsets = [0, 64], sizes = [8, 32], strides = [1, 1]} : vector<8x256xf32> to vector<8x32xf32>
    %302 = vector.extract_strided_slice %294 {offsets = [0, 192], sizes = [8, 32], strides = [1, 1]} : vector<8x256xf32> to vector<8x32xf32>
    %303 = tpu.concatenate %301, %302 in 1 : vector<8x32xf32>, vector<8x32xf32> -> vector<8x64xf32>
    %304 = vector.extract_strided_slice %294 {offsets = [0, 96], sizes = [8, 32], strides = [1, 1]} : vector<8x256xf32> to vector<8x32xf32>
    %305 = vector.extract_strided_slice %294 {offsets = [0, 224], sizes = [8, 32], strides = [1, 1]} : vector<8x256xf32> to vector<8x32xf32>
    %306 = tpu.concatenate %304, %305 in 1 : vector<8x32xf32>, vector<8x32xf32> -> vector<8x64xf32>
    %307 = arith.mulf %300, %268 : vector<8x64xf32>
    %308 = arith.mulf %297, %303 : vector<8x64xf32>
    %309 = arith.addf %307, %308 : vector<8x64xf32>
    %310 = math.tanh %309 : vector<8x64xf32>
    %311 = arith.mulf %306, %310 : vector<8x64xf32>
    %312 = arith.index_cast %277 : i32 to index
    %c0_73 = arith.constant 0 : index
    %313 = vector.load %arg1[%312, %c0_73] : memref<64x64xf32, #tpu.memory_space<vmem>>, vector<8x64xf32>
    %cst_74 = arith.constant 0.000000e+00 : f32
    %314 = vector.broadcast %cst_74 : f32 to vector<8x64xf32>
    %315 = arith.cmpf ogt, %313, %314 : vector<8x64xf32>
    %316 = arith.select %315, %311, %267 : vector<8x64xi1>, vector<8x64xf32>
    %317 = arith.select %315, %309, %268 : vector<8x64xi1>, vector<8x64xf32>
    %318 = arith.mulf %313, %311 : vector<8x64xf32>
    %319 = vector.extract_strided_slice %318 {offsets = [0, 0], sizes = [8, 32], strides = [1, 1]} : vector<8x64xf32> to vector<8x32xf32>
    %320 = arith.index_cast %277 : i32 to index
    %c0_75 = arith.constant 0 : index
    %321 = vector.load %arg15[%320, %c0_75] : memref<64x64xf32, #tpu.memory_space<vmem>>, vector<8x32xf32>
    tpu.vector_store %arg15[%320, %c0_75], %319 {strides = array<i32>} : memref<64x64xf32, #tpu.memory_space<vmem>>, vector<8x32xf32>,
    %322 = vector.extract_strided_slice %318 {offsets = [0, 32], sizes = [8, 32], strides = [1, 1]} : vector<8x64xf32> to vector<8x32xf32>
    %323 = arith.index_cast %280 : i32 to index
    %c32_76 = arith.constant 32 : index
    %324 = vector.load %arg15[%323, %c32_76] : memref<64x64xf32, #tpu.memory_space<vmem>>, vector<8x32xf32>
    tpu.vector_store %arg15[%323, %c32_76], %322 {strides = array<i32>} : memref<64x64xf32, #tpu.memory_space<vmem>>, vector<8x32xf32>,
    %c6_i32 = arith.constant 6 : i32
    %c8_i32_77 = arith.constant 8 : i32
    %325 = arith.muli %c6_i32, %c8_i32_77 : i32
    %326 = tpu.assume_multiple %325, 8 : i32
    %c7_i32_78 = arith.constant 7 : i32
    %327 = arith.subi %c7_i32_78, %c6_i32 : i32
    %c8_i32_79 = arith.constant 8 : i32
    %328 = arith.muli %327, %c8_i32_79 : i32
    %329 = tpu.assume_multiple %328, 8 : i32
    %330 = arith.index_cast %326 : i32 to index
    %c0_80 = arith.constant 0 : index
    %331 = vector.load %arg14[%330, %c0_80] : memref<64x256xf32, #tpu.memory_space<vmem>>, vector<8x128xf32>
    %332 = arith.index_cast %329 : i32 to index
    %c128_81 = arith.constant 128 : index
    %333 = vector.load %arg14[%332, %c128_81] : memref<64x256xf32, #tpu.memory_space<vmem>>, vector<8x128xf32>
    %334 = tpu.concatenate %331, %333 in 1 : vector<8x128xf32>, vector<8x128xf32> -> vector<8x256xf32>
    %cst_82 = arith.constant dense<0.000000e+00> : vector<8x256xf32>
    %335 = tpu.matmul %316, %29, %cst_82 {dimension_numbers = #tpu.dot_dimension_numbers<[1], [0], [0], [1], [0, 0, 1, 1], [], []>} : vector<8x64xf32>, vector<64x256xf32>, vector<8x256xf32> -> vector<8x256xf32>
    %336 = arith.addf %334, %335 : vector<8x256xf32>
    %337 = math.tanh %336 : vector<8x256xf32>
    %338 = arith.negf %336 : vector<8x256xf32>
    %339 = math.exp %338 : vector<8x256xf32>
    %cst_83 = arith.constant 1.000000e+00 : f32
    %340 = vector.broadcast %cst_83 : f32 to vector<8x256xf32>
    %341 = arith.addf %340, %339 : vector<8x256xf32>
    %342 = arith.divf %340, %341 : vector<8x256xf32>
    %343 = arith.select %21, %337, %342 : vector<8x256xi1>, vector<8x256xf32>
    %344 = vector.extract_strided_slice %343 {offsets = [0, 0], sizes = [8, 32], strides = [1, 1]} : vector<8x256xf32> to vector<8x32xf32>
    %345 = vector.extract_strided_slice %343 {offsets = [0, 128], sizes = [8, 32], strides = [1, 1]} : vector<8x256xf32> to vector<8x32xf32>
    %346 = tpu.concatenate %344, %345 in 1 : vector<8x32xf32>, vector<8x32xf32> -> vector<8x64xf32>
    %347 = vector.extract_strided_slice %343 {offsets = [0, 32], sizes = [8, 32], strides = [1, 1]} : vector<8x256xf32> to vector<8x32xf32>
    %348 = vector.extract_strided_slice %343 {offsets = [0, 160], sizes = [8, 32], strides = [1, 1]} : vector<8x256xf32> to vector<8x32xf32>
    %349 = tpu.concatenate %347, %348 in 1 : vector<8x32xf32>, vector<8x32xf32> -> vector<8x64xf32>
    %350 = vector.extract_strided_slice %343 {offsets = [0, 64], sizes = [8, 32], strides = [1, 1]} : vector<8x256xf32> to vector<8x32xf32>
    %351 = vector.extract_strided_slice %343 {offsets = [0, 192], sizes = [8, 32], strides = [1, 1]} : vector<8x256xf32> to vector<8x32xf32>
    %352 = tpu.concatenate %350, %351 in 1 : vector<8x32xf32>, vector<8x32xf32> -> vector<8x64xf32>
    %353 = vector.extract_strided_slice %343 {offsets = [0, 96], sizes = [8, 32], strides = [1, 1]} : vector<8x256xf32> to vector<8x32xf32>
    %354 = vector.extract_strided_slice %343 {offsets = [0, 224], sizes = [8, 32], strides = [1, 1]} : vector<8x256xf32> to vector<8x32xf32>
    %355 = tpu.concatenate %353, %354 in 1 : vector<8x32xf32>, vector<8x32xf32> -> vector<8x64xf32>
    %356 = arith.mulf %349, %317 : vector<8x64xf32>
    %357 = arith.mulf %346, %352 : vector<8x64xf32>
    %358 = arith.addf %356, %357 : vector<8x64xf32>
    %359 = math.tanh %358 : vector<8x64xf32>
    %360 = arith.mulf %355, %359 : vector<8x64xf32>
    %361 = arith.index_cast %326 : i32 to index
    %c0_84 = arith.constant 0 : index
    %362 = vector.load %arg1[%361, %c0_84] : memref<64x64xf32, #tpu.memory_space<vmem>>, vector<8x64xf32>
    %cst_85 = arith.constant 0.000000e+00 : f32
    %363 = vector.broadcast %cst_85 : f32 to vector<8x64xf32>
    %364 = arith.cmpf ogt, %362, %363 : vector<8x64xf32>
    %365 = arith.select %364, %360, %316 : vector<8x64xi1>, vector<8x64xf32>
    %366 = arith.select %364, %358, %317 : vector<8x64xi1>, vector<8x64xf32>
    %367 = arith.mulf %362, %360 : vector<8x64xf32>
    %368 = vector.extract_strided_slice %367 {offsets = [0, 0], sizes = [8, 32], strides = [1, 1]} : vector<8x64xf32> to vector<8x32xf32>
    %369 = arith.index_cast %326 : i32 to index
    %c0_86 = arith.constant 0 : index
    %370 = vector.load %arg15[%369, %c0_86] : memref<64x64xf32, #tpu.memory_space<vmem>>, vector<8x32xf32>
    tpu.vector_store %arg15[%369, %c0_86], %368 {strides = array<i32>} : memref<64x64xf32, #tpu.memory_space<vmem>>, vector<8x32xf32>,
    %371 = vector.extract_strided_slice %367 {offsets = [0, 32], sizes = [8, 32], strides = [1, 1]} : vector<8x64xf32> to vector<8x32xf32>
    %372 = arith.index_cast %329 : i32 to index
    %c32_87 = arith.constant 32 : index
    %373 = vector.load %arg15[%372, %c32_87] : memref<64x64xf32, #tpu.memory_space<vmem>>, vector<8x32xf32>
    tpu.vector_store %arg15[%372, %c32_87], %371 {strides = array<i32>} : memref<64x64xf32, #tpu.memory_space<vmem>>, vector<8x32xf32>,
    %c7_i32_88 = arith.constant 7 : i32
    %c8_i32_89 = arith.constant 8 : i32
    %374 = arith.muli %c7_i32_88, %c8_i32_89 : i32
    %375 = tpu.assume_multiple %374, 8 : i32
    %c7_i32_90 = arith.constant 7 : i32
    %376 = arith.subi %c7_i32_90, %c7_i32_88 : i32
    %c8_i32_91 = arith.constant 8 : i32
    %377 = arith.muli %376, %c8_i32_91 : i32
    %378 = tpu.assume_multiple %377, 8 : i32
    %379 = arith.index_cast %375 : i32 to index
    %c0_92 = arith.constant 0 : index
    %380 = vector.load %arg14[%379, %c0_92] : memref<64x256xf32, #tpu.memory_space<vmem>>, vector<8x128xf32>
    %381 = arith.index_cast %378 : i32 to index
    %c128_93 = arith.constant 128 : index
    %382 = vector.load %arg14[%381, %c128_93] : memref<64x256xf32, #tpu.memory_space<vmem>>, vector<8x128xf32>
    %383 = tpu.concatenate %380, %382 in 1 : vector<8x128xf32>, vector<8x128xf32> -> vector<8x256xf32>
    %cst_94 = arith.constant dense<0.000000e+00> : vector<8x256xf32>
    %384 = tpu.matmul %365, %29, %cst_94 {dimension_numbers = #tpu.dot_dimension_numbers<[1], [0], [0], [1], [0, 0, 1, 1], [], []>} : vector<8x64xf32>, vector<64x256xf32>, vector<8x256xf32> -> vector<8x256xf32>
    %385 = arith.addf %383, %384 : vector<8x256xf32>
    %386 = math.tanh %385 : vector<8x256xf32>
    %387 = arith.negf %385 : vector<8x256xf32>
    %388 = math.exp %387 : vector<8x256xf32>
    %cst_95 = arith.constant 1.000000e+00 : f32
    %389 = vector.broadcast %cst_95 : f32 to vector<8x256xf32>
    %390 = arith.addf %389, %388 : vector<8x256xf32>
    %391 = arith.divf %389, %390 : vector<8x256xf32>
    %392 = arith.select %21, %386, %391 : vector<8x256xi1>, vector<8x256xf32>
    %393 = vector.extract_strided_slice %392 {offsets = [0, 0], sizes = [8, 32], strides = [1, 1]} : vector<8x256xf32> to vector<8x32xf32>
    %394 = vector.extract_strided_slice %392 {offsets = [0, 128], sizes = [8, 32], strides = [1, 1]} : vector<8x256xf32> to vector<8x32xf32>
    %395 = tpu.concatenate %393, %394 in 1 : vector<8x32xf32>, vector<8x32xf32> -> vector<8x64xf32>
    %396 = vector.extract_strided_slice %392 {offsets = [0, 32], sizes = [8, 32], strides = [1, 1]} : vector<8x256xf32> to vector<8x32xf32>
    %397 = vector.extract_strided_slice %392 {offsets = [0, 160], sizes = [8, 32], strides = [1, 1]} : vector<8x256xf32> to vector<8x32xf32>
    %398 = tpu.concatenate %396, %397 in 1 : vector<8x32xf32>, vector<8x32xf32> -> vector<8x64xf32>
    %399 = vector.extract_strided_slice %392 {offsets = [0, 64], sizes = [8, 32], strides = [1, 1]} : vector<8x256xf32> to vector<8x32xf32>
    %400 = vector.extract_strided_slice %392 {offsets = [0, 192], sizes = [8, 32], strides = [1, 1]} : vector<8x256xf32> to vector<8x32xf32>
    %401 = tpu.concatenate %399, %400 in 1 : vector<8x32xf32>, vector<8x32xf32> -> vector<8x64xf32>
    %402 = vector.extract_strided_slice %392 {offsets = [0, 96], sizes = [8, 32], strides = [1, 1]} : vector<8x256xf32> to vector<8x32xf32>
    %403 = vector.extract_strided_slice %392 {offsets = [0, 224], sizes = [8, 32], strides = [1, 1]} : vector<8x256xf32> to vector<8x32xf32>
    %404 = tpu.concatenate %402, %403 in 1 : vector<8x32xf32>, vector<8x32xf32> -> vector<8x64xf32>
    %405 = arith.mulf %398, %366 : vector<8x64xf32>
    %406 = arith.mulf %395, %401 : vector<8x64xf32>
    %407 = arith.addf %405, %406 : vector<8x64xf32>
    %408 = math.tanh %407 : vector<8x64xf32>
    %409 = arith.mulf %404, %408 : vector<8x64xf32>
    %410 = arith.index_cast %375 : i32 to index
    %c0_96 = arith.constant 0 : index
    %411 = vector.load %arg1[%410, %c0_96] : memref<64x64xf32, #tpu.memory_space<vmem>>, vector<8x64xf32>
    %cst_97 = arith.constant 0.000000e+00 : f32
    %412 = vector.broadcast %cst_97 : f32 to vector<8x64xf32>
    %413 = arith.cmpf ogt, %411, %412 : vector<8x64xf32>
    %414 = arith.select %413, %409, %365 : vector<8x64xi1>, vector<8x64xf32>
    %415 = arith.select %413, %407, %366 : vector<8x64xi1>, vector<8x64xf32>
    %416 = arith.mulf %411, %409 : vector<8x64xf32>
    %417 = vector.extract_strided_slice %416 {offsets = [0, 0], sizes = [8, 32], strides = [1, 1]} : vector<8x64xf32> to vector<8x32xf32>
    %418 = arith.index_cast %375 : i32 to index
    %c0_98 = arith.constant 0 : index
    %419 = vector.load %arg15[%418, %c0_98] : memref<64x64xf32, #tpu.memory_space<vmem>>, vector<8x32xf32>
    tpu.vector_store %arg15[%418, %c0_98], %417 {strides = array<i32>} : memref<64x64xf32, #tpu.memory_space<vmem>>, vector<8x32xf32>,
    %420 = vector.extract_strided_slice %416 {offsets = [0, 32], sizes = [8, 32], strides = [1, 1]} : vector<8x64xf32> to vector<8x32xf32>
    %421 = arith.index_cast %378 : i32 to index
    %c32_99 = arith.constant 32 : index
    %422 = vector.load %arg15[%421, %c32_99] : memref<64x64xf32, #tpu.memory_space<vmem>>, vector<8x32xf32>
    tpu.vector_store %arg15[%421, %c32_99], %420 {strides = array<i32>} : memref<64x64xf32, #tpu.memory_space<vmem>>, vector<8x32xf32>,
    %c8_i32_100 = arith.constant 8 : i32
    %c0_101 = arith.constant 0 : index
    %c0_102 = arith.constant 0 : index
    %423 = vector.load %arg15[%c0_101, %c0_102] : memref<64x64xf32, #tpu.memory_space<vmem>>, vector<64x64xf32>
    %c0_103 = arith.constant 0 : index
    %c0_104 = arith.constant 0 : index
    %424 = vector.load %arg5[%c0_103, %c0_104] : memref<64x256xf32, #tpu.memory_space<vmem>>, vector<64x256xf32>
    %cst_105 = arith.constant dense<0.000000e+00> : vector<64x256xf32>
    %425 = tpu.matmul %423, %424, %cst_105 {dimension_numbers = #tpu.dot_dimension_numbers<[1], [0], [0], [1], [0, 0, 1, 1], [], []>} : vector<64x64xf32>, vector<64x256xf32>, vector<64x256xf32> -> vector<64x256xf32>
    %c0_106 = arith.constant 0 : index
    %c0_107 = arith.constant 0 : index
    %426 = vector.load %arg7[%c0_106, %c0_107] : memref<1x256xf32, #tpu.memory_space<vmem>>, vector<1x256xf32>
    %427 = vector.broadcast %426 : vector<1x256xf32> to vector<64x256xf32>
    %428 = arith.addf %425, %427 : vector<64x256xf32>
    %c0_108 = arith.constant 0 : index
    %c0_109 = arith.constant 0 : index
    %429 = vector.load %arg14[%c0_108, %c0_109] : memref<64x256xf32, #tpu.memory_space<vmem>>, vector<64x256xf32>
    tpu.vector_store %arg14[%c0_108, %c0_109], %428 {strides = array<i32>} : memref<64x256xf32, #tpu.memory_space<vmem>>, vector<64x256xf32>,
    %c0_110 = arith.constant 0 : index
    %c0_111 = arith.constant 0 : index
    %430 = vector.load %arg6[%c0_110, %c0_111] : memref<64x256xf32, #tpu.memory_space<vmem>>, vector<64x256xf32>
    %cst_112 = arith.constant 0.000000e+00 : f32
    %431 = vector.broadcast %cst_112 : f32 to vector<8x64xf32>
    %c0_i32_113 = arith.constant 0 : i32
    %c8_i32_114 = arith.constant 8 : i32
    %432 = arith.muli %c0_i32_113, %c8_i32_114 : i32
    %433 = tpu.assume_multiple %432, 8 : i32
    %c7_i32_115 = arith.constant 7 : i32
    %434 = arith.subi %c7_i32_115, %c0_i32_113 : i32
    %c8_i32_116 = arith.constant 8 : i32
    %435 = arith.muli %434, %c8_i32_116 : i32
    %436 = tpu.assume_multiple %435, 8 : i32
    %437 = arith.index_cast %433 : i32 to index
    %c0_117 = arith.constant 0 : index
    %438 = vector.load %arg14[%437, %c0_117] : memref<64x256xf32, #tpu.memory_space<vmem>>, vector<8x128xf32>
    %439 = arith.index_cast %436 : i32 to index
    %c128_118 = arith.constant 128 : index
    %440 = vector.load %arg14[%439, %c128_118] : memref<64x256xf32, #tpu.memory_space<vmem>>, vector<8x128xf32>
    %441 = tpu.concatenate %438, %440 in 1 : vector<8x128xf32>, vector<8x128xf32> -> vector<8x256xf32>
    %cst_119 = arith.constant dense<0.000000e+00> : vector<8x256xf32>
    %442 = tpu.matmul %431, %430, %cst_119 {dimension_numbers = #tpu.dot_dimension_numbers<[1], [0], [0], [1], [0, 0, 1, 1], [], []>} : vector<8x64xf32>, vector<64x256xf32>, vector<8x256xf32> -> vector<8x256xf32>
    %443 = arith.addf %441, %442 : vector<8x256xf32>
    %444 = math.tanh %443 : vector<8x256xf32>
    %445 = arith.negf %443 : vector<8x256xf32>
    %446 = math.exp %445 : vector<8x256xf32>
    %cst_120 = arith.constant 1.000000e+00 : f32
    %447 = vector.broadcast %cst_120 : f32 to vector<8x256xf32>
    %448 = arith.addf %447, %446 : vector<8x256xf32>
    %449 = arith.divf %447, %448 : vector<8x256xf32>
    %450 = arith.select %21, %444, %449 : vector<8x256xi1>, vector<8x256xf32>
    %451 = vector.extract_strided_slice %450 {offsets = [0, 0], sizes = [8, 32], strides = [1, 1]} : vector<8x256xf32> to vector<8x32xf32>
    %452 = vector.extract_strided_slice %450 {offsets = [0, 128], sizes = [8, 32], strides = [1, 1]} : vector<8x256xf32> to vector<8x32xf32>
    %453 = tpu.concatenate %451, %452 in 1 : vector<8x32xf32>, vector<8x32xf32> -> vector<8x64xf32>
    %454 = vector.extract_strided_slice %450 {offsets = [0, 32], sizes = [8, 32], strides = [1, 1]} : vector<8x256xf32> to vector<8x32xf32>
    %455 = vector.extract_strided_slice %450 {offsets = [0, 160], sizes = [8, 32], strides = [1, 1]} : vector<8x256xf32> to vector<8x32xf32>
    %456 = tpu.concatenate %454, %455 in 1 : vector<8x32xf32>, vector<8x32xf32> -> vector<8x64xf32>
    %457 = vector.extract_strided_slice %450 {offsets = [0, 64], sizes = [8, 32], strides = [1, 1]} : vector<8x256xf32> to vector<8x32xf32>
    %458 = vector.extract_strided_slice %450 {offsets = [0, 192], sizes = [8, 32], strides = [1, 1]} : vector<8x256xf32> to vector<8x32xf32>
    %459 = tpu.concatenate %457, %458 in 1 : vector<8x32xf32>, vector<8x32xf32> -> vector<8x64xf32>
    %460 = vector.extract_strided_slice %450 {offsets = [0, 96], sizes = [8, 32], strides = [1, 1]} : vector<8x256xf32> to vector<8x32xf32>
    %461 = vector.extract_strided_slice %450 {offsets = [0, 224], sizes = [8, 32], strides = [1, 1]} : vector<8x256xf32> to vector<8x32xf32>
    %462 = tpu.concatenate %460, %461 in 1 : vector<8x32xf32>, vector<8x32xf32> -> vector<8x64xf32>
    %463 = arith.mulf %456, %431 : vector<8x64xf32>
    %464 = arith.mulf %453, %459 : vector<8x64xf32>
    %465 = arith.addf %463, %464 : vector<8x64xf32>
    %466 = math.tanh %465 : vector<8x64xf32>
    %467 = arith.mulf %462, %466 : vector<8x64xf32>
    %468 = arith.index_cast %433 : i32 to index
    %c0_121 = arith.constant 0 : index
    %469 = vector.load %arg1[%468, %c0_121] : memref<64x64xf32, #tpu.memory_space<vmem>>, vector<8x64xf32>
    %cst_122 = arith.constant 0.000000e+00 : f32
    %470 = vector.broadcast %cst_122 : f32 to vector<8x64xf32>
    %471 = arith.cmpf ogt, %469, %470 : vector<8x64xf32>
    %472 = arith.select %471, %467, %431 : vector<8x64xi1>, vector<8x64xf32>
    %473 = arith.select %471, %465, %431 : vector<8x64xi1>, vector<8x64xf32>
    %474 = arith.mulf %469, %467 : vector<8x64xf32>
    %475 = vector.extract_strided_slice %474 {offsets = [0, 0], sizes = [8, 32], strides = [1, 1]} : vector<8x64xf32> to vector<8x32xf32>
    %476 = arith.index_cast %433 : i32 to index
    %c0_123 = arith.constant 0 : index
    %477 = vector.load %arg16[%476, %c0_123] : memref<64x64xf32, #tpu.memory_space<vmem>>, vector<8x32xf32>
    tpu.vector_store %arg16[%476, %c0_123], %475 {strides = array<i32>} : memref<64x64xf32, #tpu.memory_space<vmem>>, vector<8x32xf32>,
    %478 = vector.extract_strided_slice %474 {offsets = [0, 32], sizes = [8, 32], strides = [1, 1]} : vector<8x64xf32> to vector<8x32xf32>
    %479 = arith.index_cast %436 : i32 to index
    %c32_124 = arith.constant 32 : index
    %480 = vector.load %arg16[%479, %c32_124] : memref<64x64xf32, #tpu.memory_space<vmem>>, vector<8x32xf32>
    tpu.vector_store %arg16[%479, %c32_124], %478 {strides = array<i32>} : memref<64x64xf32, #tpu.memory_space<vmem>>, vector<8x32xf32>,
    %c1_i32_125 = arith.constant 1 : i32
    %c8_i32_126 = arith.constant 8 : i32
    %481 = arith.muli %c1_i32_125, %c8_i32_126 : i32
    %482 = tpu.assume_multiple %481, 8 : i32
    %c7_i32_127 = arith.constant 7 : i32
    %483 = arith.subi %c7_i32_127, %c1_i32_125 : i32
    %c8_i32_128 = arith.constant 8 : i32
    %484 = arith.muli %483, %c8_i32_128 : i32
    %485 = tpu.assume_multiple %484, 8 : i32
    %486 = arith.index_cast %482 : i32 to index
    %c0_129 = arith.constant 0 : index
    %487 = vector.load %arg14[%486, %c0_129] : memref<64x256xf32, #tpu.memory_space<vmem>>, vector<8x128xf32>
    %488 = arith.index_cast %485 : i32 to index
    %c128_130 = arith.constant 128 : index
    %489 = vector.load %arg14[%488, %c128_130] : memref<64x256xf32, #tpu.memory_space<vmem>>, vector<8x128xf32>
    %490 = tpu.concatenate %487, %489 in 1 : vector<8x128xf32>, vector<8x128xf32> -> vector<8x256xf32>
    %cst_131 = arith.constant dense<0.000000e+00> : vector<8x256xf32>
    %491 = tpu.matmul %472, %430, %cst_131 {dimension_numbers = #tpu.dot_dimension_numbers<[1], [0], [0], [1], [0, 0, 1, 1], [], []>} : vector<8x64xf32>, vector<64x256xf32>, vector<8x256xf32> -> vector<8x256xf32>
    %492 = arith.addf %490, %491 : vector<8x256xf32>
    %493 = math.tanh %492 : vector<8x256xf32>
    %494 = arith.negf %492 : vector<8x256xf32>
    %495 = math.exp %494 : vector<8x256xf32>
    %cst_132 = arith.constant 1.000000e+00 : f32
    %496 = vector.broadcast %cst_132 : f32 to vector<8x256xf32>
    %497 = arith.addf %496, %495 : vector<8x256xf32>
    %498 = arith.divf %496, %497 : vector<8x256xf32>
    %499 = arith.select %21, %493, %498 : vector<8x256xi1>, vector<8x256xf32>
    %500 = vector.extract_strided_slice %499 {offsets = [0, 0], sizes = [8, 32], strides = [1, 1]} : vector<8x256xf32> to vector<8x32xf32>
    %501 = vector.extract_strided_slice %499 {offsets = [0, 128], sizes = [8, 32], strides = [1, 1]} : vector<8x256xf32> to vector<8x32xf32>
    %502 = tpu.concatenate %500, %501 in 1 : vector<8x32xf32>, vector<8x32xf32> -> vector<8x64xf32>
    %503 = vector.extract_strided_slice %499 {offsets = [0, 32], sizes = [8, 32], strides = [1, 1]} : vector<8x256xf32> to vector<8x32xf32>
    %504 = vector.extract_strided_slice %499 {offsets = [0, 160], sizes = [8, 32], strides = [1, 1]} : vector<8x256xf32> to vector<8x32xf32>
    %505 = tpu.concatenate %503, %504 in 1 : vector<8x32xf32>, vector<8x32xf32> -> vector<8x64xf32>
    %506 = vector.extract_strided_slice %499 {offsets = [0, 64], sizes = [8, 32], strides = [1, 1]} : vector<8x256xf32> to vector<8x32xf32>
    %507 = vector.extract_strided_slice %499 {offsets = [0, 192], sizes = [8, 32], strides = [1, 1]} : vector<8x256xf32> to vector<8x32xf32>
    %508 = tpu.concatenate %506, %507 in 1 : vector<8x32xf32>, vector<8x32xf32> -> vector<8x64xf32>
    %509 = vector.extract_strided_slice %499 {offsets = [0, 96], sizes = [8, 32], strides = [1, 1]} : vector<8x256xf32> to vector<8x32xf32>
    %510 = vector.extract_strided_slice %499 {offsets = [0, 224], sizes = [8, 32], strides = [1, 1]} : vector<8x256xf32> to vector<8x32xf32>
    %511 = tpu.concatenate %509, %510 in 1 : vector<8x32xf32>, vector<8x32xf32> -> vector<8x64xf32>
    %512 = arith.mulf %505, %473 : vector<8x64xf32>
    %513 = arith.mulf %502, %508 : vector<8x64xf32>
    %514 = arith.addf %512, %513 : vector<8x64xf32>
    %515 = math.tanh %514 : vector<8x64xf32>
    %516 = arith.mulf %511, %515 : vector<8x64xf32>
    %517 = arith.index_cast %482 : i32 to index
    %c0_133 = arith.constant 0 : index
    %518 = vector.load %arg1[%517, %c0_133] : memref<64x64xf32, #tpu.memory_space<vmem>>, vector<8x64xf32>
    %cst_134 = arith.constant 0.000000e+00 : f32
    %519 = vector.broadcast %cst_134 : f32 to vector<8x64xf32>
    %520 = arith.cmpf ogt, %518, %519 : vector<8x64xf32>
    %521 = arith.select %520, %516, %472 : vector<8x64xi1>, vector<8x64xf32>
    %522 = arith.select %520, %514, %473 : vector<8x64xi1>, vector<8x64xf32>
    %523 = arith.mulf %518, %516 : vector<8x64xf32>
    %524 = vector.extract_strided_slice %523 {offsets = [0, 0], sizes = [8, 32], strides = [1, 1]} : vector<8x64xf32> to vector<8x32xf32>
    %525 = arith.index_cast %482 : i32 to index
    %c0_135 = arith.constant 0 : index
    %526 = vector.load %arg16[%525, %c0_135] : memref<64x64xf32, #tpu.memory_space<vmem>>, vector<8x32xf32>
    tpu.vector_store %arg16[%525, %c0_135], %524 {strides = array<i32>} : memref<64x64xf32, #tpu.memory_space<vmem>>, vector<8x32xf32>,
    %527 = vector.extract_strided_slice %523 {offsets = [0, 32], sizes = [8, 32], strides = [1, 1]} : vector<8x64xf32> to vector<8x32xf32>
    %528 = arith.index_cast %485 : i32 to index
    %c32_136 = arith.constant 32 : index
    %529 = vector.load %arg16[%528, %c32_136] : memref<64x64xf32, #tpu.memory_space<vmem>>, vector<8x32xf32>
    tpu.vector_store %arg16[%528, %c32_136], %527 {strides = array<i32>} : memref<64x64xf32, #tpu.memory_space<vmem>>, vector<8x32xf32>,
    %c2_i32_137 = arith.constant 2 : i32
    %c8_i32_138 = arith.constant 8 : i32
    %530 = arith.muli %c2_i32_137, %c8_i32_138 : i32
    %531 = tpu.assume_multiple %530, 8 : i32
    %c7_i32_139 = arith.constant 7 : i32
    %532 = arith.subi %c7_i32_139, %c2_i32_137 : i32
    %c8_i32_140 = arith.constant 8 : i32
    %533 = arith.muli %532, %c8_i32_140 : i32
    %534 = tpu.assume_multiple %533, 8 : i32
    %535 = arith.index_cast %531 : i32 to index
    %c0_141 = arith.constant 0 : index
    %536 = vector.load %arg14[%535, %c0_141] : memref<64x256xf32, #tpu.memory_space<vmem>>, vector<8x128xf32>
    %537 = arith.index_cast %534 : i32 to index
    %c128_142 = arith.constant 128 : index
    %538 = vector.load %arg14[%537, %c128_142] : memref<64x256xf32, #tpu.memory_space<vmem>>, vector<8x128xf32>
    %539 = tpu.concatenate %536, %538 in 1 : vector<8x128xf32>, vector<8x128xf32> -> vector<8x256xf32>
    %cst_143 = arith.constant dense<0.000000e+00> : vector<8x256xf32>
    %540 = tpu.matmul %521, %430, %cst_143 {dimension_numbers = #tpu.dot_dimension_numbers<[1], [0], [0], [1], [0, 0, 1, 1], [], []>} : vector<8x64xf32>, vector<64x256xf32>, vector<8x256xf32> -> vector<8x256xf32>
    %541 = arith.addf %539, %540 : vector<8x256xf32>
    %542 = math.tanh %541 : vector<8x256xf32>
    %543 = arith.negf %541 : vector<8x256xf32>
    %544 = math.exp %543 : vector<8x256xf32>
    %cst_144 = arith.constant 1.000000e+00 : f32
    %545 = vector.broadcast %cst_144 : f32 to vector<8x256xf32>
    %546 = arith.addf %545, %544 : vector<8x256xf32>
    %547 = arith.divf %545, %546 : vector<8x256xf32>
    %548 = arith.select %21, %542, %547 : vector<8x256xi1>, vector<8x256xf32>
    %549 = vector.extract_strided_slice %548 {offsets = [0, 0], sizes = [8, 32], strides = [1, 1]} : vector<8x256xf32> to vector<8x32xf32>
    %550 = vector.extract_strided_slice %548 {offsets = [0, 128], sizes = [8, 32], strides = [1, 1]} : vector<8x256xf32> to vector<8x32xf32>
    %551 = tpu.concatenate %549, %550 in 1 : vector<8x32xf32>, vector<8x32xf32> -> vector<8x64xf32>
    %552 = vector.extract_strided_slice %548 {offsets = [0, 32], sizes = [8, 32], strides = [1, 1]} : vector<8x256xf32> to vector<8x32xf32>
    %553 = vector.extract_strided_slice %548 {offsets = [0, 160], sizes = [8, 32], strides = [1, 1]} : vector<8x256xf32> to vector<8x32xf32>
    %554 = tpu.concatenate %552, %553 in 1 : vector<8x32xf32>, vector<8x32xf32> -> vector<8x64xf32>
    %555 = vector.extract_strided_slice %548 {offsets = [0, 64], sizes = [8, 32], strides = [1, 1]} : vector<8x256xf32> to vector<8x32xf32>
    %556 = vector.extract_strided_slice %548 {offsets = [0, 192], sizes = [8, 32], strides = [1, 1]} : vector<8x256xf32> to vector<8x32xf32>
    %557 = tpu.concatenate %555, %556 in 1 : vector<8x32xf32>, vector<8x32xf32> -> vector<8x64xf32>
    %558 = vector.extract_strided_slice %548 {offsets = [0, 96], sizes = [8, 32], strides = [1, 1]} : vector<8x256xf32> to vector<8x32xf32>
    %559 = vector.extract_strided_slice %548 {offsets = [0, 224], sizes = [8, 32], strides = [1, 1]} : vector<8x256xf32> to vector<8x32xf32>
    %560 = tpu.concatenate %558, %559 in 1 : vector<8x32xf32>, vector<8x32xf32> -> vector<8x64xf32>
    %561 = arith.mulf %554, %522 : vector<8x64xf32>
    %562 = arith.mulf %551, %557 : vector<8x64xf32>
    %563 = arith.addf %561, %562 : vector<8x64xf32>
    %564 = math.tanh %563 : vector<8x64xf32>
    %565 = arith.mulf %560, %564 : vector<8x64xf32>
    %566 = arith.index_cast %531 : i32 to index
    %c0_145 = arith.constant 0 : index
    %567 = vector.load %arg1[%566, %c0_145] : memref<64x64xf32, #tpu.memory_space<vmem>>, vector<8x64xf32>
    %cst_146 = arith.constant 0.000000e+00 : f32
    %568 = vector.broadcast %cst_146 : f32 to vector<8x64xf32>
    %569 = arith.cmpf ogt, %567, %568 : vector<8x64xf32>
    %570 = arith.select %569, %565, %521 : vector<8x64xi1>, vector<8x64xf32>
    %571 = arith.select %569, %563, %522 : vector<8x64xi1>, vector<8x64xf32>
    %572 = arith.mulf %567, %565 : vector<8x64xf32>
    %573 = vector.extract_strided_slice %572 {offsets = [0, 0], sizes = [8, 32], strides = [1, 1]} : vector<8x64xf32> to vector<8x32xf32>
    %574 = arith.index_cast %531 : i32 to index
    %c0_147 = arith.constant 0 : index
    %575 = vector.load %arg16[%574, %c0_147] : memref<64x64xf32, #tpu.memory_space<vmem>>, vector<8x32xf32>
    tpu.vector_store %arg16[%574, %c0_147], %573 {strides = array<i32>} : memref<64x64xf32, #tpu.memory_space<vmem>>, vector<8x32xf32>,
    %576 = vector.extract_strided_slice %572 {offsets = [0, 32], sizes = [8, 32], strides = [1, 1]} : vector<8x64xf32> to vector<8x32xf32>
    %577 = arith.index_cast %534 : i32 to index
    %c32_148 = arith.constant 32 : index
    %578 = vector.load %arg16[%577, %c32_148] : memref<64x64xf32, #tpu.memory_space<vmem>>, vector<8x32xf32>
    tpu.vector_store %arg16[%577, %c32_148], %576 {strides = array<i32>} : memref<64x64xf32, #tpu.memory_space<vmem>>, vector<8x32xf32>,
    %c3_i32_149 = arith.constant 3 : i32
    %c8_i32_150 = arith.constant 8 : i32
    %579 = arith.muli %c3_i32_149, %c8_i32_150 : i32
    %580 = tpu.assume_multiple %579, 8 : i32
    %c7_i32_151 = arith.constant 7 : i32
    %581 = arith.subi %c7_i32_151, %c3_i32_149 : i32
    %c8_i32_152 = arith.constant 8 : i32
    %582 = arith.muli %581, %c8_i32_152 : i32
    %583 = tpu.assume_multiple %582, 8 : i32
    %584 = arith.index_cast %580 : i32 to index
    %c0_153 = arith.constant 0 : index
    %585 = vector.load %arg14[%584, %c0_153] : memref<64x256xf32, #tpu.memory_space<vmem>>, vector<8x128xf32>
    %586 = arith.index_cast %583 : i32 to index
    %c128_154 = arith.constant 128 : index
    %587 = vector.load %arg14[%586, %c128_154] : memref<64x256xf32, #tpu.memory_space<vmem>>, vector<8x128xf32>
    %588 = tpu.concatenate %585, %587 in 1 : vector<8x128xf32>, vector<8x128xf32> -> vector<8x256xf32>
    %cst_155 = arith.constant dense<0.000000e+00> : vector<8x256xf32>
    %589 = tpu.matmul %570, %430, %cst_155 {dimension_numbers = #tpu.dot_dimension_numbers<[1], [0], [0], [1], [0, 0, 1, 1], [], []>} : vector<8x64xf32>, vector<64x256xf32>, vector<8x256xf32> -> vector<8x256xf32>
    %590 = arith.addf %588, %589 : vector<8x256xf32>
    %591 = math.tanh %590 : vector<8x256xf32>
    %592 = arith.negf %590 : vector<8x256xf32>
    %593 = math.exp %592 : vector<8x256xf32>
    %cst_156 = arith.constant 1.000000e+00 : f32
    %594 = vector.broadcast %cst_156 : f32 to vector<8x256xf32>
    %595 = arith.addf %594, %593 : vector<8x256xf32>
    %596 = arith.divf %594, %595 : vector<8x256xf32>
    %597 = arith.select %21, %591, %596 : vector<8x256xi1>, vector<8x256xf32>
    %598 = vector.extract_strided_slice %597 {offsets = [0, 0], sizes = [8, 32], strides = [1, 1]} : vector<8x256xf32> to vector<8x32xf32>
    %599 = vector.extract_strided_slice %597 {offsets = [0, 128], sizes = [8, 32], strides = [1, 1]} : vector<8x256xf32> to vector<8x32xf32>
    %600 = tpu.concatenate %598, %599 in 1 : vector<8x32xf32>, vector<8x32xf32> -> vector<8x64xf32>
    %601 = vector.extract_strided_slice %597 {offsets = [0, 32], sizes = [8, 32], strides = [1, 1]} : vector<8x256xf32> to vector<8x32xf32>
    %602 = vector.extract_strided_slice %597 {offsets = [0, 160], sizes = [8, 32], strides = [1, 1]} : vector<8x256xf32> to vector<8x32xf32>
    %603 = tpu.concatenate %601, %602 in 1 : vector<8x32xf32>, vector<8x32xf32> -> vector<8x64xf32>
    %604 = vector.extract_strided_slice %597 {offsets = [0, 64], sizes = [8, 32], strides = [1, 1]} : vector<8x256xf32> to vector<8x32xf32>
    %605 = vector.extract_strided_slice %597 {offsets = [0, 192], sizes = [8, 32], strides = [1, 1]} : vector<8x256xf32> to vector<8x32xf32>
    %606 = tpu.concatenate %604, %605 in 1 : vector<8x32xf32>, vector<8x32xf32> -> vector<8x64xf32>
    %607 = vector.extract_strided_slice %597 {offsets = [0, 96], sizes = [8, 32], strides = [1, 1]} : vector<8x256xf32> to vector<8x32xf32>
    %608 = vector.extract_strided_slice %597 {offsets = [0, 224], sizes = [8, 32], strides = [1, 1]} : vector<8x256xf32> to vector<8x32xf32>
    %609 = tpu.concatenate %607, %608 in 1 : vector<8x32xf32>, vector<8x32xf32> -> vector<8x64xf32>
    %610 = arith.mulf %603, %571 : vector<8x64xf32>
    %611 = arith.mulf %600, %606 : vector<8x64xf32>
    %612 = arith.addf %610, %611 : vector<8x64xf32>
    %613 = math.tanh %612 : vector<8x64xf32>
    %614 = arith.mulf %609, %613 : vector<8x64xf32>
    %615 = arith.index_cast %580 : i32 to index
    %c0_157 = arith.constant 0 : index
    %616 = vector.load %arg1[%615, %c0_157] : memref<64x64xf32, #tpu.memory_space<vmem>>, vector<8x64xf32>
    %cst_158 = arith.constant 0.000000e+00 : f32
    %617 = vector.broadcast %cst_158 : f32 to vector<8x64xf32>
    %618 = arith.cmpf ogt, %616, %617 : vector<8x64xf32>
    %619 = arith.select %618, %614, %570 : vector<8x64xi1>, vector<8x64xf32>
    %620 = arith.select %618, %612, %571 : vector<8x64xi1>, vector<8x64xf32>
    %621 = arith.mulf %616, %614 : vector<8x64xf32>
    %622 = vector.extract_strided_slice %621 {offsets = [0, 0], sizes = [8, 32], strides = [1, 1]} : vector<8x64xf32> to vector<8x32xf32>
    %623 = arith.index_cast %580 : i32 to index
    %c0_159 = arith.constant 0 : index
    %624 = vector.load %arg16[%623, %c0_159] : memref<64x64xf32, #tpu.memory_space<vmem>>, vector<8x32xf32>
    tpu.vector_store %arg16[%623, %c0_159], %622 {strides = array<i32>} : memref<64x64xf32, #tpu.memory_space<vmem>>, vector<8x32xf32>,
    %625 = vector.extract_strided_slice %621 {offsets = [0, 32], sizes = [8, 32], strides = [1, 1]} : vector<8x64xf32> to vector<8x32xf32>
    %626 = arith.index_cast %583 : i32 to index
    %c32_160 = arith.constant 32 : index
    %627 = vector.load %arg16[%626, %c32_160] : memref<64x64xf32, #tpu.memory_space<vmem>>, vector<8x32xf32>
    tpu.vector_store %arg16[%626, %c32_160], %625 {strides = array<i32>} : memref<64x64xf32, #tpu.memory_space<vmem>>, vector<8x32xf32>,
    %c4_i32_161 = arith.constant 4 : i32
    %c8_i32_162 = arith.constant 8 : i32
    %628 = arith.muli %c4_i32_161, %c8_i32_162 : i32
    %629 = tpu.assume_multiple %628, 8 : i32
    %c7_i32_163 = arith.constant 7 : i32
    %630 = arith.subi %c7_i32_163, %c4_i32_161 : i32
    %c8_i32_164 = arith.constant 8 : i32
    %631 = arith.muli %630, %c8_i32_164 : i32
    %632 = tpu.assume_multiple %631, 8 : i32
    %633 = arith.index_cast %629 : i32 to index
    %c0_165 = arith.constant 0 : index
    %634 = vector.load %arg14[%633, %c0_165] : memref<64x256xf32, #tpu.memory_space<vmem>>, vector<8x128xf32>
    %635 = arith.index_cast %632 : i32 to index
    %c128_166 = arith.constant 128 : index
    %636 = vector.load %arg14[%635, %c128_166] : memref<64x256xf32, #tpu.memory_space<vmem>>, vector<8x128xf32>
    %637 = tpu.concatenate %634, %636 in 1 : vector<8x128xf32>, vector<8x128xf32> -> vector<8x256xf32>
    %cst_167 = arith.constant dense<0.000000e+00> : vector<8x256xf32>
    %638 = tpu.matmul %619, %430, %cst_167 {dimension_numbers = #tpu.dot_dimension_numbers<[1], [0], [0], [1], [0, 0, 1, 1], [], []>} : vector<8x64xf32>, vector<64x256xf32>, vector<8x256xf32> -> vector<8x256xf32>
    %639 = arith.addf %637, %638 : vector<8x256xf32>
    %640 = math.tanh %639 : vector<8x256xf32>
    %641 = arith.negf %639 : vector<8x256xf32>
    %642 = math.exp %641 : vector<8x256xf32>
    %cst_168 = arith.constant 1.000000e+00 : f32
    %643 = vector.broadcast %cst_168 : f32 to vector<8x256xf32>
    %644 = arith.addf %643, %642 : vector<8x256xf32>
    %645 = arith.divf %643, %644 : vector<8x256xf32>
    %646 = arith.select %21, %640, %645 : vector<8x256xi1>, vector<8x256xf32>
    %647 = vector.extract_strided_slice %646 {offsets = [0, 0], sizes = [8, 32], strides = [1, 1]} : vector<8x256xf32> to vector<8x32xf32>
    %648 = vector.extract_strided_slice %646 {offsets = [0, 128], sizes = [8, 32], strides = [1, 1]} : vector<8x256xf32> to vector<8x32xf32>
    %649 = tpu.concatenate %647, %648 in 1 : vector<8x32xf32>, vector<8x32xf32> -> vector<8x64xf32>
    %650 = vector.extract_strided_slice %646 {offsets = [0, 32], sizes = [8, 32], strides = [1, 1]} : vector<8x256xf32> to vector<8x32xf32>
    %651 = vector.extract_strided_slice %646 {offsets = [0, 160], sizes = [8, 32], strides = [1, 1]} : vector<8x256xf32> to vector<8x32xf32>
    %652 = tpu.concatenate %650, %651 in 1 : vector<8x32xf32>, vector<8x32xf32> -> vector<8x64xf32>
    %653 = vector.extract_strided_slice %646 {offsets = [0, 64], sizes = [8, 32], strides = [1, 1]} : vector<8x256xf32> to vector<8x32xf32>
    %654 = vector.extract_strided_slice %646 {offsets = [0, 192], sizes = [8, 32], strides = [1, 1]} : vector<8x256xf32> to vector<8x32xf32>
    %655 = tpu.concatenate %653, %654 in 1 : vector<8x32xf32>, vector<8x32xf32> -> vector<8x64xf32>
    %656 = vector.extract_strided_slice %646 {offsets = [0, 96], sizes = [8, 32], strides = [1, 1]} : vector<8x256xf32> to vector<8x32xf32>
    %657 = vector.extract_strided_slice %646 {offsets = [0, 224], sizes = [8, 32], strides = [1, 1]} : vector<8x256xf32> to vector<8x32xf32>
    %658 = tpu.concatenate %656, %657 in 1 : vector<8x32xf32>, vector<8x32xf32> -> vector<8x64xf32>
    %659 = arith.mulf %652, %620 : vector<8x64xf32>
    %660 = arith.mulf %649, %655 : vector<8x64xf32>
    %661 = arith.addf %659, %660 : vector<8x64xf32>
    %662 = math.tanh %661 : vector<8x64xf32>
    %663 = arith.mulf %658, %662 : vector<8x64xf32>
    %664 = arith.index_cast %629 : i32 to index
    %c0_169 = arith.constant 0 : index
    %665 = vector.load %arg1[%664, %c0_169] : memref<64x64xf32, #tpu.memory_space<vmem>>, vector<8x64xf32>
    %cst_170 = arith.constant 0.000000e+00 : f32
    %666 = vector.broadcast %cst_170 : f32 to vector<8x64xf32>
    %667 = arith.cmpf ogt, %665, %666 : vector<8x64xf32>
    %668 = arith.select %667, %663, %619 : vector<8x64xi1>, vector<8x64xf32>
    %669 = arith.select %667, %661, %620 : vector<8x64xi1>, vector<8x64xf32>
    %670 = arith.mulf %665, %663 : vector<8x64xf32>
    %671 = vector.extract_strided_slice %670 {offsets = [0, 0], sizes = [8, 32], strides = [1, 1]} : vector<8x64xf32> to vector<8x32xf32>
    %672 = arith.index_cast %629 : i32 to index
    %c0_171 = arith.constant 0 : index
    %673 = vector.load %arg16[%672, %c0_171] : memref<64x64xf32, #tpu.memory_space<vmem>>, vector<8x32xf32>
    tpu.vector_store %arg16[%672, %c0_171], %671 {strides = array<i32>} : memref<64x64xf32, #tpu.memory_space<vmem>>, vector<8x32xf32>,
    %674 = vector.extract_strided_slice %670 {offsets = [0, 32], sizes = [8, 32], strides = [1, 1]} : vector<8x64xf32> to vector<8x32xf32>
    %675 = arith.index_cast %632 : i32 to index
    %c32_172 = arith.constant 32 : index
    %676 = vector.load %arg16[%675, %c32_172] : memref<64x64xf32, #tpu.memory_space<vmem>>, vector<8x32xf32>
    tpu.vector_store %arg16[%675, %c32_172], %674 {strides = array<i32>} : memref<64x64xf32, #tpu.memory_space<vmem>>, vector<8x32xf32>,
    %c5_i32_173 = arith.constant 5 : i32
    %c8_i32_174 = arith.constant 8 : i32
    %677 = arith.muli %c5_i32_173, %c8_i32_174 : i32
    %678 = tpu.assume_multiple %677, 8 : i32
    %c7_i32_175 = arith.constant 7 : i32
    %679 = arith.subi %c7_i32_175, %c5_i32_173 : i32
    %c8_i32_176 = arith.constant 8 : i32
    %680 = arith.muli %679, %c8_i32_176 : i32
    %681 = tpu.assume_multiple %680, 8 : i32
    %682 = arith.index_cast %678 : i32 to index
    %c0_177 = arith.constant 0 : index
    %683 = vector.load %arg14[%682, %c0_177] : memref<64x256xf32, #tpu.memory_space<vmem>>, vector<8x128xf32>
    %684 = arith.index_cast %681 : i32 to index
    %c128_178 = arith.constant 128 : index
    %685 = vector.load %arg14[%684, %c128_178] : memref<64x256xf32, #tpu.memory_space<vmem>>, vector<8x128xf32>
    %686 = tpu.concatenate %683, %685 in 1 : vector<8x128xf32>, vector<8x128xf32> -> vector<8x256xf32>
    %cst_179 = arith.constant dense<0.000000e+00> : vector<8x256xf32>
    %687 = tpu.matmul %668, %430, %cst_179 {dimension_numbers = #tpu.dot_dimension_numbers<[1], [0], [0], [1], [0, 0, 1, 1], [], []>} : vector<8x64xf32>, vector<64x256xf32>, vector<8x256xf32> -> vector<8x256xf32>
    %688 = arith.addf %686, %687 : vector<8x256xf32>
    %689 = math.tanh %688 : vector<8x256xf32>
    %690 = arith.negf %688 : vector<8x256xf32>
    %691 = math.exp %690 : vector<8x256xf32>
    %cst_180 = arith.constant 1.000000e+00 : f32
    %692 = vector.broadcast %cst_180 : f32 to vector<8x256xf32>
    %693 = arith.addf %692, %691 : vector<8x256xf32>
    %694 = arith.divf %692, %693 : vector<8x256xf32>
    %695 = arith.select %21, %689, %694 : vector<8x256xi1>, vector<8x256xf32>
    %696 = vector.extract_strided_slice %695 {offsets = [0, 0], sizes = [8, 32], strides = [1, 1]} : vector<8x256xf32> to vector<8x32xf32>
    %697 = vector.extract_strided_slice %695 {offsets = [0, 128], sizes = [8, 32], strides = [1, 1]} : vector<8x256xf32> to vector<8x32xf32>
    %698 = tpu.concatenate %696, %697 in 1 : vector<8x32xf32>, vector<8x32xf32> -> vector<8x64xf32>
    %699 = vector.extract_strided_slice %695 {offsets = [0, 32], sizes = [8, 32], strides = [1, 1]} : vector<8x256xf32> to vector<8x32xf32>
    %700 = vector.extract_strided_slice %695 {offsets = [0, 160], sizes = [8, 32], strides = [1, 1]} : vector<8x256xf32> to vector<8x32xf32>
    %701 = tpu.concatenate %699, %700 in 1 : vector<8x32xf32>, vector<8x32xf32> -> vector<8x64xf32>
    %702 = vector.extract_strided_slice %695 {offsets = [0, 64], sizes = [8, 32], strides = [1, 1]} : vector<8x256xf32> to vector<8x32xf32>
    %703 = vector.extract_strided_slice %695 {offsets = [0, 192], sizes = [8, 32], strides = [1, 1]} : vector<8x256xf32> to vector<8x32xf32>
    %704 = tpu.concatenate %702, %703 in 1 : vector<8x32xf32>, vector<8x32xf32> -> vector<8x64xf32>
    %705 = vector.extract_strided_slice %695 {offsets = [0, 96], sizes = [8, 32], strides = [1, 1]} : vector<8x256xf32> to vector<8x32xf32>
    %706 = vector.extract_strided_slice %695 {offsets = [0, 224], sizes = [8, 32], strides = [1, 1]} : vector<8x256xf32> to vector<8x32xf32>
    %707 = tpu.concatenate %705, %706 in 1 : vector<8x32xf32>, vector<8x32xf32> -> vector<8x64xf32>
    %708 = arith.mulf %701, %669 : vector<8x64xf32>
    %709 = arith.mulf %698, %704 : vector<8x64xf32>
    %710 = arith.addf %708, %709 : vector<8x64xf32>
    %711 = math.tanh %710 : vector<8x64xf32>
    %712 = arith.mulf %707, %711 : vector<8x64xf32>
    %713 = arith.index_cast %678 : i32 to index
    %c0_181 = arith.constant 0 : index
    %714 = vector.load %arg1[%713, %c0_181] : memref<64x64xf32, #tpu.memory_space<vmem>>, vector<8x64xf32>
    %cst_182 = arith.constant 0.000000e+00 : f32
    %715 = vector.broadcast %cst_182 : f32 to vector<8x64xf32>
    %716 = arith.cmpf ogt, %714, %715 : vector<8x64xf32>
    %717 = arith.select %716, %712, %668 : vector<8x64xi1>, vector<8x64xf32>
    %718 = arith.select %716, %710, %669 : vector<8x64xi1>, vector<8x64xf32>
    %719 = arith.mulf %714, %712 : vector<8x64xf32>
    %720 = vector.extract_strided_slice %719 {offsets = [0, 0], sizes = [8, 32], strides = [1, 1]} : vector<8x64xf32> to vector<8x32xf32>
    %721 = arith.index_cast %678 : i32 to index
    %c0_183 = arith.constant 0 : index
    %722 = vector.load %arg16[%721, %c0_183] : memref<64x64xf32, #tpu.memory_space<vmem>>, vector<8x32xf32>
    tpu.vector_store %arg16[%721, %c0_183], %720 {strides = array<i32>} : memref<64x64xf32, #tpu.memory_space<vmem>>, vector<8x32xf32>,
    %723 = vector.extract_strided_slice %719 {offsets = [0, 32], sizes = [8, 32], strides = [1, 1]} : vector<8x64xf32> to vector<8x32xf32>
    %724 = arith.index_cast %681 : i32 to index
    %c32_184 = arith.constant 32 : index
    %725 = vector.load %arg16[%724, %c32_184] : memref<64x64xf32, #tpu.memory_space<vmem>>, vector<8x32xf32>
    tpu.vector_store %arg16[%724, %c32_184], %723 {strides = array<i32>} : memref<64x64xf32, #tpu.memory_space<vmem>>, vector<8x32xf32>,
    %c6_i32_185 = arith.constant 6 : i32
    %c8_i32_186 = arith.constant 8 : i32
    %726 = arith.muli %c6_i32_185, %c8_i32_186 : i32
    %727 = tpu.assume_multiple %726, 8 : i32
    %c7_i32_187 = arith.constant 7 : i32
    %728 = arith.subi %c7_i32_187, %c6_i32_185 : i32
    %c8_i32_188 = arith.constant 8 : i32
    %729 = arith.muli %728, %c8_i32_188 : i32
    %730 = tpu.assume_multiple %729, 8 : i32
    %731 = arith.index_cast %727 : i32 to index
    %c0_189 = arith.constant 0 : index
    %732 = vector.load %arg14[%731, %c0_189] : memref<64x256xf32, #tpu.memory_space<vmem>>, vector<8x128xf32>
    %733 = arith.index_cast %730 : i32 to index
    %c128_190 = arith.constant 128 : index
    %734 = vector.load %arg14[%733, %c128_190] : memref<64x256xf32, #tpu.memory_space<vmem>>, vector<8x128xf32>
    %735 = tpu.concatenate %732, %734 in 1 : vector<8x128xf32>, vector<8x128xf32> -> vector<8x256xf32>
    %cst_191 = arith.constant dense<0.000000e+00> : vector<8x256xf32>
    %736 = tpu.matmul %717, %430, %cst_191 {dimension_numbers = #tpu.dot_dimension_numbers<[1], [0], [0], [1], [0, 0, 1, 1], [], []>} : vector<8x64xf32>, vector<64x256xf32>, vector<8x256xf32> -> vector<8x256xf32>
    %737 = arith.addf %735, %736 : vector<8x256xf32>
    %738 = math.tanh %737 : vector<8x256xf32>
    %739 = arith.negf %737 : vector<8x256xf32>
    %740 = math.exp %739 : vector<8x256xf32>
    %cst_192 = arith.constant 1.000000e+00 : f32
    %741 = vector.broadcast %cst_192 : f32 to vector<8x256xf32>
    %742 = arith.addf %741, %740 : vector<8x256xf32>
    %743 = arith.divf %741, %742 : vector<8x256xf32>
    %744 = arith.select %21, %738, %743 : vector<8x256xi1>, vector<8x256xf32>
    %745 = vector.extract_strided_slice %744 {offsets = [0, 0], sizes = [8, 32], strides = [1, 1]} : vector<8x256xf32> to vector<8x32xf32>
    %746 = vector.extract_strided_slice %744 {offsets = [0, 128], sizes = [8, 32], strides = [1, 1]} : vector<8x256xf32> to vector<8x32xf32>
    %747 = tpu.concatenate %745, %746 in 1 : vector<8x32xf32>, vector<8x32xf32> -> vector<8x64xf32>
    %748 = vector.extract_strided_slice %744 {offsets = [0, 32], sizes = [8, 32], strides = [1, 1]} : vector<8x256xf32> to vector<8x32xf32>
    %749 = vector.extract_strided_slice %744 {offsets = [0, 160], sizes = [8, 32], strides = [1, 1]} : vector<8x256xf32> to vector<8x32xf32>
    %750 = tpu.concatenate %748, %749 in 1 : vector<8x32xf32>, vector<8x32xf32> -> vector<8x64xf32>
    %751 = vector.extract_strided_slice %744 {offsets = [0, 64], sizes = [8, 32], strides = [1, 1]} : vector<8x256xf32> to vector<8x32xf32>
    %752 = vector.extract_strided_slice %744 {offsets = [0, 192], sizes = [8, 32], strides = [1, 1]} : vector<8x256xf32> to vector<8x32xf32>
    %753 = tpu.concatenate %751, %752 in 1 : vector<8x32xf32>, vector<8x32xf32> -> vector<8x64xf32>
    %754 = vector.extract_strided_slice %744 {offsets = [0, 96], sizes = [8, 32], strides = [1, 1]} : vector<8x256xf32> to vector<8x32xf32>
    %755 = vector.extract_strided_slice %744 {offsets = [0, 224], sizes = [8, 32], strides = [1, 1]} : vector<8x256xf32> to vector<8x32xf32>
    %756 = tpu.concatenate %754, %755 in 1 : vector<8x32xf32>, vector<8x32xf32> -> vector<8x64xf32>
    %757 = arith.mulf %750, %718 : vector<8x64xf32>
    %758 = arith.mulf %747, %753 : vector<8x64xf32>
    %759 = arith.addf %757, %758 : vector<8x64xf32>
    %760 = math.tanh %759 : vector<8x64xf32>
    %761 = arith.mulf %756, %760 : vector<8x64xf32>
    %762 = arith.index_cast %727 : i32 to index
    %c0_193 = arith.constant 0 : index
    %763 = vector.load %arg1[%762, %c0_193] : memref<64x64xf32, #tpu.memory_space<vmem>>, vector<8x64xf32>
    %cst_194 = arith.constant 0.000000e+00 : f32
    %764 = vector.broadcast %cst_194 : f32 to vector<8x64xf32>
    %765 = arith.cmpf ogt, %763, %764 : vector<8x64xf32>
    %766 = arith.select %765, %761, %717 : vector<8x64xi1>, vector<8x64xf32>
    %767 = arith.select %765, %759, %718 : vector<8x64xi1>, vector<8x64xf32>
    %768 = arith.mulf %763, %761 : vector<8x64xf32>
    %769 = vector.extract_strided_slice %768 {offsets = [0, 0], sizes = [8, 32], strides = [1, 1]} : vector<8x64xf32> to vector<8x32xf32>
    %770 = arith.index_cast %727 : i32 to index
    %c0_195 = arith.constant 0 : index
    %771 = vector.load %arg16[%770, %c0_195] : memref<64x64xf32, #tpu.memory_space<vmem>>, vector<8x32xf32>
    tpu.vector_store %arg16[%770, %c0_195], %769 {strides = array<i32>} : memref<64x64xf32, #tpu.memory_space<vmem>>, vector<8x32xf32>,
    %772 = vector.extract_strided_slice %768 {offsets = [0, 32], sizes = [8, 32], strides = [1, 1]} : vector<8x64xf32> to vector<8x32xf32>
    %773 = arith.index_cast %730 : i32 to index
    %c32_196 = arith.constant 32 : index
    %774 = vector.load %arg16[%773, %c32_196] : memref<64x64xf32, #tpu.memory_space<vmem>>, vector<8x32xf32>
    tpu.vector_store %arg16[%773, %c32_196], %772 {strides = array<i32>} : memref<64x64xf32, #tpu.memory_space<vmem>>, vector<8x32xf32>,
    %c7_i32_197 = arith.constant 7 : i32
    %c8_i32_198 = arith.constant 8 : i32
    %775 = arith.muli %c7_i32_197, %c8_i32_198 : i32
    %776 = tpu.assume_multiple %775, 8 : i32
    %c7_i32_199 = arith.constant 7 : i32
    %777 = arith.subi %c7_i32_199, %c7_i32_197 : i32
    %c8_i32_200 = arith.constant 8 : i32
    %778 = arith.muli %777, %c8_i32_200 : i32
    %779 = tpu.assume_multiple %778, 8 : i32
    %780 = arith.index_cast %776 : i32 to index
    %c0_201 = arith.constant 0 : index
    %781 = vector.load %arg14[%780, %c0_201] : memref<64x256xf32, #tpu.memory_space<vmem>>, vector<8x128xf32>
    %782 = arith.index_cast %779 : i32 to index
    %c128_202 = arith.constant 128 : index
    %783 = vector.load %arg14[%782, %c128_202] : memref<64x256xf32, #tpu.memory_space<vmem>>, vector<8x128xf32>
    %784 = tpu.concatenate %781, %783 in 1 : vector<8x128xf32>, vector<8x128xf32> -> vector<8x256xf32>
    %cst_203 = arith.constant dense<0.000000e+00> : vector<8x256xf32>
    %785 = tpu.matmul %766, %430, %cst_203 {dimension_numbers = #tpu.dot_dimension_numbers<[1], [0], [0], [1], [0, 0, 1, 1], [], []>} : vector<8x64xf32>, vector<64x256xf32>, vector<8x256xf32> -> vector<8x256xf32>
    %786 = arith.addf %784, %785 : vector<8x256xf32>
    %787 = math.tanh %786 : vector<8x256xf32>
    %788 = arith.negf %786 : vector<8x256xf32>
    %789 = math.exp %788 : vector<8x256xf32>
    %cst_204 = arith.constant 1.000000e+00 : f32
    %790 = vector.broadcast %cst_204 : f32 to vector<8x256xf32>
    %791 = arith.addf %790, %789 : vector<8x256xf32>
    %792 = arith.divf %790, %791 : vector<8x256xf32>
    %793 = arith.select %21, %787, %792 : vector<8x256xi1>, vector<8x256xf32>
    %794 = vector.extract_strided_slice %793 {offsets = [0, 0], sizes = [8, 32], strides = [1, 1]} : vector<8x256xf32> to vector<8x32xf32>
    %795 = vector.extract_strided_slice %793 {offsets = [0, 128], sizes = [8, 32], strides = [1, 1]} : vector<8x256xf32> to vector<8x32xf32>
    %796 = tpu.concatenate %794, %795 in 1 : vector<8x32xf32>, vector<8x32xf32> -> vector<8x64xf32>
    %797 = vector.extract_strided_slice %793 {offsets = [0, 32], sizes = [8, 32], strides = [1, 1]} : vector<8x256xf32> to vector<8x32xf32>
    %798 = vector.extract_strided_slice %793 {offsets = [0, 160], sizes = [8, 32], strides = [1, 1]} : vector<8x256xf32> to vector<8x32xf32>
    %799 = tpu.concatenate %797, %798 in 1 : vector<8x32xf32>, vector<8x32xf32> -> vector<8x64xf32>
    %800 = vector.extract_strided_slice %793 {offsets = [0, 64], sizes = [8, 32], strides = [1, 1]} : vector<8x256xf32> to vector<8x32xf32>
    %801 = vector.extract_strided_slice %793 {offsets = [0, 192], sizes = [8, 32], strides = [1, 1]} : vector<8x256xf32> to vector<8x32xf32>
    %802 = tpu.concatenate %800, %801 in 1 : vector<8x32xf32>, vector<8x32xf32> -> vector<8x64xf32>
    %803 = vector.extract_strided_slice %793 {offsets = [0, 96], sizes = [8, 32], strides = [1, 1]} : vector<8x256xf32> to vector<8x32xf32>
    %804 = vector.extract_strided_slice %793 {offsets = [0, 224], sizes = [8, 32], strides = [1, 1]} : vector<8x256xf32> to vector<8x32xf32>
    %805 = tpu.concatenate %803, %804 in 1 : vector<8x32xf32>, vector<8x32xf32> -> vector<8x64xf32>
    %806 = arith.mulf %799, %767 : vector<8x64xf32>
    %807 = arith.mulf %796, %802 : vector<8x64xf32>
    %808 = arith.addf %806, %807 : vector<8x64xf32>
    %809 = math.tanh %808 : vector<8x64xf32>
    %810 = arith.mulf %805, %809 : vector<8x64xf32>
    %811 = arith.index_cast %776 : i32 to index
    %c0_205 = arith.constant 0 : index
    %812 = vector.load %arg1[%811, %c0_205] : memref<64x64xf32, #tpu.memory_space<vmem>>, vector<8x64xf32>
    %cst_206 = arith.constant 0.000000e+00 : f32
    %813 = vector.broadcast %cst_206 : f32 to vector<8x64xf32>
    %814 = arith.cmpf ogt, %812, %813 : vector<8x64xf32>
    %815 = arith.select %814, %810, %766 : vector<8x64xi1>, vector<8x64xf32>
    %816 = arith.select %814, %808, %767 : vector<8x64xi1>, vector<8x64xf32>
    %817 = arith.mulf %812, %810 : vector<8x64xf32>
    %818 = vector.extract_strided_slice %817 {offsets = [0, 0], sizes = [8, 32], strides = [1, 1]} : vector<8x64xf32> to vector<8x32xf32>
    %819 = arith.index_cast %776 : i32 to index
    %c0_207 = arith.constant 0 : index
    %820 = vector.load %arg16[%819, %c0_207] : memref<64x64xf32, #tpu.memory_space<vmem>>, vector<8x32xf32>
    tpu.vector_store %arg16[%819, %c0_207], %818 {strides = array<i32>} : memref<64x64xf32, #tpu.memory_space<vmem>>, vector<8x32xf32>,
    %821 = vector.extract_strided_slice %817 {offsets = [0, 32], sizes = [8, 32], strides = [1, 1]} : vector<8x64xf32> to vector<8x32xf32>
    %822 = arith.index_cast %779 : i32 to index
    %c32_208 = arith.constant 32 : index
    %823 = vector.load %arg16[%822, %c32_208] : memref<64x64xf32, #tpu.memory_space<vmem>>, vector<8x32xf32>
    tpu.vector_store %arg16[%822, %c32_208], %821 {strides = array<i32>} : memref<64x64xf32, #tpu.memory_space<vmem>>, vector<8x32xf32>,
    %c8_i32_209 = arith.constant 8 : i32
    %c0_210 = arith.constant 0 : index
    %c0_211 = arith.constant 0 : index
    %824 = vector.load %arg16[%c0_210, %c0_211] : memref<64x64xf32, #tpu.memory_space<vmem>>, vector<64x64xf32>
    %c0_212 = arith.constant 0 : index
    %c0_213 = arith.constant 0 : index
    %825 = vector.load %arg8[%c0_212, %c0_213] : memref<64x256xf32, #tpu.memory_space<vmem>>, vector<64x256xf32>
    %cst_214 = arith.constant dense<0.000000e+00> : vector<64x256xf32>
    %826 = tpu.matmul %824, %825, %cst_214 {dimension_numbers = #tpu.dot_dimension_numbers<[1], [0], [0], [1], [0, 0, 1, 1], [], []>} : vector<64x64xf32>, vector<64x256xf32>, vector<64x256xf32> -> vector<64x256xf32>
    %c0_215 = arith.constant 0 : index
    %c0_216 = arith.constant 0 : index
    %827 = vector.load %arg10[%c0_215, %c0_216] : memref<1x256xf32, #tpu.memory_space<vmem>>, vector<1x256xf32>
    %828 = vector.broadcast %827 : vector<1x256xf32> to vector<64x256xf32>
    %829 = arith.addf %826, %828 : vector<64x256xf32>
    %c0_217 = arith.constant 0 : index
    %c0_218 = arith.constant 0 : index
    %830 = vector.load %arg14[%c0_217, %c0_218] : memref<64x256xf32, #tpu.memory_space<vmem>>, vector<64x256xf32>
    tpu.vector_store %arg14[%c0_217, %c0_218], %829 {strides = array<i32>} : memref<64x256xf32, #tpu.memory_space<vmem>>, vector<64x256xf32>,
    %c0_219 = arith.constant 0 : index
    %c0_220 = arith.constant 0 : index
    %831 = vector.load %arg9[%c0_219, %c0_220] : memref<64x256xf32, #tpu.memory_space<vmem>>, vector<64x256xf32>
    %cst_221 = arith.constant 0.000000e+00 : f32
    %832 = vector.broadcast %cst_221 : f32 to vector<8x64xf32>
    %c0_i32_222 = arith.constant 0 : i32
    %c8_i32_223 = arith.constant 8 : i32
    %833 = arith.muli %c0_i32_222, %c8_i32_223 : i32
    %834 = tpu.assume_multiple %833, 8 : i32
    %c7_i32_224 = arith.constant 7 : i32
    %835 = arith.subi %c7_i32_224, %c0_i32_222 : i32
    %c8_i32_225 = arith.constant 8 : i32
    %836 = arith.muli %835, %c8_i32_225 : i32
    %837 = tpu.assume_multiple %836, 8 : i32
    %838 = arith.index_cast %834 : i32 to index
    %c0_226 = arith.constant 0 : index
    %839 = vector.load %arg14[%838, %c0_226] : memref<64x256xf32, #tpu.memory_space<vmem>>, vector<8x128xf32>
    %840 = arith.index_cast %837 : i32 to index
    %c128_227 = arith.constant 128 : index
    %841 = vector.load %arg14[%840, %c128_227] : memref<64x256xf32, #tpu.memory_space<vmem>>, vector<8x128xf32>
    %842 = tpu.concatenate %839, %841 in 1 : vector<8x128xf32>, vector<8x128xf32> -> vector<8x256xf32>
    %cst_228 = arith.constant dense<0.000000e+00> : vector<8x256xf32>
    %843 = tpu.matmul %832, %831, %cst_228 {dimension_numbers = #tpu.dot_dimension_numbers<[1], [0], [0], [1], [0, 0, 1, 1], [], []>} : vector<8x64xf32>, vector<64x256xf32>, vector<8x256xf32> -> vector<8x256xf32>
    %844 = arith.addf %842, %843 : vector<8x256xf32>
    %845 = math.tanh %844 : vector<8x256xf32>
    %846 = arith.negf %844 : vector<8x256xf32>
    %847 = math.exp %846 : vector<8x256xf32>
    %cst_229 = arith.constant 1.000000e+00 : f32
    %848 = vector.broadcast %cst_229 : f32 to vector<8x256xf32>
    %849 = arith.addf %848, %847 : vector<8x256xf32>
    %850 = arith.divf %848, %849 : vector<8x256xf32>
    %851 = arith.select %21, %845, %850 : vector<8x256xi1>, vector<8x256xf32>
    %852 = vector.extract_strided_slice %851 {offsets = [0, 0], sizes = [8, 32], strides = [1, 1]} : vector<8x256xf32> to vector<8x32xf32>
    %853 = vector.extract_strided_slice %851 {offsets = [0, 128], sizes = [8, 32], strides = [1, 1]} : vector<8x256xf32> to vector<8x32xf32>
    %854 = tpu.concatenate %852, %853 in 1 : vector<8x32xf32>, vector<8x32xf32> -> vector<8x64xf32>
    %855 = vector.extract_strided_slice %851 {offsets = [0, 32], sizes = [8, 32], strides = [1, 1]} : vector<8x256xf32> to vector<8x32xf32>
    %856 = vector.extract_strided_slice %851 {offsets = [0, 160], sizes = [8, 32], strides = [1, 1]} : vector<8x256xf32> to vector<8x32xf32>
    %857 = tpu.concatenate %855, %856 in 1 : vector<8x32xf32>, vector<8x32xf32> -> vector<8x64xf32>
    %858 = vector.extract_strided_slice %851 {offsets = [0, 64], sizes = [8, 32], strides = [1, 1]} : vector<8x256xf32> to vector<8x32xf32>
    %859 = vector.extract_strided_slice %851 {offsets = [0, 192], sizes = [8, 32], strides = [1, 1]} : vector<8x256xf32> to vector<8x32xf32>
    %860 = tpu.concatenate %858, %859 in 1 : vector<8x32xf32>, vector<8x32xf32> -> vector<8x64xf32>
    %861 = vector.extract_strided_slice %851 {offsets = [0, 96], sizes = [8, 32], strides = [1, 1]} : vector<8x256xf32> to vector<8x32xf32>
    %862 = vector.extract_strided_slice %851 {offsets = [0, 224], sizes = [8, 32], strides = [1, 1]} : vector<8x256xf32> to vector<8x32xf32>
    %863 = tpu.concatenate %861, %862 in 1 : vector<8x32xf32>, vector<8x32xf32> -> vector<8x64xf32>
    %864 = arith.mulf %857, %832 : vector<8x64xf32>
    %865 = arith.mulf %854, %860 : vector<8x64xf32>
    %866 = arith.addf %864, %865 : vector<8x64xf32>
    %867 = math.tanh %866 : vector<8x64xf32>
    %868 = arith.mulf %863, %867 : vector<8x64xf32>
    %869 = arith.index_cast %834 : i32 to index
    %c0_230 = arith.constant 0 : index
    %870 = vector.load %arg1[%869, %c0_230] : memref<64x64xf32, #tpu.memory_space<vmem>>, vector<8x64xf32>
    %cst_231 = arith.constant 0.000000e+00 : f32
    %871 = vector.broadcast %cst_231 : f32 to vector<8x64xf32>
    %872 = arith.cmpf ogt, %870, %871 : vector<8x64xf32>
    %873 = arith.select %872, %868, %832 : vector<8x64xi1>, vector<8x64xf32>
    %874 = arith.select %872, %866, %832 : vector<8x64xi1>, vector<8x64xf32>
    %875 = arith.mulf %870, %868 : vector<8x64xf32>
    %876 = vector.extract_strided_slice %875 {offsets = [0, 0], sizes = [8, 32], strides = [1, 1]} : vector<8x64xf32> to vector<8x32xf32>
    %877 = arith.index_cast %834 : i32 to index
    %c0_232 = arith.constant 0 : index
    %878 = vector.load %arg15[%877, %c0_232] : memref<64x64xf32, #tpu.memory_space<vmem>>, vector<8x32xf32>
    tpu.vector_store %arg15[%877, %c0_232], %876 {strides = array<i32>} : memref<64x64xf32, #tpu.memory_space<vmem>>, vector<8x32xf32>,
    %879 = vector.extract_strided_slice %875 {offsets = [0, 32], sizes = [8, 32], strides = [1, 1]} : vector<8x64xf32> to vector<8x32xf32>
    %880 = arith.index_cast %837 : i32 to index
    %c32_233 = arith.constant 32 : index
    %881 = vector.load %arg15[%880, %c32_233] : memref<64x64xf32, #tpu.memory_space<vmem>>, vector<8x32xf32>
    tpu.vector_store %arg15[%880, %c32_233], %879 {strides = array<i32>} : memref<64x64xf32, #tpu.memory_space<vmem>>, vector<8x32xf32>,
    %c1_i32_234 = arith.constant 1 : i32
    %c8_i32_235 = arith.constant 8 : i32
    %882 = arith.muli %c1_i32_234, %c8_i32_235 : i32
    %883 = tpu.assume_multiple %882, 8 : i32
    %c7_i32_236 = arith.constant 7 : i32
    %884 = arith.subi %c7_i32_236, %c1_i32_234 : i32
    %c8_i32_237 = arith.constant 8 : i32
    %885 = arith.muli %884, %c8_i32_237 : i32
    %886 = tpu.assume_multiple %885, 8 : i32
    %887 = arith.index_cast %883 : i32 to index
    %c0_238 = arith.constant 0 : index
    %888 = vector.load %arg14[%887, %c0_238] : memref<64x256xf32, #tpu.memory_space<vmem>>, vector<8x128xf32>
    %889 = arith.index_cast %886 : i32 to index
    %c128_239 = arith.constant 128 : index
    %890 = vector.load %arg14[%889, %c128_239] : memref<64x256xf32, #tpu.memory_space<vmem>>, vector<8x128xf32>
    %891 = tpu.concatenate %888, %890 in 1 : vector<8x128xf32>, vector<8x128xf32> -> vector<8x256xf32>
    %cst_240 = arith.constant dense<0.000000e+00> : vector<8x256xf32>
    %892 = tpu.matmul %873, %831, %cst_240 {dimension_numbers = #tpu.dot_dimension_numbers<[1], [0], [0], [1], [0, 0, 1, 1], [], []>} : vector<8x64xf32>, vector<64x256xf32>, vector<8x256xf32> -> vector<8x256xf32>
    %893 = arith.addf %891, %892 : vector<8x256xf32>
    %894 = math.tanh %893 : vector<8x256xf32>
    %895 = arith.negf %893 : vector<8x256xf32>
    %896 = math.exp %895 : vector<8x256xf32>
    %cst_241 = arith.constant 1.000000e+00 : f32
    %897 = vector.broadcast %cst_241 : f32 to vector<8x256xf32>
    %898 = arith.addf %897, %896 : vector<8x256xf32>
    %899 = arith.divf %897, %898 : vector<8x256xf32>
    %900 = arith.select %21, %894, %899 : vector<8x256xi1>, vector<8x256xf32>
    %901 = vector.extract_strided_slice %900 {offsets = [0, 0], sizes = [8, 32], strides = [1, 1]} : vector<8x256xf32> to vector<8x32xf32>
    %902 = vector.extract_strided_slice %900 {offsets = [0, 128], sizes = [8, 32], strides = [1, 1]} : vector<8x256xf32> to vector<8x32xf32>
    %903 = tpu.concatenate %901, %902 in 1 : vector<8x32xf32>, vector<8x32xf32> -> vector<8x64xf32>
    %904 = vector.extract_strided_slice %900 {offsets = [0, 32], sizes = [8, 32], strides = [1, 1]} : vector<8x256xf32> to vector<8x32xf32>
    %905 = vector.extract_strided_slice %900 {offsets = [0, 160], sizes = [8, 32], strides = [1, 1]} : vector<8x256xf32> to vector<8x32xf32>
    %906 = tpu.concatenate %904, %905 in 1 : vector<8x32xf32>, vector<8x32xf32> -> vector<8x64xf32>
    %907 = vector.extract_strided_slice %900 {offsets = [0, 64], sizes = [8, 32], strides = [1, 1]} : vector<8x256xf32> to vector<8x32xf32>
    %908 = vector.extract_strided_slice %900 {offsets = [0, 192], sizes = [8, 32], strides = [1, 1]} : vector<8x256xf32> to vector<8x32xf32>
    %909 = tpu.concatenate %907, %908 in 1 : vector<8x32xf32>, vector<8x32xf32> -> vector<8x64xf32>
    %910 = vector.extract_strided_slice %900 {offsets = [0, 96], sizes = [8, 32], strides = [1, 1]} : vector<8x256xf32> to vector<8x32xf32>
    %911 = vector.extract_strided_slice %900 {offsets = [0, 224], sizes = [8, 32], strides = [1, 1]} : vector<8x256xf32> to vector<8x32xf32>
    %912 = tpu.concatenate %910, %911 in 1 : vector<8x32xf32>, vector<8x32xf32> -> vector<8x64xf32>
    %913 = arith.mulf %906, %874 : vector<8x64xf32>
    %914 = arith.mulf %903, %909 : vector<8x64xf32>
    %915 = arith.addf %913, %914 : vector<8x64xf32>
    %916 = math.tanh %915 : vector<8x64xf32>
    %917 = arith.mulf %912, %916 : vector<8x64xf32>
    %918 = arith.index_cast %883 : i32 to index
    %c0_242 = arith.constant 0 : index
    %919 = vector.load %arg1[%918, %c0_242] : memref<64x64xf32, #tpu.memory_space<vmem>>, vector<8x64xf32>
    %cst_243 = arith.constant 0.000000e+00 : f32
    %920 = vector.broadcast %cst_243 : f32 to vector<8x64xf32>
    %921 = arith.cmpf ogt, %919, %920 : vector<8x64xf32>
    %922 = arith.select %921, %917, %873 : vector<8x64xi1>, vector<8x64xf32>
    %923 = arith.select %921, %915, %874 : vector<8x64xi1>, vector<8x64xf32>
    %924 = arith.mulf %919, %917 : vector<8x64xf32>
    %925 = vector.extract_strided_slice %924 {offsets = [0, 0], sizes = [8, 32], strides = [1, 1]} : vector<8x64xf32> to vector<8x32xf32>
    %926 = arith.index_cast %883 : i32 to index
    %c0_244 = arith.constant 0 : index
    %927 = vector.load %arg15[%926, %c0_244] : memref<64x64xf32, #tpu.memory_space<vmem>>, vector<8x32xf32>
    tpu.vector_store %arg15[%926, %c0_244], %925 {strides = array<i32>} : memref<64x64xf32, #tpu.memory_space<vmem>>, vector<8x32xf32>,
    %928 = vector.extract_strided_slice %924 {offsets = [0, 32], sizes = [8, 32], strides = [1, 1]} : vector<8x64xf32> to vector<8x32xf32>
    %929 = arith.index_cast %886 : i32 to index
    %c32_245 = arith.constant 32 : index
    %930 = vector.load %arg15[%929, %c32_245] : memref<64x64xf32, #tpu.memory_space<vmem>>, vector<8x32xf32>
    tpu.vector_store %arg15[%929, %c32_245], %928 {strides = array<i32>} : memref<64x64xf32, #tpu.memory_space<vmem>>, vector<8x32xf32>,
    %c2_i32_246 = arith.constant 2 : i32
    %c8_i32_247 = arith.constant 8 : i32
    %931 = arith.muli %c2_i32_246, %c8_i32_247 : i32
    %932 = tpu.assume_multiple %931, 8 : i32
    %c7_i32_248 = arith.constant 7 : i32
    %933 = arith.subi %c7_i32_248, %c2_i32_246 : i32
    %c8_i32_249 = arith.constant 8 : i32
    %934 = arith.muli %933, %c8_i32_249 : i32
    %935 = tpu.assume_multiple %934, 8 : i32
    %936 = arith.index_cast %932 : i32 to index
    %c0_250 = arith.constant 0 : index
    %937 = vector.load %arg14[%936, %c0_250] : memref<64x256xf32, #tpu.memory_space<vmem>>, vector<8x128xf32>
    %938 = arith.index_cast %935 : i32 to index
    %c128_251 = arith.constant 128 : index
    %939 = vector.load %arg14[%938, %c128_251] : memref<64x256xf32, #tpu.memory_space<vmem>>, vector<8x128xf32>
    %940 = tpu.concatenate %937, %939 in 1 : vector<8x128xf32>, vector<8x128xf32> -> vector<8x256xf32>
    %cst_252 = arith.constant dense<0.000000e+00> : vector<8x256xf32>
    %941 = tpu.matmul %922, %831, %cst_252 {dimension_numbers = #tpu.dot_dimension_numbers<[1], [0], [0], [1], [0, 0, 1, 1], [], []>} : vector<8x64xf32>, vector<64x256xf32>, vector<8x256xf32> -> vector<8x256xf32>
    %942 = arith.addf %940, %941 : vector<8x256xf32>
    %943 = math.tanh %942 : vector<8x256xf32>
    %944 = arith.negf %942 : vector<8x256xf32>
    %945 = math.exp %944 : vector<8x256xf32>
    %cst_253 = arith.constant 1.000000e+00 : f32
    %946 = vector.broadcast %cst_253 : f32 to vector<8x256xf32>
    %947 = arith.addf %946, %945 : vector<8x256xf32>
    %948 = arith.divf %946, %947 : vector<8x256xf32>
    %949 = arith.select %21, %943, %948 : vector<8x256xi1>, vector<8x256xf32>
    %950 = vector.extract_strided_slice %949 {offsets = [0, 0], sizes = [8, 32], strides = [1, 1]} : vector<8x256xf32> to vector<8x32xf32>
    %951 = vector.extract_strided_slice %949 {offsets = [0, 128], sizes = [8, 32], strides = [1, 1]} : vector<8x256xf32> to vector<8x32xf32>
    %952 = tpu.concatenate %950, %951 in 1 : vector<8x32xf32>, vector<8x32xf32> -> vector<8x64xf32>
    %953 = vector.extract_strided_slice %949 {offsets = [0, 32], sizes = [8, 32], strides = [1, 1]} : vector<8x256xf32> to vector<8x32xf32>
    %954 = vector.extract_strided_slice %949 {offsets = [0, 160], sizes = [8, 32], strides = [1, 1]} : vector<8x256xf32> to vector<8x32xf32>
    %955 = tpu.concatenate %953, %954 in 1 : vector<8x32xf32>, vector<8x32xf32> -> vector<8x64xf32>
    %956 = vector.extract_strided_slice %949 {offsets = [0, 64], sizes = [8, 32], strides = [1, 1]} : vector<8x256xf32> to vector<8x32xf32>
    %957 = vector.extract_strided_slice %949 {offsets = [0, 192], sizes = [8, 32], strides = [1, 1]} : vector<8x256xf32> to vector<8x32xf32>
    %958 = tpu.concatenate %956, %957 in 1 : vector<8x32xf32>, vector<8x32xf32> -> vector<8x64xf32>
    %959 = vector.extract_strided_slice %949 {offsets = [0, 96], sizes = [8, 32], strides = [1, 1]} : vector<8x256xf32> to vector<8x32xf32>
    %960 = vector.extract_strided_slice %949 {offsets = [0, 224], sizes = [8, 32], strides = [1, 1]} : vector<8x256xf32> to vector<8x32xf32>
    %961 = tpu.concatenate %959, %960 in 1 : vector<8x32xf32>, vector<8x32xf32> -> vector<8x64xf32>
    %962 = arith.mulf %955, %923 : vector<8x64xf32>
    %963 = arith.mulf %952, %958 : vector<8x64xf32>
    %964 = arith.addf %962, %963 : vector<8x64xf32>
    %965 = math.tanh %964 : vector<8x64xf32>
    %966 = arith.mulf %961, %965 : vector<8x64xf32>
    %967 = arith.index_cast %932 : i32 to index
    %c0_254 = arith.constant 0 : index
    %968 = vector.load %arg1[%967, %c0_254] : memref<64x64xf32, #tpu.memory_space<vmem>>, vector<8x64xf32>
    %cst_255 = arith.constant 0.000000e+00 : f32
    %969 = vector.broadcast %cst_255 : f32 to vector<8x64xf32>
    %970 = arith.cmpf ogt, %968, %969 : vector<8x64xf32>
    %971 = arith.select %970, %966, %922 : vector<8x64xi1>, vector<8x64xf32>
    %972 = arith.select %970, %964, %923 : vector<8x64xi1>, vector<8x64xf32>
    %973 = arith.mulf %968, %966 : vector<8x64xf32>
    %974 = vector.extract_strided_slice %973 {offsets = [0, 0], sizes = [8, 32], strides = [1, 1]} : vector<8x64xf32> to vector<8x32xf32>
    %975 = arith.index_cast %932 : i32 to index
    %c0_256 = arith.constant 0 : index
    %976 = vector.load %arg15[%975, %c0_256] : memref<64x64xf32, #tpu.memory_space<vmem>>, vector<8x32xf32>
    tpu.vector_store %arg15[%975, %c0_256], %974 {strides = array<i32>} : memref<64x64xf32, #tpu.memory_space<vmem>>, vector<8x32xf32>,
    %977 = vector.extract_strided_slice %973 {offsets = [0, 32], sizes = [8, 32], strides = [1, 1]} : vector<8x64xf32> to vector<8x32xf32>
    %978 = arith.index_cast %935 : i32 to index
    %c32_257 = arith.constant 32 : index
    %979 = vector.load %arg15[%978, %c32_257] : memref<64x64xf32, #tpu.memory_space<vmem>>, vector<8x32xf32>
    tpu.vector_store %arg15[%978, %c32_257], %977 {strides = array<i32>} : memref<64x64xf32, #tpu.memory_space<vmem>>, vector<8x32xf32>,
    %c3_i32_258 = arith.constant 3 : i32
    %c8_i32_259 = arith.constant 8 : i32
    %980 = arith.muli %c3_i32_258, %c8_i32_259 : i32
    %981 = tpu.assume_multiple %980, 8 : i32
    %c7_i32_260 = arith.constant 7 : i32
    %982 = arith.subi %c7_i32_260, %c3_i32_258 : i32
    %c8_i32_261 = arith.constant 8 : i32
    %983 = arith.muli %982, %c8_i32_261 : i32
    %984 = tpu.assume_multiple %983, 8 : i32
    %985 = arith.index_cast %981 : i32 to index
    %c0_262 = arith.constant 0 : index
    %986 = vector.load %arg14[%985, %c0_262] : memref<64x256xf32, #tpu.memory_space<vmem>>, vector<8x128xf32>
    %987 = arith.index_cast %984 : i32 to index
    %c128_263 = arith.constant 128 : index
    %988 = vector.load %arg14[%987, %c128_263] : memref<64x256xf32, #tpu.memory_space<vmem>>, vector<8x128xf32>
    %989 = tpu.concatenate %986, %988 in 1 : vector<8x128xf32>, vector<8x128xf32> -> vector<8x256xf32>
    %cst_264 = arith.constant dense<0.000000e+00> : vector<8x256xf32>
    %990 = tpu.matmul %971, %831, %cst_264 {dimension_numbers = #tpu.dot_dimension_numbers<[1], [0], [0], [1], [0, 0, 1, 1], [], []>} : vector<8x64xf32>, vector<64x256xf32>, vector<8x256xf32> -> vector<8x256xf32>
    %991 = arith.addf %989, %990 : vector<8x256xf32>
    %992 = math.tanh %991 : vector<8x256xf32>
    %993 = arith.negf %991 : vector<8x256xf32>
    %994 = math.exp %993 : vector<8x256xf32>
    %cst_265 = arith.constant 1.000000e+00 : f32
    %995 = vector.broadcast %cst_265 : f32 to vector<8x256xf32>
    %996 = arith.addf %995, %994 : vector<8x256xf32>
    %997 = arith.divf %995, %996 : vector<8x256xf32>
    %998 = arith.select %21, %992, %997 : vector<8x256xi1>, vector<8x256xf32>
    %999 = vector.extract_strided_slice %998 {offsets = [0, 0], sizes = [8, 32], strides = [1, 1]} : vector<8x256xf32> to vector<8x32xf32>
    %1000 = vector.extract_strided_slice %998 {offsets = [0, 128], sizes = [8, 32], strides = [1, 1]} : vector<8x256xf32> to vector<8x32xf32>
    %1001 = tpu.concatenate %999, %1000 in 1 : vector<8x32xf32>, vector<8x32xf32> -> vector<8x64xf32>
    %1002 = vector.extract_strided_slice %998 {offsets = [0, 32], sizes = [8, 32], strides = [1, 1]} : vector<8x256xf32> to vector<8x32xf32>
    %1003 = vector.extract_strided_slice %998 {offsets = [0, 160], sizes = [8, 32], strides = [1, 1]} : vector<8x256xf32> to vector<8x32xf32>
    %1004 = tpu.concatenate %1002, %1003 in 1 : vector<8x32xf32>, vector<8x32xf32> -> vector<8x64xf32>
    %1005 = vector.extract_strided_slice %998 {offsets = [0, 64], sizes = [8, 32], strides = [1, 1]} : vector<8x256xf32> to vector<8x32xf32>
    %1006 = vector.extract_strided_slice %998 {offsets = [0, 192], sizes = [8, 32], strides = [1, 1]} : vector<8x256xf32> to vector<8x32xf32>
    %1007 = tpu.concatenate %1005, %1006 in 1 : vector<8x32xf32>, vector<8x32xf32> -> vector<8x64xf32>
    %1008 = vector.extract_strided_slice %998 {offsets = [0, 96], sizes = [8, 32], strides = [1, 1]} : vector<8x256xf32> to vector<8x32xf32>
    %1009 = vector.extract_strided_slice %998 {offsets = [0, 224], sizes = [8, 32], strides = [1, 1]} : vector<8x256xf32> to vector<8x32xf32>
    %1010 = tpu.concatenate %1008, %1009 in 1 : vector<8x32xf32>, vector<8x32xf32> -> vector<8x64xf32>
    %1011 = arith.mulf %1004, %972 : vector<8x64xf32>
    %1012 = arith.mulf %1001, %1007 : vector<8x64xf32>
    %1013 = arith.addf %1011, %1012 : vector<8x64xf32>
    %1014 = math.tanh %1013 : vector<8x64xf32>
    %1015 = arith.mulf %1010, %1014 : vector<8x64xf32>
    %1016 = arith.index_cast %981 : i32 to index
    %c0_266 = arith.constant 0 : index
    %1017 = vector.load %arg1[%1016, %c0_266] : memref<64x64xf32, #tpu.memory_space<vmem>>, vector<8x64xf32>
    %cst_267 = arith.constant 0.000000e+00 : f32
    %1018 = vector.broadcast %cst_267 : f32 to vector<8x64xf32>
    %1019 = arith.cmpf ogt, %1017, %1018 : vector<8x64xf32>
    %1020 = arith.select %1019, %1015, %971 : vector<8x64xi1>, vector<8x64xf32>
    %1021 = arith.select %1019, %1013, %972 : vector<8x64xi1>, vector<8x64xf32>
    %1022 = arith.mulf %1017, %1015 : vector<8x64xf32>
    %1023 = vector.extract_strided_slice %1022 {offsets = [0, 0], sizes = [8, 32], strides = [1, 1]} : vector<8x64xf32> to vector<8x32xf32>
    %1024 = arith.index_cast %981 : i32 to index
    %c0_268 = arith.constant 0 : index
    %1025 = vector.load %arg15[%1024, %c0_268] : memref<64x64xf32, #tpu.memory_space<vmem>>, vector<8x32xf32>
    tpu.vector_store %arg15[%1024, %c0_268], %1023 {strides = array<i32>} : memref<64x64xf32, #tpu.memory_space<vmem>>, vector<8x32xf32>,
    %1026 = vector.extract_strided_slice %1022 {offsets = [0, 32], sizes = [8, 32], strides = [1, 1]} : vector<8x64xf32> to vector<8x32xf32>
    %1027 = arith.index_cast %984 : i32 to index
    %c32_269 = arith.constant 32 : index
    %1028 = vector.load %arg15[%1027, %c32_269] : memref<64x64xf32, #tpu.memory_space<vmem>>, vector<8x32xf32>
    tpu.vector_store %arg15[%1027, %c32_269], %1026 {strides = array<i32>} : memref<64x64xf32, #tpu.memory_space<vmem>>, vector<8x32xf32>,
    %c4_i32_270 = arith.constant 4 : i32
    %c8_i32_271 = arith.constant 8 : i32
    %1029 = arith.muli %c4_i32_270, %c8_i32_271 : i32
    %1030 = tpu.assume_multiple %1029, 8 : i32
    %c7_i32_272 = arith.constant 7 : i32
    %1031 = arith.subi %c7_i32_272, %c4_i32_270 : i32
    %c8_i32_273 = arith.constant 8 : i32
    %1032 = arith.muli %1031, %c8_i32_273 : i32
    %1033 = tpu.assume_multiple %1032, 8 : i32
    %1034 = arith.index_cast %1030 : i32 to index
    %c0_274 = arith.constant 0 : index
    %1035 = vector.load %arg14[%1034, %c0_274] : memref<64x256xf32, #tpu.memory_space<vmem>>, vector<8x128xf32>
    %1036 = arith.index_cast %1033 : i32 to index
    %c128_275 = arith.constant 128 : index
    %1037 = vector.load %arg14[%1036, %c128_275] : memref<64x256xf32, #tpu.memory_space<vmem>>, vector<8x128xf32>
    %1038 = tpu.concatenate %1035, %1037 in 1 : vector<8x128xf32>, vector<8x128xf32> -> vector<8x256xf32>
    %cst_276 = arith.constant dense<0.000000e+00> : vector<8x256xf32>
    %1039 = tpu.matmul %1020, %831, %cst_276 {dimension_numbers = #tpu.dot_dimension_numbers<[1], [0], [0], [1], [0, 0, 1, 1], [], []>} : vector<8x64xf32>, vector<64x256xf32>, vector<8x256xf32> -> vector<8x256xf32>
    %1040 = arith.addf %1038, %1039 : vector<8x256xf32>
    %1041 = math.tanh %1040 : vector<8x256xf32>
    %1042 = arith.negf %1040 : vector<8x256xf32>
    %1043 = math.exp %1042 : vector<8x256xf32>
    %cst_277 = arith.constant 1.000000e+00 : f32
    %1044 = vector.broadcast %cst_277 : f32 to vector<8x256xf32>
    %1045 = arith.addf %1044, %1043 : vector<8x256xf32>
    %1046 = arith.divf %1044, %1045 : vector<8x256xf32>
    %1047 = arith.select %21, %1041, %1046 : vector<8x256xi1>, vector<8x256xf32>
    %1048 = vector.extract_strided_slice %1047 {offsets = [0, 0], sizes = [8, 32], strides = [1, 1]} : vector<8x256xf32> to vector<8x32xf32>
    %1049 = vector.extract_strided_slice %1047 {offsets = [0, 128], sizes = [8, 32], strides = [1, 1]} : vector<8x256xf32> to vector<8x32xf32>
    %1050 = tpu.concatenate %1048, %1049 in 1 : vector<8x32xf32>, vector<8x32xf32> -> vector<8x64xf32>
    %1051 = vector.extract_strided_slice %1047 {offsets = [0, 32], sizes = [8, 32], strides = [1, 1]} : vector<8x256xf32> to vector<8x32xf32>
    %1052 = vector.extract_strided_slice %1047 {offsets = [0, 160], sizes = [8, 32], strides = [1, 1]} : vector<8x256xf32> to vector<8x32xf32>
    %1053 = tpu.concatenate %1051, %1052 in 1 : vector<8x32xf32>, vector<8x32xf32> -> vector<8x64xf32>
    %1054 = vector.extract_strided_slice %1047 {offsets = [0, 64], sizes = [8, 32], strides = [1, 1]} : vector<8x256xf32> to vector<8x32xf32>
    %1055 = vector.extract_strided_slice %1047 {offsets = [0, 192], sizes = [8, 32], strides = [1, 1]} : vector<8x256xf32> to vector<8x32xf32>
    %1056 = tpu.concatenate %1054, %1055 in 1 : vector<8x32xf32>, vector<8x32xf32> -> vector<8x64xf32>
    %1057 = vector.extract_strided_slice %1047 {offsets = [0, 96], sizes = [8, 32], strides = [1, 1]} : vector<8x256xf32> to vector<8x32xf32>
    %1058 = vector.extract_strided_slice %1047 {offsets = [0, 224], sizes = [8, 32], strides = [1, 1]} : vector<8x256xf32> to vector<8x32xf32>
    %1059 = tpu.concatenate %1057, %1058 in 1 : vector<8x32xf32>, vector<8x32xf32> -> vector<8x64xf32>
    %1060 = arith.mulf %1053, %1021 : vector<8x64xf32>
    %1061 = arith.mulf %1050, %1056 : vector<8x64xf32>
    %1062 = arith.addf %1060, %1061 : vector<8x64xf32>
    %1063 = math.tanh %1062 : vector<8x64xf32>
    %1064 = arith.mulf %1059, %1063 : vector<8x64xf32>
    %1065 = arith.index_cast %1030 : i32 to index
    %c0_278 = arith.constant 0 : index
    %1066 = vector.load %arg1[%1065, %c0_278] : memref<64x64xf32, #tpu.memory_space<vmem>>, vector<8x64xf32>
    %cst_279 = arith.constant 0.000000e+00 : f32
    %1067 = vector.broadcast %cst_279 : f32 to vector<8x64xf32>
    %1068 = arith.cmpf ogt, %1066, %1067 : vector<8x64xf32>
    %1069 = arith.select %1068, %1064, %1020 : vector<8x64xi1>, vector<8x64xf32>
    %1070 = arith.select %1068, %1062, %1021 : vector<8x64xi1>, vector<8x64xf32>
    %1071 = arith.mulf %1066, %1064 : vector<8x64xf32>
    %1072 = vector.extract_strided_slice %1071 {offsets = [0, 0], sizes = [8, 32], strides = [1, 1]} : vector<8x64xf32> to vector<8x32xf32>
    %1073 = arith.index_cast %1030 : i32 to index
    %c0_280 = arith.constant 0 : index
    %1074 = vector.load %arg15[%1073, %c0_280] : memref<64x64xf32, #tpu.memory_space<vmem>>, vector<8x32xf32>
    tpu.vector_store %arg15[%1073, %c0_280], %1072 {strides = array<i32>} : memref<64x64xf32, #tpu.memory_space<vmem>>, vector<8x32xf32>,
    %1075 = vector.extract_strided_slice %1071 {offsets = [0, 32], sizes = [8, 32], strides = [1, 1]} : vector<8x64xf32> to vector<8x32xf32>
    %1076 = arith.index_cast %1033 : i32 to index
    %c32_281 = arith.constant 32 : index
    %1077 = vector.load %arg15[%1076, %c32_281] : memref<64x64xf32, #tpu.memory_space<vmem>>, vector<8x32xf32>
    tpu.vector_store %arg15[%1076, %c32_281], %1075 {strides = array<i32>} : memref<64x64xf32, #tpu.memory_space<vmem>>, vector<8x32xf32>,
    %c5_i32_282 = arith.constant 5 : i32
    %c8_i32_283 = arith.constant 8 : i32
    %1078 = arith.muli %c5_i32_282, %c8_i32_283 : i32
    %1079 = tpu.assume_multiple %1078, 8 : i32
    %c7_i32_284 = arith.constant 7 : i32
    %1080 = arith.subi %c7_i32_284, %c5_i32_282 : i32
    %c8_i32_285 = arith.constant 8 : i32
    %1081 = arith.muli %1080, %c8_i32_285 : i32
    %1082 = tpu.assume_multiple %1081, 8 : i32
    %1083 = arith.index_cast %1079 : i32 to index
    %c0_286 = arith.constant 0 : index
    %1084 = vector.load %arg14[%1083, %c0_286] : memref<64x256xf32, #tpu.memory_space<vmem>>, vector<8x128xf32>
    %1085 = arith.index_cast %1082 : i32 to index
    %c128_287 = arith.constant 128 : index
    %1086 = vector.load %arg14[%1085, %c128_287] : memref<64x256xf32, #tpu.memory_space<vmem>>, vector<8x128xf32>
    %1087 = tpu.concatenate %1084, %1086 in 1 : vector<8x128xf32>, vector<8x128xf32> -> vector<8x256xf32>
    %cst_288 = arith.constant dense<0.000000e+00> : vector<8x256xf32>
    %1088 = tpu.matmul %1069, %831, %cst_288 {dimension_numbers = #tpu.dot_dimension_numbers<[1], [0], [0], [1], [0, 0, 1, 1], [], []>} : vector<8x64xf32>, vector<64x256xf32>, vector<8x256xf32> -> vector<8x256xf32>
    %1089 = arith.addf %1087, %1088 : vector<8x256xf32>
    %1090 = math.tanh %1089 : vector<8x256xf32>
    %1091 = arith.negf %1089 : vector<8x256xf32>
    %1092 = math.exp %1091 : vector<8x256xf32>
    %cst_289 = arith.constant 1.000000e+00 : f32
    %1093 = vector.broadcast %cst_289 : f32 to vector<8x256xf32>
    %1094 = arith.addf %1093, %1092 : vector<8x256xf32>
    %1095 = arith.divf %1093, %1094 : vector<8x256xf32>
    %1096 = arith.select %21, %1090, %1095 : vector<8x256xi1>, vector<8x256xf32>
    %1097 = vector.extract_strided_slice %1096 {offsets = [0, 0], sizes = [8, 32], strides = [1, 1]} : vector<8x256xf32> to vector<8x32xf32>
    %1098 = vector.extract_strided_slice %1096 {offsets = [0, 128], sizes = [8, 32], strides = [1, 1]} : vector<8x256xf32> to vector<8x32xf32>
    %1099 = tpu.concatenate %1097, %1098 in 1 : vector<8x32xf32>, vector<8x32xf32> -> vector<8x64xf32>
    %1100 = vector.extract_strided_slice %1096 {offsets = [0, 32], sizes = [8, 32], strides = [1, 1]} : vector<8x256xf32> to vector<8x32xf32>
    %1101 = vector.extract_strided_slice %1096 {offsets = [0, 160], sizes = [8, 32], strides = [1, 1]} : vector<8x256xf32> to vector<8x32xf32>
    %1102 = tpu.concatenate %1100, %1101 in 1 : vector<8x32xf32>, vector<8x32xf32> -> vector<8x64xf32>
    %1103 = vector.extract_strided_slice %1096 {offsets = [0, 64], sizes = [8, 32], strides = [1, 1]} : vector<8x256xf32> to vector<8x32xf32>
    %1104 = vector.extract_strided_slice %1096 {offsets = [0, 192], sizes = [8, 32], strides = [1, 1]} : vector<8x256xf32> to vector<8x32xf32>
    %1105 = tpu.concatenate %1103, %1104 in 1 : vector<8x32xf32>, vector<8x32xf32> -> vector<8x64xf32>
    %1106 = vector.extract_strided_slice %1096 {offsets = [0, 96], sizes = [8, 32], strides = [1, 1]} : vector<8x256xf32> to vector<8x32xf32>
    %1107 = vector.extract_strided_slice %1096 {offsets = [0, 224], sizes = [8, 32], strides = [1, 1]} : vector<8x256xf32> to vector<8x32xf32>
    %1108 = tpu.concatenate %1106, %1107 in 1 : vector<8x32xf32>, vector<8x32xf32> -> vector<8x64xf32>
    %1109 = arith.mulf %1102, %1070 : vector<8x64xf32>
    %1110 = arith.mulf %1099, %1105 : vector<8x64xf32>
    %1111 = arith.addf %1109, %1110 : vector<8x64xf32>
    %1112 = math.tanh %1111 : vector<8x64xf32>
    %1113 = arith.mulf %1108, %1112 : vector<8x64xf32>
    %1114 = arith.index_cast %1079 : i32 to index
    %c0_290 = arith.constant 0 : index
    %1115 = vector.load %arg1[%1114, %c0_290] : memref<64x64xf32, #tpu.memory_space<vmem>>, vector<8x64xf32>
    %cst_291 = arith.constant 0.000000e+00 : f32
    %1116 = vector.broadcast %cst_291 : f32 to vector<8x64xf32>
    %1117 = arith.cmpf ogt, %1115, %1116 : vector<8x64xf32>
    %1118 = arith.select %1117, %1113, %1069 : vector<8x64xi1>, vector<8x64xf32>
    %1119 = arith.select %1117, %1111, %1070 : vector<8x64xi1>, vector<8x64xf32>
    %1120 = arith.mulf %1115, %1113 : vector<8x64xf32>
    %1121 = vector.extract_strided_slice %1120 {offsets = [0, 0], sizes = [8, 32], strides = [1, 1]} : vector<8x64xf32> to vector<8x32xf32>
    %1122 = arith.index_cast %1079 : i32 to index
    %c0_292 = arith.constant 0 : index
    %1123 = vector.load %arg15[%1122, %c0_292] : memref<64x64xf32, #tpu.memory_space<vmem>>, vector<8x32xf32>
    tpu.vector_store %arg15[%1122, %c0_292], %1121 {strides = array<i32>} : memref<64x64xf32, #tpu.memory_space<vmem>>, vector<8x32xf32>,
    %1124 = vector.extract_strided_slice %1120 {offsets = [0, 32], sizes = [8, 32], strides = [1, 1]} : vector<8x64xf32> to vector<8x32xf32>
    %1125 = arith.index_cast %1082 : i32 to index
    %c32_293 = arith.constant 32 : index
    %1126 = vector.load %arg15[%1125, %c32_293] : memref<64x64xf32, #tpu.memory_space<vmem>>, vector<8x32xf32>
    tpu.vector_store %arg15[%1125, %c32_293], %1124 {strides = array<i32>} : memref<64x64xf32, #tpu.memory_space<vmem>>, vector<8x32xf32>,
    %c6_i32_294 = arith.constant 6 : i32
    %c8_i32_295 = arith.constant 8 : i32
    %1127 = arith.muli %c6_i32_294, %c8_i32_295 : i32
    %1128 = tpu.assume_multiple %1127, 8 : i32
    %c7_i32_296 = arith.constant 7 : i32
    %1129 = arith.subi %c7_i32_296, %c6_i32_294 : i32
    %c8_i32_297 = arith.constant 8 : i32
    %1130 = arith.muli %1129, %c8_i32_297 : i32
    %1131 = tpu.assume_multiple %1130, 8 : i32
    %1132 = arith.index_cast %1128 : i32 to index
    %c0_298 = arith.constant 0 : index
    %1133 = vector.load %arg14[%1132, %c0_298] : memref<64x256xf32, #tpu.memory_space<vmem>>, vector<8x128xf32>
    %1134 = arith.index_cast %1131 : i32 to index
    %c128_299 = arith.constant 128 : index
    %1135 = vector.load %arg14[%1134, %c128_299] : memref<64x256xf32, #tpu.memory_space<vmem>>, vector<8x128xf32>
    %1136 = tpu.concatenate %1133, %1135 in 1 : vector<8x128xf32>, vector<8x128xf32> -> vector<8x256xf32>
    %cst_300 = arith.constant dense<0.000000e+00> : vector<8x256xf32>
    %1137 = tpu.matmul %1118, %831, %cst_300 {dimension_numbers = #tpu.dot_dimension_numbers<[1], [0], [0], [1], [0, 0, 1, 1], [], []>} : vector<8x64xf32>, vector<64x256xf32>, vector<8x256xf32> -> vector<8x256xf32>
    %1138 = arith.addf %1136, %1137 : vector<8x256xf32>
    %1139 = math.tanh %1138 : vector<8x256xf32>
    %1140 = arith.negf %1138 : vector<8x256xf32>
    %1141 = math.exp %1140 : vector<8x256xf32>
    %cst_301 = arith.constant 1.000000e+00 : f32
    %1142 = vector.broadcast %cst_301 : f32 to vector<8x256xf32>
    %1143 = arith.addf %1142, %1141 : vector<8x256xf32>
    %1144 = arith.divf %1142, %1143 : vector<8x256xf32>
    %1145 = arith.select %21, %1139, %1144 : vector<8x256xi1>, vector<8x256xf32>
    %1146 = vector.extract_strided_slice %1145 {offsets = [0, 0], sizes = [8, 32], strides = [1, 1]} : vector<8x256xf32> to vector<8x32xf32>
    %1147 = vector.extract_strided_slice %1145 {offsets = [0, 128], sizes = [8, 32], strides = [1, 1]} : vector<8x256xf32> to vector<8x32xf32>
    %1148 = tpu.concatenate %1146, %1147 in 1 : vector<8x32xf32>, vector<8x32xf32> -> vector<8x64xf32>
    %1149 = vector.extract_strided_slice %1145 {offsets = [0, 32], sizes = [8, 32], strides = [1, 1]} : vector<8x256xf32> to vector<8x32xf32>
    %1150 = vector.extract_strided_slice %1145 {offsets = [0, 160], sizes = [8, 32], strides = [1, 1]} : vector<8x256xf32> to vector<8x32xf32>
    %1151 = tpu.concatenate %1149, %1150 in 1 : vector<8x32xf32>, vector<8x32xf32> -> vector<8x64xf32>
    %1152 = vector.extract_strided_slice %1145 {offsets = [0, 64], sizes = [8, 32], strides = [1, 1]} : vector<8x256xf32> to vector<8x32xf32>
    %1153 = vector.extract_strided_slice %1145 {offsets = [0, 192], sizes = [8, 32], strides = [1, 1]} : vector<8x256xf32> to vector<8x32xf32>
    %1154 = tpu.concatenate %1152, %1153 in 1 : vector<8x32xf32>, vector<8x32xf32> -> vector<8x64xf32>
    %1155 = vector.extract_strided_slice %1145 {offsets = [0, 96], sizes = [8, 32], strides = [1, 1]} : vector<8x256xf32> to vector<8x32xf32>
    %1156 = vector.extract_strided_slice %1145 {offsets = [0, 224], sizes = [8, 32], strides = [1, 1]} : vector<8x256xf32> to vector<8x32xf32>
    %1157 = tpu.concatenate %1155, %1156 in 1 : vector<8x32xf32>, vector<8x32xf32> -> vector<8x64xf32>
    %1158 = arith.mulf %1151, %1119 : vector<8x64xf32>
    %1159 = arith.mulf %1148, %1154 : vector<8x64xf32>
    %1160 = arith.addf %1158, %1159 : vector<8x64xf32>
    %1161 = math.tanh %1160 : vector<8x64xf32>
    %1162 = arith.mulf %1157, %1161 : vector<8x64xf32>
    %1163 = arith.index_cast %1128 : i32 to index
    %c0_302 = arith.constant 0 : index
    %1164 = vector.load %arg1[%1163, %c0_302] : memref<64x64xf32, #tpu.memory_space<vmem>>, vector<8x64xf32>
    %cst_303 = arith.constant 0.000000e+00 : f32
    %1165 = vector.broadcast %cst_303 : f32 to vector<8x64xf32>
    %1166 = arith.cmpf ogt, %1164, %1165 : vector<8x64xf32>
    %1167 = arith.select %1166, %1162, %1118 : vector<8x64xi1>, vector<8x64xf32>
    %1168 = arith.select %1166, %1160, %1119 : vector<8x64xi1>, vector<8x64xf32>
    %1169 = arith.mulf %1164, %1162 : vector<8x64xf32>
    %1170 = vector.extract_strided_slice %1169 {offsets = [0, 0], sizes = [8, 32], strides = [1, 1]} : vector<8x64xf32> to vector<8x32xf32>
    %1171 = arith.index_cast %1128 : i32 to index
    %c0_304 = arith.constant 0 : index
    %1172 = vector.load %arg15[%1171, %c0_304] : memref<64x64xf32, #tpu.memory_space<vmem>>, vector<8x32xf32>
    tpu.vector_store %arg15[%1171, %c0_304], %1170 {strides = array<i32>} : memref<64x64xf32, #tpu.memory_space<vmem>>, vector<8x32xf32>,
    %1173 = vector.extract_strided_slice %1169 {offsets = [0, 32], sizes = [8, 32], strides = [1, 1]} : vector<8x64xf32> to vector<8x32xf32>
    %1174 = arith.index_cast %1131 : i32 to index
    %c32_305 = arith.constant 32 : index
    %1175 = vector.load %arg15[%1174, %c32_305] : memref<64x64xf32, #tpu.memory_space<vmem>>, vector<8x32xf32>
    tpu.vector_store %arg15[%1174, %c32_305], %1173 {strides = array<i32>} : memref<64x64xf32, #tpu.memory_space<vmem>>, vector<8x32xf32>,
    %c7_i32_306 = arith.constant 7 : i32
    %c8_i32_307 = arith.constant 8 : i32
    %1176 = arith.muli %c7_i32_306, %c8_i32_307 : i32
    %1177 = tpu.assume_multiple %1176, 8 : i32
    %c7_i32_308 = arith.constant 7 : i32
    %1178 = arith.subi %c7_i32_308, %c7_i32_306 : i32
    %c8_i32_309 = arith.constant 8 : i32
    %1179 = arith.muli %1178, %c8_i32_309 : i32
    %1180 = tpu.assume_multiple %1179, 8 : i32
    %1181 = arith.index_cast %1177 : i32 to index
    %c0_310 = arith.constant 0 : index
    %1182 = vector.load %arg14[%1181, %c0_310] : memref<64x256xf32, #tpu.memory_space<vmem>>, vector<8x128xf32>
    %1183 = arith.index_cast %1180 : i32 to index
    %c128_311 = arith.constant 128 : index
    %1184 = vector.load %arg14[%1183, %c128_311] : memref<64x256xf32, #tpu.memory_space<vmem>>, vector<8x128xf32>
    %1185 = tpu.concatenate %1182, %1184 in 1 : vector<8x128xf32>, vector<8x128xf32> -> vector<8x256xf32>
    %cst_312 = arith.constant dense<0.000000e+00> : vector<8x256xf32>
    %1186 = tpu.matmul %1167, %831, %cst_312 {dimension_numbers = #tpu.dot_dimension_numbers<[1], [0], [0], [1], [0, 0, 1, 1], [], []>} : vector<8x64xf32>, vector<64x256xf32>, vector<8x256xf32> -> vector<8x256xf32>
    %1187 = arith.addf %1185, %1186 : vector<8x256xf32>
    %1188 = math.tanh %1187 : vector<8x256xf32>
    %1189 = arith.negf %1187 : vector<8x256xf32>
    %1190 = math.exp %1189 : vector<8x256xf32>
    %cst_313 = arith.constant 1.000000e+00 : f32
    %1191 = vector.broadcast %cst_313 : f32 to vector<8x256xf32>
    %1192 = arith.addf %1191, %1190 : vector<8x256xf32>
    %1193 = arith.divf %1191, %1192 : vector<8x256xf32>
    %1194 = arith.select %21, %1188, %1193 : vector<8x256xi1>, vector<8x256xf32>
    %1195 = vector.extract_strided_slice %1194 {offsets = [0, 0], sizes = [8, 32], strides = [1, 1]} : vector<8x256xf32> to vector<8x32xf32>
    %1196 = vector.extract_strided_slice %1194 {offsets = [0, 128], sizes = [8, 32], strides = [1, 1]} : vector<8x256xf32> to vector<8x32xf32>
    %1197 = tpu.concatenate %1195, %1196 in 1 : vector<8x32xf32>, vector<8x32xf32> -> vector<8x64xf32>
    %1198 = vector.extract_strided_slice %1194 {offsets = [0, 32], sizes = [8, 32], strides = [1, 1]} : vector<8x256xf32> to vector<8x32xf32>
    %1199 = vector.extract_strided_slice %1194 {offsets = [0, 160], sizes = [8, 32], strides = [1, 1]} : vector<8x256xf32> to vector<8x32xf32>
    %1200 = tpu.concatenate %1198, %1199 in 1 : vector<8x32xf32>, vector<8x32xf32> -> vector<8x64xf32>
    %1201 = vector.extract_strided_slice %1194 {offsets = [0, 64], sizes = [8, 32], strides = [1, 1]} : vector<8x256xf32> to vector<8x32xf32>
    %1202 = vector.extract_strided_slice %1194 {offsets = [0, 192], sizes = [8, 32], strides = [1, 1]} : vector<8x256xf32> to vector<8x32xf32>
    %1203 = tpu.concatenate %1201, %1202 in 1 : vector<8x32xf32>, vector<8x32xf32> -> vector<8x64xf32>
    %1204 = vector.extract_strided_slice %1194 {offsets = [0, 96], sizes = [8, 32], strides = [1, 1]} : vector<8x256xf32> to vector<8x32xf32>
    %1205 = vector.extract_strided_slice %1194 {offsets = [0, 224], sizes = [8, 32], strides = [1, 1]} : vector<8x256xf32> to vector<8x32xf32>
    %1206 = tpu.concatenate %1204, %1205 in 1 : vector<8x32xf32>, vector<8x32xf32> -> vector<8x64xf32>
    %1207 = arith.mulf %1200, %1168 : vector<8x64xf32>
    %1208 = arith.mulf %1197, %1203 : vector<8x64xf32>
    %1209 = arith.addf %1207, %1208 : vector<8x64xf32>
    %1210 = math.tanh %1209 : vector<8x64xf32>
    %1211 = arith.mulf %1206, %1210 : vector<8x64xf32>
    %1212 = arith.index_cast %1177 : i32 to index
    %c0_314 = arith.constant 0 : index
    %1213 = vector.load %arg1[%1212, %c0_314] : memref<64x64xf32, #tpu.memory_space<vmem>>, vector<8x64xf32>
    %cst_315 = arith.constant 0.000000e+00 : f32
    %1214 = vector.broadcast %cst_315 : f32 to vector<8x64xf32>
    %1215 = arith.cmpf ogt, %1213, %1214 : vector<8x64xf32>
    %1216 = arith.select %1215, %1211, %1167 : vector<8x64xi1>, vector<8x64xf32>
    %1217 = arith.select %1215, %1209, %1168 : vector<8x64xi1>, vector<8x64xf32>
    %1218 = arith.mulf %1213, %1211 : vector<8x64xf32>
    %1219 = vector.extract_strided_slice %1218 {offsets = [0, 0], sizes = [8, 32], strides = [1, 1]} : vector<8x64xf32> to vector<8x32xf32>
    %1220 = arith.index_cast %1177 : i32 to index
    %c0_316 = arith.constant 0 : index
    %1221 = vector.load %arg15[%1220, %c0_316] : memref<64x64xf32, #tpu.memory_space<vmem>>, vector<8x32xf32>
    tpu.vector_store %arg15[%1220, %c0_316], %1219 {strides = array<i32>} : memref<64x64xf32, #tpu.memory_space<vmem>>, vector<8x32xf32>,
    %1222 = vector.extract_strided_slice %1218 {offsets = [0, 32], sizes = [8, 32], strides = [1, 1]} : vector<8x64xf32> to vector<8x32xf32>
    %1223 = arith.index_cast %1180 : i32 to index
    %c32_317 = arith.constant 32 : index
    %1224 = vector.load %arg15[%1223, %c32_317] : memref<64x64xf32, #tpu.memory_space<vmem>>, vector<8x32xf32>
    tpu.vector_store %arg15[%1223, %c32_317], %1222 {strides = array<i32>} : memref<64x64xf32, #tpu.memory_space<vmem>>, vector<8x32xf32>,
    %c8_i32_318 = arith.constant 8 : i32
    %c0_319 = arith.constant 0 : index
    %c0_320 = arith.constant 0 : index
    %1225 = vector.load %arg15[%c0_319, %c0_320] : memref<64x64xf32, #tpu.memory_space<vmem>>, vector<64x64xf32>
    %c0_321 = arith.constant 0 : index
    %c0_322 = arith.constant 0 : index
    %1226 = vector.load %arg11[%c0_321, %c0_322] : memref<64x128xf32, #tpu.memory_space<vmem>>, vector<64x128xf32>
    %cst_323 = arith.constant dense<0.000000e+00> : vector<64x128xf32>
    %1227 = tpu.matmul %1225, %1226, %cst_323 {dimension_numbers = #tpu.dot_dimension_numbers<[1], [0], [0], [1], [0, 0, 1, 1], [], []>} : vector<64x64xf32>, vector<64x128xf32>, vector<64x128xf32> -> vector<64x128xf32>
    %c0_324 = arith.constant 0 : index
    %c0_325 = arith.constant 0 : index
    %1228 = vector.load %arg12[%c0_324, %c0_325] : memref<1x128xf32, #tpu.memory_space<vmem>>, vector<1x128xf32>
    %1229 = vector.broadcast %1228 : vector<1x128xf32> to vector<64x128xf32>
    %1230 = arith.addf %1227, %1229 : vector<64x128xf32>
    %c0_326 = arith.constant 0 : index
    %c0_327 = arith.constant 0 : index
    %1231 = vector.load %arg13[%c0_326, %c0_327] : memref<64x128xf32, #tpu.memory_space<vmem>>, vector<64x128xf32>
    tpu.vector_store %arg13[%c0_326, %c0_327], %1230 {strides = array<i32>} : memref<64x128xf32, #tpu.memory_space<vmem>>, vector<64x128xf32>,
    return
  }
}

</mosaic_0001>

<bundles_post_ra>
// kernel: tpu_custom_call.1
= control target key start
LH: loop header
LB: loop body
LE: loop exit
PB: predicated region body
PF: predicated region fallthrough
CT: control target
= control target key end

     0   :  { %18 = vsyncpa [#allocation6], 0  ;;  %s6561_s0 = inlined_call_operand.vmem [shape: f32[64,32], index: 0, kind: input, shape index: {}]   ;;  %s6562_s1 = inlined_call_operand.hbm [shape: f32[64,64], index: 1, kind: input, shape index: {}]   ;;  %s6563_s2 = inlined_call_operand.hbm [shape: f32[32,256], index: 2, kind: input, shape index: {}]   ;;  %s6564_s3 = inlined_call_operand.hbm [shape: f32[64,256], index: 3, kind: input, shape index: {}]   ;;  %s6565_s4 = inlined_call_operand.vmem [shape: f32[1,256], index: 4, kind: input, shape index: {}]   ;;  %s6566_s5 = inlined_call_operand.hbm [shape: f32[64,256], index: 5, kind: input, shape index: {}]   ;;  %s6567_s6 = inlined_call_operand.hbm [shape: f32[64,256], index: 6, kind: input, shape index: {}]   ;;  %s6568_s7 = inlined_call_operand.hbm [shape: f32[1,256], index: 7, kind: input, shape index: {}]   ;;  %s6569_s8 = inlined_call_operand.hbm [shape: f32[64,256], index: 8, kind: input, shape index: {}]   ;;  %s6570_s9 = inlined_call_operand.vmem [shape: f32[64,256], index: 9, kind: input, shape index: {}]   ;;  %s6571_s10 = inlined_call_operand.vmem [shape: f32[1,256], index: 10, kind: input, shape index: {}]   ;;  %s6572_s11 = inlined_call_operand.hbm [shape: f32[64,128], index: 11, kind: input, shape index: {}]   ;;  %s6573_s12 = inlined_call_operand.vmem [shape: f32[1,128], index: 12, kind: input, shape index: {}]   ;;  %s6574_s13 = inlined_call_operand.hbm [shape: f32[64,128], index: 13, kind: output, shape index: {}]  }
   0x1   :  { %19 = vsyncpa [#allocation9], 0 }
   0x2   :  { %20 = vsyncpa [#allocation12], 0 }
   0x3   :  { %21 = vsyncpa [#allocation15], 0 }
   0x4   :  { %22 = vsyncpa [#allocation18], 0 }
   0x5   :  { %23 = vsyncpa [#allocation7], 0  ;;  %s5286_s25 = smov [#allocation8]   ;;  %s5076_s29 = scalar_lea.hbm %s6563_s2, 1024 }
   0x6   :  { %s43_s26 = sshll.u32 %s5286_s25, 4  ;;  %p5077_p0 = scmp.ne.s32.totalorder %s6563_s2, %s5076_s29  ;;  %s44_s26 = int_to_ptr.vmem [resolvable:$true] %s43_s26 }
   0x7   :  { %p5080_p1 = scmp.lt.u32.totalorder %s5076_s29, %s6563_s2 }
   0x9   :  { %p5082_p2 = pnand %p5080_p1, %p5077_p0 }
   0xb   :  { %5085 = shalt.err (!%p5082_p2)
}
   0xc   :  { %s5086_s17 = scalar_lea.vmem %s44_s26, 1024  ;;  %p5091_p4 = scmp.lt.s32.totalorder %s44_s26, %s44_s26 }
   0xd   :  { %p5087_p3 = scmp.ne.s32.totalorder %s44_s26, %s5086_s17  ;;  %p5092_p5 = scmp.lt.s32.totalorder %s5086_s17, %s5086_s17 }
   0xf   :  { %p5093_p6 = por %p5092_p5, %p5091_p4 }
  0x11   :  { %p5094_p7 = pnand %p5093_p6, %p5087_p3 }
  0x13   :  { %5097 = shalt.err (!%p5094_p7)
}
  0x14   :  { %s5287_s18 = smov 256   ;;  %s5288_s19 = smov 16  }
  0x15   :  { %49 = dma.hbm_to_vmem [thread:$0]  %s6563_s2, 1024, %s44_s26, [#allocation9], %s5287_s18, %s5287_s18, %s5288_s19  }
  0x16   :  { %s5289_s22 = smov [#allocation11]   ;;  %s5290_s24 = smov [#allocation14]  }
  0x17   :  { %s69_s23 = sshll.u32 %s5289_s22, 4  ;;  %s94_s25 = sshll.u32 %s5290_s24, 4  ;;  %s70_s23 = int_to_ptr.vmem [resolvable:$true] %s69_s23  ;;  %s95_s25 = int_to_ptr.vmem [resolvable:$true] %s94_s25 }
  0x18   :  { %s5098_s29 = scalar_lea.hbm %s6566_s5, 2048 }
  0x19   :  { %p5099_p8 = scmp.ne.s32.totalorder %s6566_s5, %s5098_s29  ;;  %p5102_p9 = scmp.lt.u32.totalorder %s5098_s29, %s6566_s5 }
  0x1b   :  { %p5104_p10 = pnand %p5102_p9, %p5099_p8 }
  0x1d   :  { %5107 = shalt.err (!%p5104_p10)
}
  0x1e   :  { %s5108_s2 = scalar_lea.vmem %s70_s23, 2048  ;;  %p5113_p12 = scmp.lt.s32.totalorder %s70_s23, %s70_s23 }
  0x1f   :  { %p5109_p11 = scmp.ne.s32.totalorder %s70_s23, %s5108_s2  ;;  %p5114_p13 = scmp.lt.s32.totalorder %s5108_s2, %s5108_s2 }
  0x21   :  { %p5115_p0 = por %p5114_p13, %p5113_p12 }
  0x23   :  { %p5116_p1 = pnand %p5115_p0, %p5109_p11 }
  0x25   :  { %5119 = shalt.err (!%p5116_p1)
}
  0x26   :  { %75 = dma.hbm_to_vmem [thread:$0]  %s6566_s5, 2048, %s70_s23, [#allocation12], %s5287_s18, %s5287_s18, %s5288_s19  }
  0x27   :  { %s5120_s22 = scalar_lea.hbm %s6568_s7, 32 }
  0x28   :  { %p5121_p2 = scmp.ne.s32.totalorder %s6568_s7, %s5120_s22  ;;  %p5124_p3 = scmp.lt.u32.totalorder %s5120_s22, %s6568_s7 }
  0x2a   :  { %p5126_p4 = pnand %p5124_p3, %p5121_p2 }
  0x2c   :  { %5129 = shalt.err (!%p5126_p4)
}
  0x2d   :  { %s5130_s30 = scalar_lea.vmem %s95_s25, 32  ;;  %p5135_p6 = scmp.lt.s32.totalorder %s95_s25, %s95_s25 }
  0x2e   :  { %p5131_p5 = scmp.ne.s32.totalorder %s95_s25, %s5130_s30  ;;  %p5136_p7 = scmp.lt.s32.totalorder %s5130_s30, %s5130_s30 }
  0x30   :  { %p5137_p8 = por %p5136_p7, %p5135_p6 }
  0x32   :  { %p5138_p9 = pnand %p5137_p8, %p5131_p5 }
  0x34   :  { %5141 = shalt.err (!%p5138_p9)
}
  0x35   :  { %97 = dma.hbm_to_vmem [thread:$0]  %s6568_s7, 32, %s95_s25, [#allocation15]  }
  0x36   :  { %s5291_s14 = smov [#allocation5]   ;;  %s5142_s26 = scalar_lea.hbm %s6562_s1, 1024 }
  0x37   :  { %s31_s15 = sshll.u32 %s5291_s14, 4  ;;  %p5143_p10 = scmp.ne.s32.totalorder %s6562_s1, %s5142_s26  ;;  %s32_s15 = int_to_ptr.vmem [resolvable:$true] %s31_s15 }
  0x38   :  { %p5146_p11 = scmp.lt.u32.totalorder %s5142_s26, %s6562_s1 }
  0x3a   :  { %p5148_p12 = pnand %p5146_p11, %p5143_p10 }
  0x3c   :  { %5151 = shalt.err (!%p5148_p12)
}
  0x3d   :  { %s5152_s24 = scalar_lea.vmem %s32_s15, 1024  ;;  %p5157_p0 = scmp.lt.s32.totalorder %s32_s15, %s32_s15 }
  0x3e   :  { %p5153_p13 = scmp.ne.s32.totalorder %s32_s15, %s5152_s24  ;;  %p5158_p1 = scmp.lt.s32.totalorder %s5152_s24, %s5152_s24 }
  0x40   :  { %p5159_p2 = por %p5158_p1, %p5157_p0 }
  0x42   :  { %p5160_p3 = pnand %p5159_p2, %p5153_p13 }
  0x44   :  { %5163 = shalt.err (!%p5160_p3)
}
  0x45   :  { %s5292_s7 = smov 128   ;;  %s5293_s25 = smov 8  }
  0x46   :  { %37 = dma.hbm_to_vmem [thread:$0]  %s6562_s1, 1024, %s32_s15, [#allocation6], %s5292_s7, %s5292_s7, %s5293_s25  }
  0x47   :  { %s5294_s29 = smov [#allocation10]   ;;  %s5295_s5 = smov [#allocation13]  }
  0x48   :  { %s55_s30 = sshll.u32 %s5294_s29, 4  ;;  %s81_s23 = sshll.u32 %s5295_s5, 4  ;;  %s56_s30 = int_to_ptr.vmem [resolvable:$true] %s55_s30  ;;  %s5430_s23 = int_to_ptr.vmem [resolvable:$true] %s81_s23 }
  0x49   :  { %s5164_s2 = scalar_lea.hbm %s6564_s3, 2048 }
  0x4a   :  { %p5165_p4 = scmp.ne.s32.totalorder %s6564_s3, %s5164_s2  ;;  %p5168_p5 = scmp.lt.u32.totalorder %s5164_s2, %s6564_s3 }
  0x4c   :  { %p5170_p6 = pnand %p5168_p5, %p5165_p4 }
  0x4e   :  { %5173 = shalt.err (!%p5170_p6)
}
  0x4f   :  { %s5174_s1 = scalar_lea.vmem %s56_s30, 2048  ;;  %p5179_p8 = scmp.lt.s32.totalorder %s56_s30, %s56_s30 }
  0x50   :  { %p5175_p7 = scmp.ne.s32.totalorder %s56_s30, %s5174_s1  ;;  %p5180_p9 = scmp.lt.s32.totalorder %s5174_s1, %s5174_s1 }
  0x52   :  { %p5181_p10 = por %p5180_p9, %p5179_p8 }
  0x54   :  { %p5182_p11 = pnand %p5181_p10, %p5175_p7 }
  0x56   :  { %5185 = shalt.err (!%p5182_p11)
}
  0x57   :  { %61 = dma.hbm_to_vmem [thread:$0]  %s6564_s3, 2048, %s56_s30, [#allocation9], %s5287_s18, %s5287_s18, %s5288_s19  }
  0x58   :  { %s5186_s28 = scalar_lea.hbm %s6567_s6, 2048 }
  0x59   :  { %p5187_p12 = scmp.ne.s32.totalorder %s6567_s6, %s5186_s28  ;;  %p5190_p13 = scmp.lt.u32.totalorder %s5186_s28, %s6567_s6 }
  0x5b   :  { %p5192_p0 = pnand %p5190_p13, %p5187_p12 }
  0x5d   :  { %5195 = shalt.err (!%p5192_p0)
}
  0x5e   :  { %s5196_s2 = scalar_lea.vmem %s5430_s23, 2048  ;;  %p5201_p2 = scmp.lt.s32.totalorder %s5430_s23, %s5430_s23 }
  0x5f   :  { %p5197_p1 = scmp.ne.s32.totalorder %s5430_s23, %s5196_s2  ;;  %p5202_p3 = scmp.lt.s32.totalorder %s5196_s2, %s5196_s2 }
  0x61   :  { %p5203_p4 = por %p5202_p3, %p5201_p2 }
  0x63   :  { %p5204_p5 = pnand %p5203_p4, %p5197_p1 }
  0x65   :  { %5207 = shalt.err (!%p5204_p5)
}
  0x66   :  { %87 = dma.hbm_to_vmem [thread:$0]  %s6567_s6, 2048, %s5430_s23, [#allocation12], %s5287_s18, %s5287_s18, %s5288_s19  }
  0x67   :  { %s5296_s26 = smov [#allocation16]   ;;  %s5297_s20 = smov [#allocation17]  }
  0x68   :  { %s103_s17 = sshll.u32 %s5296_s26, 4  ;;  %s119_s21 = sshll.u32 %s5297_s20, 4  ;;  %s104_s17 = int_to_ptr.vmem [resolvable:$true] %s103_s17  ;;  %s5467_s21 = int_to_ptr.vmem [resolvable:$true] %s119_s21 }
  0x69   :  { %s5208_s22 = scalar_lea.hbm %s6569_s8, 2048 }
  0x6a   :  { %p5209_p6 = scmp.ne.s32.totalorder %s6569_s8, %s5208_s22  ;;  %p5212_p7 = scmp.lt.u32.totalorder %s5208_s22, %s6569_s8 }
  0x6c   :  { %p5214_p8 = pnand %p5212_p7, %p5209_p6 }
  0x6e   :  { %5217 = shalt.err (!%p5214_p8)
}
  0x6f   :  { %s5218_s6 = scalar_lea.vmem %s104_s17, 2048  ;;  %p5223_p10 = scmp.lt.s32.totalorder %s104_s17, %s104_s17 }
  0x70   :  { %p5219_p9 = scmp.ne.s32.totalorder %s104_s17, %s5218_s6  ;;  %p5224_p11 = scmp.lt.s32.totalorder %s5218_s6, %s5218_s6 }
  0x72   :  { %p5225_p12 = por %p5224_p11, %p5223_p10 }
  0x74   :  { %p5226_p13 = pnand %p5225_p12, %p5219_p9 }
  0x76   :  { %5229 = shalt.err (!%p5226_p13)
}
  0x77   :  { %109 = dma.hbm_to_vmem [thread:$0]  %s6569_s8, 2048, %s104_s17, [#allocation15], %s5287_s18, %s5287_s18, %s5288_s19  }
  0x78   :  { %s5230_s2 = scalar_lea.hbm %s6572_s11, 1024 }
  0x79   :  { %p5231_p0 = scmp.ne.s32.totalorder %s6572_s11, %s5230_s2  ;;  %p5234_p1 = scmp.lt.u32.totalorder %s5230_s2, %s6572_s11 }
  0x7b   :  { %p5236_p2 = pnand %p5234_p1, %p5231_p0 }
  0x7d   :  { %5239 = shalt.err (!%p5236_p2)
}
  0x7e   :  { %s5240_s1 = scalar_lea.vmem %s5467_s21, 1024  ;;  %p5245_p4 = scmp.lt.s32.totalorder %s5467_s21, %s5467_s21 }
  0x7f   :  { %p5241_p3 = scmp.ne.s32.totalorder %s5467_s21, %s5240_s1  ;;  %p5246_p5 = scmp.lt.s32.totalorder %s5240_s1, %s5240_s1 }
  0x81   :  { %p5247_p6 = por %p5246_p5, %p5245_p4 }
  0x83   :  { %p5248_p7 = pnand %p5247_p6, %p5241_p3 }
  0x85   :  { %5251 = shalt.err (!%p5248_p7)
}
  0x86   :  { %125 = dma.hbm_to_vmem [thread:$0]  %s6572_s11, 1024, %s5467_s21, [#allocation18], %s5292_s7, %s5292_s7, %s5293_s25  }
  0x87   :  { %5274 = dma.done.wait [#allocation6], 1024  }
  0x88   :  { %5275 = vsyncadd [#allocation6], 4294966272 }
  0x89   :  { %5276 = dma.done.wait [#allocation9], 3072  }
  0x8a   :  { %5277 = vsyncadd [#allocation9], 4294964224 }
  0x8b   :  { %5278 = dma.done.wait [#allocation12], 4096  }
  0x8c   :  { %5279 = vsyncadd [#allocation12], 4294963200 }
  0x8d   :  { %5280 = dma.done.wait [#allocation15], 2080  }
  0x8e   :  { %5281 = vsyncadd [#allocation15], 4294965216 }
  0x8f   :  { %5282 = dma.done.wait [#allocation18], 1024  }
  0x90   :  { %5283 = vsyncadd [#allocation18], 4294966272  ;;  %v5298_v0 = vmov 0.0   ;;  %v194_v1 = vld [vmem:[#allocation8 + $0x8] sm:$0xff]  ;;  %v196_v2 = vld [vmem:[#allocation8 + $0x18] sm:$0xff]  ;;  %vm213_vm0 = vcmask 261120   ;;  %v152_v42 = vlaneseq }
  0x91   :  { %326 = vmatprep.mubr.f32.mxu1 %v5298_v0  ;;  %302 = vmatprep.mubr.f32.mxu0 %v5298_v0  ;;  %v193_v3 = vld [vmem:[#allocation8] sm:$0xff]  ;;  %v4279_v4 = vpack.c.bf16 %v196_v2, %v194_v1  ;;  %v195_v5 = vld [vmem:[#allocation8 + $0x10] sm:$0xff]  ;;  %v198_v6 = vld [vmem:[#allocation8 + $0x28] sm:$0xff]  ;;  %s5300_s5 = smov 32   ;;  %s5301_s14 = smov 96   ;;  %vm391_vm8 = vcmask 523264  }
  0x92   :  { %v200_v7 = vld [vmem:[#allocation8 + $0x38] sm:$0xff]  ;;  %v4281_v8 = vpack.c.bf16 %v195_v5, %v193_v3  ;;  %v197_v10 = vld [vmem:[#allocation8 + $0x20] sm:$0xff]  ;;  %v199_v11 = vld [vmem:[#allocation8 + $0x30] sm:$0xff]  ;;  %v204_v47 = vshrl.u32 %v152_v42, 7  ;;  %vm520_vm9 = vcmask 523520  }
  0x93   :  { %v4283_v9 = vpack.c.bf16 %v200_v7, %v198_v6  ;;  %4719 = vmatprep.subr.bf16.mxu1 %v4279_v4  ;;  %v368_v12 = vld [vmem:[#allocation10 + $0x8] sm:$0xff]  ;;  %v370_v13 = vld [vmem:[#allocation10 + $0x18] sm:$0xff]  ;;  %4280 = vmatprep.subr.bf16.mxu0 %v4279_v4  ;;  %v4285_v14 = vpack.c.bf16 %v199_v11, %v197_v10  ;;  %v367_v16 = vld [vmem:[#allocation10] sm:$0xff]  ;;  %v153_v4 = vand.u32 127, %v152_v42 }
  0x94   :  { %4721 = vmatpush1.bf16.msra.mxu1 %v4281_v8  ;;  %4282 = vmatpush1.bf16.msra.mxu0 %v4281_v8  ;;  %v5506_v15 = vpack.c.bf16 %v370_v13, %v368_v12  ;;  %v369_v17 = vld [vmem:[#allocation10 + $0x10] sm:$0xff]  ;;  %v372_v18 = vld [vmem:[#allocation10 + $0x28] sm:$0xff]  ;;  %v374_v19 = vld [vmem:[#allocation10 + $0x38] sm:$0xff]  ;;  %v5585_v50 = vsub.s32 0, %v204_v47  ;;  %v5594_v54 = vsub.s32 1, %v204_v47 }
  0x95   :  { %4720 = vmatprep.subr.bf16.mxu1 %v4283_v9  ;;  %4284 = vmatprep.subr.bf16.mxu0 %v4283_v9  ;;  %v189_v20 = vld [vmem:[%s6561_s0 + $0x20] sm:$0xff]  ;;  %v5511_v21 = vpack.c.bf16 %v369_v17, %v367_v16  ;;  %v5514_v22 = vpack.c.bf16 %v374_v19, %v372_v18  ;;  %v373_v24 = vld [vmem:[#allocation10 + $0x30] sm:$0xff]  ;;  %v376_v26 = vld [vmem:[#allocation10 + $0x48] sm:$0xff]  ;;  %v154_v7 = vadd.s32 128, %v153_v4  ;;  %vm179_vm1 = vcmp.ge.s32.totalorder %v153_v4, 64 }
  0x96   :  { %v371_v23 = vld [vmem:[#allocation10 + $0x20] sm:$0xff]  ;;  %v378_v27 = vld [vmem:[#allocation10 + $0x58] sm:$0xff]  ;;  %v190_v28 = vld [vmem:[%s6561_s0 + $0x28] sm:$0xff]  ;;  %vm181_vm2 = vcmp.lt.s32.totalorder %v153_v4, 96 }
  0x97   :  { %v185_v25 = vld [vmem:[%s6561_s0] sm:$0xff]  ;;  %v5527_v29 = vpack.c.bf16 %v373_v24, %v371_v23  ;;  %v5530_v30 = vpack.c.bf16 %v378_v27, %v376_v26  ;;  %v377_v32 = vld [vmem:[#allocation10 + $0x50] sm:$0xff]  ;;  %v380_v33 = vld [vmem:[#allocation10 + $0x68] sm:$0xff]  ;;  %v166_v10 = vand.u32 127, %v154_v7 }
  0x98   :  { %4722 = vmatpush1.bf16.msra.mxu1 %v4285_v14  ;;  %4286 = vmatpush1.bf16.msra.mxu0 %v4285_v14  ;;  %v375_v31 = vld [vmem:[#allocation10 + $0x40] sm:$0xff]  ;;  %v382_v34 = vld [vmem:[#allocation10 + $0x78] sm:$0xff]  ;;  %v191_v35 = vld [vmem:[%s6561_s0 + $0x30] sm:$0xff] }
  0x99   :  { %4288 = vmatprep.subr.bf16.mxu1 %v5506_v15  ;;  %4320 = vmatprep.subr.bf16.mxu0 %v5506_v15  ;;  %v5541_v36 = vpack.c.bf16 %v377_v32, %v375_v31  ;;  %v5544_v37 = vpack.c.bf16 %v382_v34, %v380_v33  ;;  %v379_v38 = vld [vmem:[#allocation10 + $0x60] sm:$0xff]  ;;  %v381_v39 = vld [vmem:[#allocation10 + $0x70] sm:$0xff]  ;;  %v192_v40 = vld [vmem:[%s6561_s0 + $0x38] sm:$0xff]  ;;  %vm180_vm3 = vcmp.ge.s32.totalorder %v166_v10, 64  ;;  %vm182_vm4 = vcmp.lt.s32.totalorder %v166_v10, 96 }
  0x9a   :  { %v5554_v41 = vpack.c.bf16 %v381_v39, %v379_v38  ;;  %v201_v51 = vld [vmem:[%s6565_s4] sm:$0x3]  ;;  %vm5606_vm5 = vmand %vm179_vm1, %vm181_vm2  ;;  %s5299_s4 = smov 64   ;;  %v3957_v14 = vld [vmem:[#allocation17 + $0x20] sm:$0xff] }
  0x9b   :  { %4137 = vmatmul.mubr.msk.f32.vlgmr.msra.gmra.mrb[0].mxu1 %vm213_vm0, %v189_v20  ;;  %4133 = vmatmul.mubr.msk.f32.vlgmr.msra.gmra.mrb[0].mxu0 %vm213_vm0, %v185_v25  ;;  %v5597_v55 = vrot.slane %v201_v51, %v5585_v50  ;;  %v5603_v59 = vrot.slane %v201_v51, %v5594_v54  ;;  %vm5610_vm6 = vmand %vm180_vm3, %vm182_vm4  ;;  %v186_v20 = vld [vmem:[%s6561_s0 + $0x8] sm:$0xff]  ;;  %v513_v31 = vld [vmem:[#allocation5] sm:$0xff] }
  0x9c   :  { %4290 = vmatpush1.bf16.msra.mxu1 %v5511_v21  ;;  %332 = vmatprep.mubr.f32.mxu1 %v5298_v0  ;;  %vm514_vm7 = vcmp.gt.f32.partialorder %v513_v31, 0.0 }
  0x9d   :  { %4292 = vmatprep.subr.bf16.mxu1 %v5514_v22  ;;  %308 = vmatprep.mubr.f32.mxu0 %v5298_v0 }
  0x9e   :  { %4322 = vmatpush1.bf16.msra.mxu0 %v5511_v21 }
  0x9f   :  { %4138 = vmatmul.mubr.msk.f32.gmra.mrb[2].mxu1 %vm213_vm0, %v190_v28  ;;  %4324 = vmatprep.subr.bf16.mxu0 %v5514_v22 }
  0xa0   :  { %4294 = vmatpush1.bf16.msra.mxu1 %v5527_v29  ;;  %338 = vmatprep.mubr.f32.mxu1 %v5298_v0 }
  0xa1   :  { %4296 = vmatprep.subr.bf16.mxu1 %v5530_v30  ;;  %4134 = vmatmul.mubr.msk.f32.gmra.mrb[2].mxu0 %vm213_vm0, %v186_v20 }
  0xa2   :  { %4326 = vmatpush1.bf16.msra.mxu0 %v5527_v29  ;;  %314 = vmatprep.mubr.f32.mxu0 %v5298_v0 }
  0xa3   :  { %4139 = vmatmul.mubr.msk.f32.gmra.mrb[4].mxu1 %vm213_vm0, %v191_v35  ;;  %4328 = vmatprep.subr.bf16.mxu0 %v5530_v30 }
  0xa4   :  { %4298 = vmatpush1.bf16.msra.mxu1 %v5541_v36  ;;  %344 = vmatprep.mubr.f32.mxu1 %v5298_v0 }
  0xa5   :  { %4300 = vmatprep.subr.bf16.mxu1 %v5544_v37 }
  0xa6   :  { %4330 = vmatpush1.bf16.msra.mxu0 %v5541_v36 }
  0xa7   :  { %4140 = vmatmul.mubr.msk.f32.gmra.mrb[6].mxu1 %vm213_vm0, %v192_v40  ;;  %4332 = vmatprep.subr.bf16.mxu0 %v5544_v37 }
  0xa8   :  { %4302 = vmatpush1.bf16.msra.mxu1 %v5554_v41  ;;  %459 = vmatprep.mubr.f32.mxu1 %v5298_v0 }
  0xa9   :  { %4304 = vmatprep.subr.bf16.mxu1 %v5506_v15 }
  0xaa   :  { %4334 = vmatpush1.bf16.msra.mxu0 %v5554_v41 }
  0xab   :  { %460 = vmatmul.mubr.f32.vlgmr.msra.gmra.mrb[8].mxu1 %v5298_v0  ;;  %4352 = vmatprep.subr.bf16.mxu0 %v5506_v15 }
  0xac   :  { %4306 = vmatpush1.bf16.msra.mxu1 %v5511_v21  ;;  %597 = vmatprep.mubr.f32.mxu1 %v5298_v0 }
  0xad   :  { %4308 = vmatprep.subr.bf16.mxu1 %v5514_v22 }
  0xb0   :  { %4310 = vmatpush1.bf16.msra.mxu1 %v5527_v29 }
  0xb1   :  { %4312 = vmatprep.subr.bf16.mxu1 %v5530_v30 }
  0xb4   :  { %4314 = vmatpush1.bf16.msra.mxu1 %v5541_v36 }
  0xb5   :  { %4316 = vmatprep.subr.bf16.mxu1 %v5544_v37 }
  0xb8   :  { %4318 = vmatpush1.bf16.msra.mxu1 %v5554_v41 }
  0xb9   :  { %4336 = vmatprep.subr.bf16.mxu1 %v5506_v15 }
 0x16e   :  { %v5575_v43 = vpop.f32.mrb[0].mxu1  ;;  %v304_v44 = vpop.f32.mrb[0].mxu0 }
 0x16f   :  { %v5577_v45 = vpop.f32.mrb[1].mxu1  ;;  %v5579_v46 = vpop.f32.mrb[1].mxu0  ;;  %v305_v58 = vadd.f32 %v304_v44, %v5597_v55 }
 0x172   :  { %v5581_v48 = vpop.f32.mrb[2].mxu1 }
 0x173   :  { %v5583_v49 = vpop.f32.mrb[3].mxu1 }
 0x176   :  { %v5590_v52 = vpop.f32.mrb[4].mxu1 }
 0x177   :  { %v5592_v53 = vpop.f32.mrb[5].mxu1 }
 0x17a   :  { %v5599_v56 = vpop.f32.mrb[6].mxu1 }
 0x17b   :  { %v348_v57 = vpop.f32.mrb[7].mxu1 }
 0x17c   :  { %v349_v60 = vadd.f32 %v348_v57, %v5603_v59 }
 0x17e   :  { %v461_v61 = vpop.f32.mrb[8].mxu1 }
 0x17f   :  { %v466_v62 = vadd.f32 %v461_v61, %v305_v58  ;;  %v463_v63 = vpop.f32.mrb[9].mxu1  ;;  %v310_v58 = vpop.f32.mrb[2].mxu0 }
 0x180   :  { %v467_v1 = vadd.f32 %v463_v63, %v349_v60  ;;  %v5650_v60 = vpop.f32.mrb[3].mxu0  ;;  %v311_v61 = vadd.f32 %v310_v58, %v5597_v55 }
 0x181   :  { %v4141_v2 = vmul.f32 -1.442695, %v466_v62 }
 0x182   :  { %v4142_v3 = vmul.f32 -1.442695, %v467_v1 }
 0x183   :  { %4740 = vpow2.f32 %v4141_v2 }
 0x184   :  { %4742 = vpow2.f32 %v4142_v3 }
 0x185   :  { %4744 = vtanh.f32 %v466_v62  ;;  %v343_v62 = vadd.f32 %v5592_v53, %v5603_v59 }
 0x186   :  { %4746 = vtanh.f32 %v467_v1 }
 0x18d   :  { %v4741_v5 = vpop.eup %4740 }
 0x18e   :  { %v4743_v6 = vpop.eup %4742  ;;  %v476_v8 = vadd.f32 1.0, %v4741_v5 }
 0x18f   :  { %v477_v9 = vadd.f32 1.0, %v4743_v6  ;;  %v4745_v11 = vpop.eup %4744 }
 0x190   :  { %4748 = vrcp.f32 %v476_v8  ;;  %v4747_v13 = vpop.eup %4746 }
 0x191   :  { %4750 = vrcp.f32 %v477_v9 }
 0x19a   :  { %v4749_v16 = vpop.eup %4748 }
 0x19b   :  { %v4751_v17 = vpop.eup %4750  ;;  %v482_v18 = vsel %vm5606_vm5, %v4745_v11, %v4749_v16 }
 0x19c   :  { %494 = vrot.lane.b32.xlu1 %v482_v18, %s5299_s4  ;;  %v483_v19 = vsel %vm5610_vm6, %v4747_v13, %v4751_v17 }
 0x19d   :  { %485 = vrot.lane.b32.xlu0 %v483_v19, %s5300_s5 }
 0x1a0   :  { %497 = vrot.lane.b32.xlu1 %v483_v19, %s5301_s14 }
 0x1a1   :  { %490 = vrot.lane.b32.xlu0 %v482_v18, %s5301_s14 }
 0x1a4   :  { %504 = vrot.lane.b32.xlu1 %v483_v19, %s5299_s4 }
 0x1a5   :  { %501 = vrot.lane.b32.xlu0 %v482_v18, %s5300_s5 }
 0x20e   :  { %v495_v23 = vpop.permute.xlu1 %494 }
 0x20f   :  { %v486_v24 = vpop.permute.xlu0 %485 }
 0x210   :  { %v488_v26 = vsel %vm213_vm0, %v482_v18, %v486_v24  ;;  %v187_v18 = vld [vmem:[%s6561_s0 + $0x10] sm:$0xff] }
 0x211   :  { %4135 = vmatmul.mubr.msk.f32.gmra.mrb[4].mxu0 %vm213_vm0, %v187_v18 }
 0x212   :  { %v498_v25 = vpop.permute.xlu1 %497  ;;  %320 = vmatprep.mubr.f32.mxu0 %v5298_v0 }
 0x213   :  { %v500_v27 = vsel %vm213_vm0, %v495_v23, %v498_v25  ;;  %v491_v28 = vpop.permute.xlu0 %490 }
 0x214   :  { %v509_v32 = vmul.f32 %v500_v27, %v488_v26  ;;  %v493_v33 = vsel %vm213_vm0, %v491_v28, %v483_v19  ;;  %v188_v19 = vld [vmem:[%s6561_s0 + $0x18] sm:$0xff]  ;;  %v652_v27 = vld [vmem:[#allocation5 + $0x8] sm:$0xff] }
 0x215   :  { %v508_v34 = vmul.f32 0.0, %v493_v33  ;;  %4136 = vmatmul.mubr.msk.f32.gmra.mrb[6].mxu0 %vm213_vm0, %v188_v19  ;;  %vm653_vm10 = vcmp.gt.f32.partialorder %v652_v27, 0.0 }
 0x216   :  { %v505_v39 = vpop.permute.xlu1 %504  ;;  %736 = vmatprep.mubr.f32.mxu0 %v5298_v0 }
 0x217   :  { %v510_v35 = vadd.f32 %v509_v32, %v508_v34  ;;  %v502_v40 = vpop.permute.xlu0 %501 }
 0x218   :  { %v507_v44 = vsel %vm213_vm0, %v502_v40, %v505_v39 }
 0x219   :  { %4752 = vtanh.f32 %v510_v35  ;;  %v5632_v38 = vsel %vm514_vm7, %v510_v35, 0.0 }
 0x223   :  { %v4753_v42 = vpop.eup %4752 }
 0x224   :  { %v512_v47 = vmul.f32 %v4753_v42, %v507_v44 }
 0x226   :  { %v5635_v51 = vsel %vm514_vm7, %v512_v47, 0.0  ;;  %v517_v57 = vmul.f32 %v513_v31, %v512_v47 }
 0x227   :  { %4143 = vmatmul.mubr.msk.f32.vlgmr.msra.gmra.mrb[10].mxu1 %vm391_vm8, %v5635_v51 }
 0x228   :  { %518 = vst.msk [vmem:[#allocation3] sm:$0xff] %vm213_vm0, %v517_v57  ;;  %4338 = vmatpush1.bf16.msra.mxu1 %v5511_v21  ;;  %875 = vmatprep.mubr.f32.mxu1 %v5298_v0 }
 0x229   :  { %521 = vst.msk [vmem:[#allocation3 + $0x38] sm:$0xff] %vm520_vm9, %v517_v57  ;;  %4340 = vmatprep.subr.bf16.mxu1 %v5514_v22 }
 0x22c   :  { %4342 = vmatpush1.bf16.msra.mxu1 %v5527_v29 }
 0x22d   :  { %4344 = vmatprep.subr.bf16.mxu1 %v5530_v30 }
 0x230   :  { %4346 = vmatpush1.bf16.msra.mxu1 %v5541_v36 }
 0x231   :  { %4348 = vmatprep.subr.bf16.mxu1 %v5544_v37 }
 0x234   :  { %4350 = vmatpush1.bf16.msra.mxu1 %v5554_v41 }
 0x235   :  { %4368 = vmatprep.subr.bf16.mxu1 %v5506_v15 }
 0x2fa   :  { %v599_v63 = vpop.f32.mrb[10].mxu1 }
 0x2fb   :  { %v604_v1 = vadd.f32 %v599_v63, %v311_v61  ;;  %v601_v2 = vpop.f32.mrb[11].mxu1 }
 0x2fc   :  { %v605_v3 = vadd.f32 %v601_v2, %v343_v62 }
 0x2fd   :  { %v4144_v4 = vmul.f32 -1.442695, %v604_v1 }
 0x2fe   :  { %v4145_v5 = vmul.f32 -1.442695, %v605_v3 }
 0x2ff   :  { %4754 = vpow2.f32 %v4144_v4 }
 0x300   :  { %4756 = vpow2.f32 %v4145_v5 }
 0x301   :  { %4758 = vtanh.f32 %v604_v1  ;;  %v337_v1 = vadd.f32 %v5583_v49, %v5603_v59 }
 0x302   :  { %4760 = vtanh.f32 %v605_v3 }
 0x309   :  { %v4755_v6 = vpop.eup %4754 }
 0x30a   :  { %v4757_v7 = vpop.eup %4756  ;;  %v614_v8 = vadd.f32 1.0, %v4755_v6 }
 0x30b   :  { %v615_v9 = vadd.f32 1.0, %v4757_v7  ;;  %v4759_v10 = vpop.eup %4758 }
 0x30c   :  { %4762 = vrcp.f32 %v614_v8  ;;  %v4761_v11 = vpop.eup %4760 }
 0x30d   :  { %4764 = vrcp.f32 %v615_v9 }
 0x316   :  { %v4763_v13 = vpop.eup %4762 }
 0x317   :  { %v4765_v53 = vpop.eup %4764  ;;  %v620_v16 = vsel %vm5606_vm5, %v4759_v10, %v4763_v13 }
 0x318   :  { %628 = vrot.lane.b32.xlu1 %v620_v16, %s5301_s14  ;;  %v621_v17 = vsel %vm5610_vm6, %v4761_v11, %v4765_v53 }
 0x319   :  { %623 = vrot.lane.b32.xlu0 %v621_v17, %s5300_s5 }
 0x31c   :  { %635 = vrot.lane.b32.xlu1 %v621_v17, %s5301_s14 }
 0x31d   :  { %632 = vrot.lane.b32.xlu0 %v620_v16, %s5299_s4 }
 0x320   :  { %642 = vrot.lane.b32.xlu1 %v621_v17, %s5299_s4 }
 0x321   :  { %639 = vrot.lane.b32.xlu0 %v620_v16, %s5300_s5 }
 0x38a   :  { %v629_v20 = vpop.permute.xlu1 %628 }
 0x38b   :  { %v624_v23 = vpop.permute.xlu0 %623  ;;  %v631_v24 = vsel %vm213_vm0, %v629_v20, %v621_v17 }
 0x38c   :  { %v626_v28 = vsel %vm213_vm0, %v620_v16, %v624_v23  ;;  %v646_v32 = vmul.f32 %v631_v24, %v5632_v38 }
 0x38e   :  { %v636_v25 = vpop.permute.xlu1 %635 }
 0x38f   :  { %v633_v26 = vpop.permute.xlu0 %632 }
 0x390   :  { %v638_v31 = vsel %vm213_vm0, %v633_v26, %v636_v25  ;;  %v791_v26 = vld [vmem:[#allocation5 + $0x10] sm:$0xff] }
 0x391   :  { %v647_v33 = vmul.f32 %v638_v31, %v626_v28  ;;  %vm792_vm11 = vcmp.gt.f32.partialorder %v791_v26, 0.0 }
 0x392   :  { %v643_v39 = vpop.permute.xlu1 %642 }
 0x393   :  { %v648_v34 = vadd.f32 %v647_v33, %v646_v32  ;;  %v640_v40 = vpop.permute.xlu0 %639 }
 0x394   :  { %v645_v44 = vsel %vm213_vm0, %v640_v40, %v643_v39 }
 0x395   :  { %4766 = vtanh.f32 %v648_v34  ;;  %v5680_v35 = vsel %vm653_vm10, %v648_v34, %v5632_v38  ;;  %v316_v38 = vpop.f32.mrb[4].mxu0 }
 0x396   :  { %v317_v63 = vadd.f32 %v316_v38, %v5597_v55 }
 0x39f   :  { %v4767_v42 = vpop.eup %4766 }
 0x3a0   :  { %v650_v47 = vmul.f32 %v4767_v42, %v645_v44 }
 0x3a2   :  { %v5684_v57 = vsel %vm653_vm10, %v650_v47, %v5635_v51  ;;  %v656_v58 = vmul.f32 %v652_v27, %v650_v47  ;;  %v5699_v51 = vpop.f32.mrb[5].mxu0 }
 0x3a3   :  { %4146 = vmatmul.mubr.msk.f32.vlgmr.msra.gmra.mrb[8].mxu0 %vm391_vm8, %v5684_v57  ;;  %v5701_v61 = vpop.f32.mrb[6].mxu0 }
 0x3a4   :  { %658 = vst.msk [vmem:[#allocation3 + $0x8] sm:$0xff] %vm213_vm0, %v656_v58  ;;  %4354 = vmatpush1.bf16.msra.mxu0 %v5511_v21  ;;  %1008 = vmatprep.mubr.f32.mxu0 %v5298_v0  ;;  %v5703_v62 = vpop.f32.mrb[7].mxu0 }
 0x3a5   :  { %660 = vst.msk [vmem:[#allocation3 + $0x30] sm:$0xff] %vm520_vm9, %v656_v58  ;;  %4356 = vmatprep.subr.bf16.mxu0 %v5514_v22 }
 0x3a8   :  { %4358 = vmatpush1.bf16.msra.mxu0 %v5527_v29 }
 0x3a9   :  { %4360 = vmatprep.subr.bf16.mxu0 %v5530_v30 }
 0x3ac   :  { %4362 = vmatpush1.bf16.msra.mxu0 %v5541_v36 }
 0x3ad   :  { %4364 = vmatprep.subr.bf16.mxu0 %v5544_v37 }
 0x3b0   :  { %4366 = vmatpush1.bf16.msra.mxu0 %v5554_v41 }
 0x3b1   :  { %4384 = vmatprep.subr.bf16.mxu0 %v5506_v15 }
 0x476   :  { %v738_v2 = vpop.f32.mrb[8].mxu0 }
 0x477   :  { %v743_v3 = vadd.f32 %v738_v2, %v317_v63  ;;  %v740_v4 = vpop.f32.mrb[9].mxu0 }
 0x478   :  { %v744_v5 = vadd.f32 %v740_v4, %v337_v1 }
 0x479   :  { %v4147_v6 = vmul.f32 -1.442695, %v743_v3 }
 0x47a   :  { %v4148_v7 = vmul.f32 -1.442695, %v744_v5 }
 0x47b   :  { %4768 = vpow2.f32 %v4147_v6 }
 0x47c   :  { %4770 = vpow2.f32 %v4148_v7 }
 0x47d   :  { %4772 = vtanh.f32 %v743_v3 }
 0x47e   :  { %4774 = vtanh.f32 %v744_v5 }
 0x485   :  { %v4769_v8 = vpop.eup %4768 }
 0x486   :  { %v4771_v9 = vpop.eup %4770  ;;  %v753_v10 = vadd.f32 1.0, %v4769_v8 }
 0x487   :  { %v754_v11 = vadd.f32 1.0, %v4771_v9  ;;  %v4773_v13 = vpop.eup %4772 }
 0x488   :  { %4776 = vrcp.f32 %v753_v10  ;;  %v4775_v53 = vpop.eup %4774 }
 0x489   :  { %4778 = vrcp.f32 %v754_v11 }
 0x492   :  { %v4777_v16 = vpop.eup %4776 }
 0x493   :  { %v4779_v49 = vpop.eup %4778  ;;  %v759_v17 = vsel %vm5606_vm5, %v4773_v13, %v4777_v16 }
 0x494   :  { %767 = vrot.lane.b32.xlu1 %v759_v17, %s5301_s14  ;;  %v760_v18 = vsel %vm5610_vm6, %v4775_v53, %v4779_v49 }
 0x495   :  { %762 = vrot.lane.b32.xlu0 %v760_v18, %s5300_s5 }
 0x498   :  { %774 = vrot.lane.b32.xlu1 %v760_v18, %s5301_s14 }
 0x499   :  { %771 = vrot.lane.b32.xlu0 %v759_v17, %s5299_s4 }
 0x49c   :  { %781 = vrot.lane.b32.xlu1 %v760_v18, %s5299_s4 }
 0x49d   :  { %778 = vrot.lane.b32.xlu0 %v759_v17, %s5300_s5 }
 0x506   :  { %v768_v19 = vpop.permute.xlu1 %767 }
 0x507   :  { %v763_v20 = vpop.permute.xlu0 %762  ;;  %v770_v23 = vsel %vm213_vm0, %v768_v19, %v760_v18  ;;  %v930_v19 = vld [vmem:[#allocation5 + $0x18] sm:$0xff] }
 0x508   :  { %v765_v27 = vsel %vm213_vm0, %v759_v17, %v763_v20  ;;  %v785_v31 = vmul.f32 %v770_v23, %v5680_v35  ;;  %vm931_vm12 = vcmp.gt.f32.partialorder %v930_v19, 0.0 }
 0x50a   :  { %v775_v24 = vpop.permute.xlu1 %774 }
 0x50b   :  { %v772_v25 = vpop.permute.xlu0 %771 }
 0x50c   :  { %v777_v28 = vsel %vm213_vm0, %v772_v25, %v775_v24 }
 0x50d   :  { %v786_v32 = vmul.f32 %v777_v28, %v765_v27 }
 0x50e   :  { %v782_v39 = vpop.permute.xlu1 %781 }
 0x50f   :  { %v787_v33 = vadd.f32 %v786_v32, %v785_v31  ;;  %v779_v40 = vpop.permute.xlu0 %778 }
 0x510   :  { %v784_v44 = vsel %vm213_vm0, %v779_v40, %v782_v39 }
 0x511   :  { %4780 = vtanh.f32 %v787_v33  ;;  %v5723_v34 = vsel %vm792_vm11, %v787_v33, %v5680_v35  ;;  %v323_v35 = vadd.f32 %v5701_v61, %v5597_v55 }
 0x51b   :  { %v4781_v42 = vpop.eup %4780 }
 0x51c   :  { %v789_v47 = vmul.f32 %v4781_v42, %v784_v44  ;;  %v325_v44 = vadd.f32 %v5703_v62, %v5603_v59 }
 0x51e   :  { %v795_v58 = vmul.f32 %v791_v26, %v789_v47  ;;  %v5727_v38 = vsel %vm792_vm11, %v789_v47, %v5684_v57  ;;  %v331_v57 = vadd.f32 %v5577_v45, %v5603_v59 }
 0x51f   :  { %4149 = vmatmul.mubr.msk.f32.vlgmr.msra.gmra.mrb[12].mxu1 %vm391_vm8, %v5727_v38 }
 0x520   :  { %797 = vst.msk [vmem:[#allocation3 + $0x10] sm:$0xff] %vm213_vm0, %v795_v58  ;;  %4370 = vmatpush1.bf16.msra.mxu1 %v5511_v21  ;;  %1139 = vmatprep.mubr.f32.mxu1 %v5298_v0 }
 0x521   :  { %799 = vst.msk [vmem:[#allocation3 + $0x28] sm:$0xff] %vm520_vm9, %v795_v58  ;;  %4372 = vmatprep.subr.bf16.mxu1 %v5514_v22 }
 0x524   :  { %4374 = vmatpush1.bf16.msra.mxu1 %v5527_v29 }
 0x525   :  { %4376 = vmatprep.subr.bf16.mxu1 %v5530_v30 }
 0x528   :  { %4378 = vmatpush1.bf16.msra.mxu1 %v5541_v36 }
 0x529   :  { %4380 = vmatprep.subr.bf16.mxu1 %v5544_v37 }
 0x52c   :  { %4382 = vmatpush1.bf16.msra.mxu1 %v5554_v41 }
 0x52d   :  { %4400 = vmatprep.subr.bf16.mxu1 %v5506_v15 }
 0x5f2   :  { %v877_v63 = vpop.f32.mrb[12].mxu1 }
 0x5f3   :  { %v882_v1 = vadd.f32 %v877_v63, %v323_v35  ;;  %v879_v2 = vpop.f32.mrb[13].mxu1 }
 0x5f4   :  { %v883_v3 = vadd.f32 %v879_v2, %v331_v57 }
 0x5f5   :  { %v4150_v4 = vmul.f32 -1.442695, %v882_v1 }
 0x5f6   :  { %v4151_v5 = vmul.f32 -1.442695, %v883_v3 }
 0x5f7   :  { %4782 = vpow2.f32 %v4150_v4 }
 0x5f8   :  { %4784 = vpow2.f32 %v4151_v5 }
 0x5f9   :  { %4786 = vtanh.f32 %v882_v1 }
 0x5fa   :  { %4788 = vtanh.f32 %v883_v3 }
 0x601   :  { %v4783_v6 = vpop.eup %4782 }
 0x602   :  { %v4785_v7 = vpop.eup %4784  ;;  %v892_v8 = vadd.f32 1.0, %v4783_v6 }
 0x603   :  { %v893_v15 = vadd.f32 1.0, %v4785_v7  ;;  %v4787_v61 = vpop.eup %4786 }
 0x604   :  { %4790 = vrcp.f32 %v892_v8  ;;  %v4789_v9 = vpop.eup %4788 }
 0x605   :  { %4792 = vrcp.f32 %v893_v15 }
 0x60e   :  { %v4791_v10 = vpop.eup %4790 }
 0x60f   :  { %v4793_v45 = vpop.eup %4792  ;;  %v898_v11 = vsel %vm5606_vm5, %v4787_v61, %v4791_v10 }
 0x610   :  { %906 = vrot.lane.b32.xlu1 %v898_v11, %s5301_s14  ;;  %v899_v13 = vsel %vm5610_vm6, %v4789_v9, %v4793_v45 }
 0x611   :  { %901 = vrot.lane.b32.xlu0 %v899_v13, %s5300_s5 }
 0x614   :  { %913 = vrot.lane.b32.xlu1 %v899_v13, %s5301_s14 }
 0x615   :  { %910 = vrot.lane.b32.xlu0 %v898_v11, %s5299_s4 }
 0x618   :  { %920 = vrot.lane.b32.xlu1 %v899_v13, %s5299_s4 }
 0x619   :  { %917 = vrot.lane.b32.xlu0 %v898_v11, %s5300_s5 }
 0x682   :  { %v907_v53 = vpop.permute.xlu1 %906 }
 0x683   :  { %v902_v16 = vpop.permute.xlu0 %901  ;;  %v909_v49 = vsel %vm213_vm0, %v907_v53, %v899_v13 }
 0x684   :  { %v904_v20 = vsel %vm213_vm0, %v898_v11, %v902_v16  ;;  %v924_v24 = vmul.f32 %v909_v49, %v5723_v34  ;;  %v1063_v11 = vld [vmem:[#allocation5 + $0x20] sm:$0xff] }
 0x685   :  { %vm1064_vm13 = vcmp.gt.f32.partialorder %v1063_v11, 0.0 }
 0x686   :  { %v914_v17 = vpop.permute.xlu1 %913 }
 0x687   :  { %v911_v18 = vpop.permute.xlu0 %910 }
 0x688   :  { %v916_v23 = vsel %vm213_vm0, %v911_v18, %v914_v17 }
 0x689   :  { %v925_v25 = vmul.f32 %v916_v23, %v904_v20 }
 0x68a   :  { %v921_v28 = vpop.permute.xlu1 %920 }
 0x68b   :  { %v926_v26 = vadd.f32 %v925_v25, %v924_v24  ;;  %v918_v31 = vpop.permute.xlu0 %917 }
 0x68c   :  { %v923_v33 = vsel %vm213_vm0, %v918_v31, %v921_v28 }
 0x68d   :  { %4794 = vtanh.f32 %v926_v26  ;;  %v5761_v27 = vsel %vm931_vm12, %v926_v26, %v5723_v34  ;;  %v329_v34 = vadd.f32 %v5575_v43, %v5597_v55 }
 0x697   :  { %v4795_v32 = vpop.eup %4794 }
 0x698   :  { %v928_v39 = vmul.f32 %v4795_v32, %v923_v33 }
 0x69a   :  { %v934_v40 = vmul.f32 %v930_v19, %v928_v39  ;;  %v5765_v42 = vsel %vm931_vm12, %v928_v39, %v5727_v38 }
 0x69b   :  { %4152 = vmatmul.mubr.msk.f32.vlgmr.msra.gmra.mrb[10].mxu0 %vm391_vm8, %v5765_v42 }
 0x69c   :  { %936 = vst.msk [vmem:[#allocation3 + $0x18] sm:$0xff] %vm213_vm0, %v934_v40  ;;  %4386 = vmatpush1.bf16.msra.mxu0 %v5511_v21  ;;  %1270 = vmatprep.mubr.f32.mxu0 %v5298_v0 }
 0x69d   :  { %938 = vst.msk [vmem:[#allocation3 + $0x20] sm:$0xff] %vm520_vm9, %v934_v40  ;;  %4388 = vmatprep.subr.bf16.mxu0 %v5514_v22 }
 0x6a0   :  { %4390 = vmatpush1.bf16.msra.mxu0 %v5527_v29 }
 0x6a1   :  { %4392 = vmatprep.subr.bf16.mxu0 %v5530_v30 }
 0x6a4   :  { %4394 = vmatpush1.bf16.msra.mxu0 %v5541_v36 }
 0x6a5   :  { %4396 = vmatprep.subr.bf16.mxu0 %v5544_v37 }
 0x6a8   :  { %4398 = vmatpush1.bf16.msra.mxu0 %v5554_v41 }
 0x76e   :  { %v1010_v47 = vpop.f32.mrb[10].mxu0 }
 0x76f   :  { %v1015_v58 = vadd.f32 %v1010_v47, %v329_v34  ;;  %v1012_v38 = vpop.f32.mrb[11].mxu0 }
 0x770   :  { %v1016_v35 = vadd.f32 %v1012_v38, %v325_v44 }
 0x771   :  { %v4153_v57 = vmul.f32 -1.442695, %v1015_v58 }
 0x772   :  { %v4154_v63 = vmul.f32 -1.442695, %v1016_v35 }
 0x773   :  { %4796 = vpow2.f32 %v4153_v57 }
 0x774   :  { %4798 = vpow2.f32 %v4154_v63  ;;  %v1194_v63 = vld [vmem:[#allocation5 + $0x28] sm:$0xff] }
 0x775   :  { %4800 = vtanh.f32 %v1015_v58  ;;  %vm1195_vm14 = vcmp.gt.f32.partialorder %v1194_v63, 0.0 }
 0x776   :  { %4802 = vtanh.f32 %v1016_v35 }
 0x77d   :  { %v4797_v1 = vpop.eup %4796 }
 0x77e   :  { %v4799_v2 = vpop.eup %4798  ;;  %v1025_v3 = vadd.f32 1.0, %v4797_v1 }
 0x77f   :  { %v1026_v4 = vadd.f32 1.0, %v4799_v2  ;;  %v4801_v43 = vpop.eup %4800 }
 0x780   :  { %4804 = vrcp.f32 %v1025_v3  ;;  %v4803_v5 = vpop.eup %4802 }
 0x781   :  { %4806 = vrcp.f32 %v1026_v4 }
 0x78a   :  { %v4805_v6 = vpop.eup %4804 }
 0x78b   :  { %v4807_v62 = vpop.eup %4806  ;;  %v1031_v7 = vsel %vm5606_vm5, %v4801_v43, %v4805_v6 }
 0x78c   :  { %1039 = vrot.lane.b32.xlu1 %v1031_v7, %s5301_s14  ;;  %v1032_v8 = vsel %vm5610_vm6, %v4803_v5, %v4807_v62 }
 0x78d   :  { %1034 = vrot.lane.b32.xlu0 %v1032_v8, %s5300_s5 }
 0x790   :  { %1046 = vrot.lane.b32.xlu1 %v1032_v8, %s5301_s14 }
 0x791   :  { %1043 = vrot.lane.b32.xlu0 %v1031_v7, %s5299_s4 }
 0x794   :  { %1053 = vrot.lane.b32.xlu1 %v1032_v8, %s5299_s4 }
 0x795   :  { %1050 = vrot.lane.b32.xlu0 %v1031_v7, %s5300_s5 }
 0x7fe   :  { %v1040_v15 = vpop.permute.xlu1 %1039 }
 0x7ff   :  { %v1035_v61 = vpop.permute.xlu0 %1034  ;;  %v1042_v9 = vsel %vm213_vm0, %v1040_v15, %v1032_v8 }
 0x800   :  { %v1037_v13 = vsel %vm213_vm0, %v1031_v7, %v1035_v61  ;;  %v1057_v16 = vmul.f32 %v1042_v9, %v5761_v27 }
 0x802   :  { %v1047_v10 = vpop.permute.xlu1 %1046 }
 0x803   :  { %v1044_v45 = vpop.permute.xlu0 %1043 }
 0x804   :  { %v1049_v53 = vsel %vm213_vm0, %v1044_v45, %v1047_v10  ;;  %v341_v10 = vadd.f32 %v5590_v52, %v5597_v55  ;;  %v313_v45 = vadd.f32 %v5650_v60, %v5603_v59 }
 0x805   :  { %v1058_v49 = vmul.f32 %v1049_v53, %v1037_v13 }
 0x806   :  { %v1054_v19 = vpop.permute.xlu1 %1053 }
 0x807   :  { %v1059_v17 = vadd.f32 %v1058_v49, %v1057_v16  ;;  %v1051_v20 = vpop.permute.xlu0 %1050 }
 0x808   :  { %v1056_v24 = vsel %vm213_vm0, %v1051_v20, %v1054_v19 }
 0x809   :  { %4808 = vtanh.f32 %v1059_v17  ;;  %v5798_v18 = vsel %vm1064_vm13, %v1059_v17, %v5761_v27  ;;  %v335_v27 = vadd.f32 %v5581_v48, %v5597_v55 }
 0x813   :  { %v4809_v23 = vpop.eup %4808 }
 0x814   :  { %v1061_v25 = vmul.f32 %v4809_v23, %v1056_v24 }
 0x816   :  { %v1067_v26 = vmul.f32 %v1063_v11, %v1061_v25  ;;  %v5802_v28 = vsel %vm1064_vm13, %v1061_v25, %v5765_v42 }
 0x817   :  { %4155 = vmatmul.mubr.msk.f32.vlgmr.msra.gmra.mrb[14].mxu1 %vm391_vm8, %v5802_v28 }
 0x818   :  { %1068 = vst.msk [vmem:[#allocation3 + $0x20] sm:$0xff] %vm213_vm0, %v1067_v26  ;;  %4402 = vmatpush1.bf16.msra.mxu1 %v5511_v21  ;;  %1401 = vmatprep.mubr.f32.mxu1 %v5298_v0  ;;  %v319_v21 = vadd.f32 %v5699_v51, %v5603_v59 }
 0x819   :  { %1069 = vst.msk [vmem:[#allocation3 + $0x18] sm:$0xff] %vm520_vm9, %v1067_v26  ;;  %4404 = vmatprep.subr.bf16.mxu1 %v5514_v22 }
 0x81c   :  { %4406 = vmatpush1.bf16.msra.mxu1 %v5527_v29 }
 0x81d   :  { %4408 = vmatprep.subr.bf16.mxu1 %v5530_v30 }
 0x820   :  { %4410 = vmatpush1.bf16.msra.mxu1 %v5541_v36 }
 0x821   :  { %4412 = vmatprep.subr.bf16.mxu1 %v5544_v37 }
 0x824   :  { %4414 = vmatpush1.bf16.msra.mxu1 %v5554_v41 }
 0x8ea   :  { %v1141_v31 = vpop.f32.mrb[14].mxu1 }
 0x8eb   :  { %v1146_v32 = vadd.f32 %v1141_v31, %v335_v27  ;;  %v1143_v33 = vpop.f32.mrb[15].mxu1 }
 0x8ec   :  { %v1147_v22 = vadd.f32 %v1143_v33, %v319_v21 }
 0x8ed   :  { %v4156_v39 = vmul.f32 -1.442695, %v1146_v32 }
 0x8ee   :  { %v4157_v29 = vmul.f32 -1.442695, %v1147_v22 }
 0x8ef   :  { %4810 = vpow2.f32 %v4156_v39 }
 0x8f0   :  { %4812 = vpow2.f32 %v4157_v29 }
 0x8f1   :  { %4814 = vtanh.f32 %v1146_v32 }
 0x8f2   :  { %4816 = vtanh.f32 %v1147_v22  ;;  %v1325_v22 = vld [vmem:[#allocation5 + $0x30] sm:$0xff] }
 0x8f3   :  { %vm1326_vm15 = vcmp.gt.f32.partialorder %v1325_v22, 0.0 }
 0x8f9   :  { %v4811_v30 = vpop.eup %4810 }
 0x8fa   :  { %v4813_v36 = vpop.eup %4812  ;;  %v1156_v37 = vadd.f32 1.0, %v4811_v30 }
 0x8fb   :  { %v1157_v41 = vadd.f32 1.0, %v4813_v36  ;;  %v4815_v48 = vpop.eup %4814 }
 0x8fc   :  { %4818 = vrcp.f32 %v1156_v37  ;;  %v4817_v40 = vpop.eup %4816 }
 0x8fd   :  { %4820 = vrcp.f32 %v1157_v41 }
 0x906   :  { %v4819_v42 = vpop.eup %4818 }
 0x907   :  { %v4821_v51 = vpop.eup %4820  ;;  %v1162_v34 = vsel %vm5606_vm5, %v4815_v48, %v4819_v42 }
 0x908   :  { %1170 = vrot.lane.b32.xlu1 %v1162_v34, %s5301_s14  ;;  %v1163_v44 = vsel %vm5610_vm6, %v4817_v40, %v4821_v51 }
 0x909   :  { %1165 = vrot.lane.b32.xlu0 %v1163_v44, %s5300_s5 }
 0x90c   :  { %1177 = vrot.lane.b32.xlu1 %v1163_v44, %s5301_s14 }
 0x90d   :  { %1174 = vrot.lane.b32.xlu0 %v1162_v34, %s5299_s4 }
 0x910   :  { %1184 = vrot.lane.b32.xlu1 %v1163_v44, %s5299_s4 }
 0x911   :  { %1181 = vrot.lane.b32.xlu0 %v1162_v34, %s5300_s5 }
 0x97a   :  { %v1171_v47 = vpop.permute.xlu1 %1170 }
 0x97b   :  { %v1166_v58 = vpop.permute.xlu0 %1165  ;;  %v1173_v38 = vsel %vm213_vm0, %v1171_v47, %v1163_v44 }
 0x97c   :  { %v1168_v1 = vsel %vm213_vm0, %v1162_v34, %v1166_v58  ;;  %v1188_v3 = vmul.f32 %v1173_v38, %v5798_v18  ;;  %v347_v58 = vadd.f32 %v5599_v56, %v5597_v55  ;;  %v307_v38 = vadd.f32 %v5579_v46, %v5603_v59 }
 0x97e   :  { %v1178_v35 = vpop.permute.xlu1 %1177 }
 0x97f   :  { %v1175_v57 = vpop.permute.xlu0 %1174 }
 0x980   :  { %v1180_v2 = vsel %vm213_vm0, %v1175_v57, %v1178_v35 }
 0x981   :  { %v1189_v4 = vmul.f32 %v1180_v2, %v1168_v1 }
 0x982   :  { %v1185_v6 = vpop.permute.xlu1 %1184 }
 0x983   :  { %v1190_v43 = vadd.f32 %v1189_v4, %v1188_v3  ;;  %v1182_v62 = vpop.permute.xlu0 %1181 }
 0x984   :  { %v1187_v8 = vsel %vm213_vm0, %v1182_v62, %v1185_v6 }
 0x985   :  { %4822 = vtanh.f32 %v1190_v43  ;;  %v1197_v5 = vsel %vm1195_vm14, %v1190_v43, %v5798_v18 }
 0x98f   :  { %v4823_v7 = vpop.eup %4822 }
 0x990   :  { %v1192_v15 = vmul.f32 %v4823_v7, %v1187_v8  ;;  %v1469_v8 = vld [vmem:[#allocation11 + $0x8] sm:$0xff] }
 0x992   :  { %v1198_v61 = vmul.f32 %v1194_v63, %v1192_v15  ;;  %v1196_v9 = vsel %vm1195_vm14, %v1192_v15, %v5802_v28  ;;  %v1471_v15 = vld [vmem:[#allocation11 + $0x18] sm:$0xff] }
 0x993   :  { %4158 = vmatmul.mubr.msk.f32.vlgmr.msra.gmra.mrb[12].mxu0 %vm391_vm8, %v1196_v9 }
 0x994   :  { %1199 = vst.msk [vmem:[#allocation3 + $0x28] sm:$0xff] %vm213_vm0, %v1198_v61  ;;  %1584 = vmatprep.mubr.f32.mxu0 %v5298_v0 }
 0x995   :  { %1200 = vst.msk [vmem:[#allocation3 + $0x10] sm:$0xff] %vm520_vm9, %v1198_v61  ;;  %v4415_v61 = vpack.c.bf16 %v1471_v15, %v1469_v8 }
 0x997   :  { %4416 = vmatprep.subr.bf16.mxu0 %v4415_v61 }
 0xa66   :  { %v1272_v11 = vpop.f32.mrb[12].mxu0 }
 0xa67   :  { %v1277_v13 = vadd.f32 %v1272_v11, %v341_v10  ;;  %v1274_v53 = vpop.f32.mrb[13].mxu0  ;;  %v1470_v10 = vld [vmem:[#allocation11 + $0x10] sm:$0xff]  ;;  %v1650_v11 = vld [vmem:[#allocation13 + $0x8] sm:$0xff] }
 0xa68   :  { %v1278_v16 = vadd.f32 %v1274_v53, %v313_v45 }
 0xa69   :  { %v4159_v49 = vmul.f32 -1.442695, %v1277_v13 }
 0xa6a   :  { %v4160_v17 = vmul.f32 -1.442695, %v1278_v16 }
 0xa6b   :  { %4824 = vpow2.f32 %v4159_v49  ;;  %v1651_v49 = vld [vmem:[#allocation13 + $0x10] sm:$0xff] }
 0xa6c   :  { %4826 = vpow2.f32 %v4160_v17 }
 0xa6d   :  { %4828 = vtanh.f32 %v1277_v13  ;;  %v1652_v13 = vld [vmem:[#allocation13 + $0x18] sm:$0xff] }
 0xa6e   :  { %4830 = vtanh.f32 %v1278_v16  ;;  %v5883_v53 = vpack.c.bf16 %v1652_v13, %v1650_v11  ;;  %v1649_v16 = vld [vmem:[#allocation13] sm:$0xff] }
 0xa6f   :  { %v5887_v17 = vpack.c.bf16 %v1651_v49, %v1649_v16  ;;  %v1462_v16 = vld [vmem:[#allocation3 + $0x10] sm:$0xff]  ;;  %v1463_v49 = vld [vmem:[#allocation3 + $0x18] sm:$0xff] }
 0xa70   :  { %4432 = vmatprep.subr.bf16.mxu1 %v5883_v53 }
 0xa75   :  { %v4825_v18 = vpop.eup %4824 }
 0xa76   :  { %v4827_v19 = vpop.eup %4826  ;;  %v1287_v20 = vadd.f32 1.0, %v4825_v18  ;;  %v1473_v18 = vld [vmem:[#allocation11 + $0x28] sm:$0xff] }
 0xa77   :  { %v1288_v23 = vadd.f32 1.0, %v4827_v19  ;;  %v4829_v52 = vpop.eup %4828  ;;  %v1475_v19 = vld [vmem:[#allocation11 + $0x38] sm:$0xff] }
 0xa78   :  { %4832 = vrcp.f32 %v1287_v20  ;;  %v4831_v24 = vpop.eup %4830  ;;  %v4419_v20 = vpack.c.bf16 %v1475_v19, %v1473_v18  ;;  %v1464_v18 = vld [vmem:[#allocation3 + $0x20] sm:$0xff]  ;;  %v1465_v19 = vld [vmem:[#allocation3 + $0x28] sm:$0xff] }
 0xa79   :  { %4834 = vrcp.f32 %v1288_v23  ;;  %v1472_v23 = vld [vmem:[#allocation11 + $0x20] sm:$0xff] }
 0xa82   :  { %v4833_v25 = vpop.eup %4832 }
 0xa83   :  { %v4835_v60 = vpop.eup %4834  ;;  %v1293_v26 = vsel %vm5606_vm5, %v4829_v52, %v4833_v25  ;;  %v1474_v52 = vld [vmem:[#allocation11 + $0x30] sm:$0xff]  ;;  %v1654_v25 = vld [vmem:[#allocation13 + $0x28] sm:$0xff] }
 0xa84   :  { %1301 = vrot.lane.b32.xlu1 %v1293_v26, %s5301_s14  ;;  %v1294_v28 = vsel %vm5610_vm6, %v4831_v24, %v4835_v60  ;;  %v4421_v24 = vpack.c.bf16 %v1474_v52, %v1472_v23  ;;  %v1656_v60 = vld [vmem:[#allocation13 + $0x38] sm:$0xff] }
 0xa85   :  { %1296 = vrot.lane.b32.xlu0 %v1294_v28, %s5300_s5 }
 0xa88   :  { %1308 = vrot.lane.b32.xlu1 %v1294_v28, %s5301_s14 }
 0xa89   :  { %1305 = vrot.lane.b32.xlu0 %v1293_v26, %s5299_s4 }
 0xa8c   :  { %1315 = vrot.lane.b32.xlu1 %v1294_v28, %s5299_s4 }
 0xa8d   :  { %1312 = vrot.lane.b32.xlu0 %v1293_v26, %s5300_s5 }
 0xaf6   :  { %v1302_v27 = vpop.permute.xlu1 %1301 }
 0xaf7   :  { %v1297_v21 = vpop.permute.xlu0 %1296  ;;  %v1304_v31 = vsel %vm213_vm0, %v1302_v27, %v1294_v28  ;;  %v1653_v28 = vld [vmem:[#allocation13 + $0x20] sm:$0xff]  ;;  %v1655_v27 = vld [vmem:[#allocation13 + $0x30] sm:$0xff] }
 0xaf8   :  { %v1299_v39 = vsel %vm213_vm0, %v1293_v26, %v1297_v21  ;;  %v1319_v30 = vmul.f32 %v1304_v31, %v1197_v5  ;;  %v5893_v26 = vpack.c.bf16 %v1656_v60, %v1654_v25  ;;  %v5897_v21 = vpack.c.bf16 %v1655_v27, %v1653_v28  ;;  %v1477_v31 = vld [vmem:[#allocation11 + $0x48] sm:$0xff]  ;;  %v1484_v25 = vld [vmem:[#allocation14] sm:$0x3] }
 0xaf9   :  { %v1489_v60 = vrot.slane %v1484_v25, %v5585_v50  ;;  %v1493_v28 = vrot.slane %v1484_v25, %v5594_v54 }
 0xafa   :  { %v1309_v32 = vpop.permute.xlu1 %1308 }
 0xafb   :  { %v1306_v33 = vpop.permute.xlu0 %1305 }
 0xafc   :  { %v1311_v29 = vsel %vm213_vm0, %v1306_v33, %v1309_v32  ;;  %v1479_v32 = vld [vmem:[#allocation11 + $0x58] sm:$0xff] }
 0xafd   :  { %v1320_v36 = vmul.f32 %v1311_v29, %v1299_v39  ;;  %v4423_v33 = vpack.c.bf16 %v1479_v32, %v1477_v31  ;;  %v1478_v39 = vld [vmem:[#allocation11 + $0x50] sm:$0xff] }
 0xafe   :  { %v1316_v48 = vpop.permute.xlu1 %1315 }
 0xaff   :  { %v1321_v37 = vadd.f32 %v1320_v36, %v1319_v30  ;;  %v1313_v40 = vpop.permute.xlu0 %1312  ;;  %v1658_v30 = vld [vmem:[#allocation13 + $0x48] sm:$0xff]  ;;  %v1660_v36 = vld [vmem:[#allocation13 + $0x58] sm:$0xff] }
 0xb00   :  { %v1318_v51 = vsel %vm213_vm0, %v1313_v40, %v1316_v48  ;;  %v1657_v48 = vld [vmem:[#allocation13 + $0x40] sm:$0xff]  ;;  %v1659_v40 = vld [vmem:[#allocation13 + $0x50] sm:$0xff] }
 0xb01   :  { %4836 = vtanh.f32 %v1321_v37  ;;  %v5858_v41 = vsel %vm1326_vm15, %v1321_v37, %v1197_v5  ;;  %v5901_v37 = vpack.c.bf16 %v1660_v36, %v1658_v30 }
 0xb0b   :  { %v4837_v42 = vpop.eup %4836 }
 0xb0c   :  { %v1323_v34 = vmul.f32 %v4837_v42, %v1318_v51  ;;  %v1481_v42 = vld [vmem:[#allocation11 + $0x68] sm:$0xff]  ;;  %v5903_v51 = vpack.c.bf16 %v1659_v40, %v1657_v48 }
 0xb0e   :  { %v1329_v44 = vmul.f32 %v1325_v22, %v1323_v34  ;;  %v1327_v47 = vsel %vm1326_vm15, %v1323_v34, %v1196_v9  ;;  %v1468_v9 = vld [vmem:[#allocation11] sm:$0xff]  ;;  %v1483_v34 = vld [vmem:[#allocation11 + $0x78] sm:$0xff] }
 0xb0f   :  { %4161 = vmatmul.mubr.msk.f32.vlgmr.msra.gmra.mrb[16].mxu1 %vm391_vm8, %v1327_v47  ;;  %v4417_v45 = vpack.c.bf16 %v1470_v10, %v1468_v9  ;;  %v1476_v22 = vld [vmem:[#allocation11 + $0x40] sm:$0xff]  ;;  %v1482_v47 = vld [vmem:[#allocation11 + $0x70] sm:$0xff] }
 0xb10   :  { %1330 = vst.msk [vmem:[#allocation3 + $0x30] sm:$0xff] %vm213_vm0, %v1329_v44  ;;  %1731 = vmatprep.mubr.f32.mxu1 %v5298_v0  ;;  %4434 = vmatpush1.bf16.msra.mxu1 %v5887_v17  ;;  %v4425_v29 = vpack.c.bf16 %v1478_v39, %v1476_v22 }
 0xb11   :  { %1331 = vst.msk [vmem:[#allocation3 + $0x8] sm:$0xff] %vm520_vm9, %v1329_v44  ;;  %4418 = vmatpush1.bf16.msra.mxu0 %v4417_v45  ;;  %4436 = vmatprep.subr.bf16.mxu1 %v5893_v26  ;;  %v1480_v44 = vld [vmem:[#allocation11 + $0x60] sm:$0xff]  ;;  %v1456_v45 = vld [vmem:[#allocation5 + $0x38] sm:$0xff] }
 0xb12   :  { %4420 = vmatprep.subr.bf16.mxu0 %v4419_v20 }
 0xb14   :  { %4438 = vmatpush1.bf16.msra.mxu1 %v5897_v21 }
 0xb15   :  { %4422 = vmatpush1.bf16.msra.mxu0 %v4421_v24  ;;  %4440 = vmatprep.subr.bf16.mxu1 %v5901_v37 }
 0xb16   :  { %4424 = vmatprep.subr.bf16.mxu0 %v4423_v33 }
 0xb17   :  { %v1466_v20 = vld [vmem:[#allocation3 + $0x30] sm:$0xff] }
 0xb18   :  { %4442 = vmatpush1.bf16.msra.mxu1 %v5903_v51 }
 0xb19   :  { %4426 = vmatpush1.bf16.msra.mxu0 %v4425_v29 }
 0xbe2   :  { %v1403_v35 = vpop.f32.mrb[16].mxu1 }
 0xbe3   :  { %v1408_v57 = vadd.f32 %v1403_v35, %v347_v58  ;;  %v1405_v63 = vpop.f32.mrb[17].mxu1  ;;  %v4427_v58 = vpack.c.bf16 %v1483_v34, %v1481_v42  ;;  %v1662_v35 = vld [vmem:[#allocation13 + $0x68] sm:$0xff] }
 0xbe4   :  { %v1409_v1 = vadd.f32 %v1405_v63, %v307_v38  ;;  %v4429_v38 = vpack.c.bf16 %v1482_v47, %v1480_v44  ;;  %v1661_v63 = vld [vmem:[#allocation13 + $0x60] sm:$0xff] }
 0xbe5   :  { %v4162_v2 = vmul.f32 -1.442695, %v1408_v57  ;;  %4428 = vmatprep.subr.bf16.mxu0 %v4427_v58 }
 0xbe6   :  { %v4163_v3 = vmul.f32 -1.442695, %v1409_v1  ;;  %4430 = vmatpush1.bf16.msra.mxu0 %v4429_v38 }
 0xbe7   :  { %4838 = vpow2.f32 %v4162_v2  ;;  %v1663_v2 = vld [vmem:[#allocation13 + $0x70] sm:$0xff]  ;;  %4464 = vmatprep.subr.bf16.mxu0 %v5883_v53 }
 0xbe8   :  { %4840 = vpow2.f32 %v4163_v3  ;;  %v5909_v3 = vpack.c.bf16 %v1663_v2, %v1661_v63 }
 0xbe9   :  { %4842 = vtanh.f32 %v1408_v57  ;;  %v1664_v57 = vld [vmem:[#allocation13 + $0x78] sm:$0xff] }
 0xbea   :  { %4844 = vtanh.f32 %v1409_v1  ;;  %v5907_v1 = vpack.c.bf16 %v1664_v57, %v1662_v35 }
 0xbec   :  { %4444 = vmatprep.subr.bf16.mxu1 %v5907_v1 }
 0xbed   :  { %4446 = vmatpush1.bf16.msra.mxu1 %v5909_v3 }
 0xbee   :  { %4448 = vmatprep.subr.bf16.mxu1 %v5883_v53 }
 0xbf0   :  { %1732 = vmatmul.mubr.f32.vlgmr.msra.gmra.mrb[18].mxu1 %v5298_v0 }
 0xbf1   :  { %v4839_v4 = vpop.eup %4838  ;;  %4450 = vmatpush1.bf16.msra.mxu1 %v5887_v17  ;;  %1862 = vmatprep.mubr.f32.mxu1 %v5298_v0 }
 0xbf2   :  { %v4841_v43 = vpop.eup %4840  ;;  %v1418_v5 = vadd.f32 1.0, %v4839_v4  ;;  %4452 = vmatprep.subr.bf16.mxu1 %v5893_v26 }
 0xbf3   :  { %v1419_v6 = vadd.f32 1.0, %v4841_v43  ;;  %v4843_v55 = vpop.eup %4842 }
 0xbf4   :  { %4846 = vrcp.f32 %v1418_v5  ;;  %v4845_v56 = vpop.eup %4844 }
 0xbf5   :  { %4848 = vrcp.f32 %v1419_v6  ;;  %4454 = vmatpush1.bf16.msra.mxu1 %v5897_v21 }
 0xbf6   :  { %4456 = vmatprep.subr.bf16.mxu1 %v5901_v37 }
 0xbf9   :  { %4458 = vmatpush1.bf16.msra.mxu1 %v5903_v51 }
 0xbfa   :  { %4460 = vmatprep.subr.bf16.mxu1 %v5907_v1 }
 0xbfd   :  { %4462 = vmatpush1.bf16.msra.mxu1 %v5909_v3 }
 0xbfe   :  { %v4847_v62 = vpop.eup %4846  ;;  %4480 = vmatprep.subr.bf16.mxu1 %v5883_v53 }
 0xbff   :  { %v4849_v46 = vpop.eup %4848  ;;  %v5871_v59 = vsel %vm5606_vm5, %v4843_v55, %v4847_v62 }
 0xc00   :  { %1432 = vrot.lane.b32.xlu1 %v5871_v59, %s5301_s14  ;;  %v5877_v7 = vsel %vm5610_vm6, %v4845_v56, %v4849_v46 }
 0xc01   :  { %1427 = vrot.lane.b32.xlu0 %v5877_v7, %s5300_s5 }
 0xc04   :  { %1439 = vrot.lane.b32.xlu1 %v5877_v7, %s5301_s14 }
 0xc05   :  { %1436 = vrot.lane.b32.xlu0 %v5871_v59, %s5299_s4 }
 0xc08   :  { %1446 = vrot.lane.b32.xlu1 %v5877_v7, %s5299_s4 }
 0xc09   :  { %1443 = vrot.lane.b32.xlu0 %v5871_v59, %s5300_s5 }
 0xc72   :  { %v1433_v4 = vpop.permute.xlu1 %1432 }
 0xc73   :  { %v1428_v43 = vpop.permute.xlu0 %1427  ;;  %v1435_v5 = vsel %vm213_vm0, %v1433_v4, %v5877_v7 }
 0xc74   :  { %v1430_v56 = vsel %vm213_vm0, %v5871_v59, %v1428_v43  ;;  %v1450_v46 = vmul.f32 %v1435_v5, %v5858_v41  ;;  %v1461_v41 = vld [vmem:[#allocation3 + $0x8] sm:$0xff] }
 0xc76   :  { %v1440_v6 = vpop.permute.xlu1 %1439 }
 0xc77   :  { %v1437_v55 = vpop.permute.xlu0 %1436 }
 0xc78   :  { %v1442_v62 = vsel %vm213_vm0, %v1437_v55, %v1440_v6 }
 0xc79   :  { %v1451_v8 = vmul.f32 %v1442_v62, %v1430_v56 }
 0xc7a   :  { %v1447_v61 = vpop.permute.xlu1 %1446 }
 0xc7b   :  { %v1452_v15 = vadd.f32 %v1451_v8, %v1450_v46  ;;  %v1444_v9 = vpop.permute.xlu0 %1443 }
 0xc7c   :  { %v1449_v11 = vsel %vm213_vm0, %v1444_v9, %v1447_v61 }
 0xc7d   :  { %4850 = vtanh.f32 %v1452_v15 }
 0xc87   :  { %v4851_v10 = vpop.eup %4850 }
 0xc88   :  { %v1454_v13 = vmul.f32 %v4851_v10, %v1449_v11 }
 0xc8a   :  { %v1457_v7 = vmul.f32 %v1456_v45, %v1454_v13 }
 0xc8c   :  { %1458 = vst.msk [vmem:[#allocation3 + $0x38] sm:$0xff] %vm213_vm0, %v1457_v7 }
 0xc8d   :  { %1459 = vst.msk [vmem:[#allocation3] sm:$0xff] %vm520_vm9, %v1457_v7 }
 0xc93   :  { %v1467_v23 = vld [vmem:[#allocation3 + $0x38] sm:$0xff] }
 0xc94   :  { %v1460_v59 = vld [vmem:[#allocation3] sm:$0xff] }
 0xc95   :  { %4164 = vmatmul.mubr.msk.f32.vlgmr.msra.gmra.mrb[14].mxu0 %vm391_vm8, %v1460_v59 }
 0xc96   :  { %1590 = vmatprep.mubr.f32.mxu0 %v5298_v0  ;;  %4466 = vmatpush1.bf16.msra.mxu0 %v5887_v17 }
 0xc97   :  { %4468 = vmatprep.subr.bf16.mxu0 %v5893_v26 }
 0xc99   :  { %4165 = vmatmul.mubr.msk.f32.gmra.mrb[16].mxu0 %vm391_vm8, %v1461_v41 }
 0xc9a   :  { %1596 = vmatprep.mubr.f32.mxu0 %v5298_v0  ;;  %4470 = vmatpush1.bf16.msra.mxu0 %v5897_v21 }
 0xc9b   :  { %4472 = vmatprep.subr.bf16.mxu0 %v5901_v37 }
 0xc9d   :  { %4166 = vmatmul.mubr.msk.f32.gmra.mrb[18].mxu0 %vm391_vm8, %v1462_v16 }
 0xc9e   :  { %1602 = vmatprep.mubr.f32.mxu0 %v5298_v0  ;;  %4474 = vmatpush1.bf16.msra.mxu0 %v5903_v51 }
 0xc9f   :  { %4476 = vmatprep.subr.bf16.mxu0 %v5907_v1 }
 0xca1   :  { %4167 = vmatmul.mubr.msk.f32.gmra.mrb[20].mxu0 %vm391_vm8, %v1463_v49 }
 0xca2   :  { %1608 = vmatprep.mubr.f32.mxu0 %v5298_v0  ;;  %4478 = vmatpush1.bf16.msra.mxu0 %v5909_v3 }
 0xca3   :  { %4496 = vmatprep.subr.bf16.mxu0 %v5883_v53 }
 0xca5   :  { %4168 = vmatmul.mubr.msk.f32.gmra.mrb[22].mxu0 %vm391_vm8, %v1464_v18 }
 0xca6   :  { %1614 = vmatprep.mubr.f32.mxu0 %v5298_v0 }
 0xca9   :  { %4169 = vmatmul.mubr.msk.f32.gmra.mrb[24].mxu0 %vm391_vm8, %v1465_v19 }
 0xcaa   :  { %1620 = vmatprep.mubr.f32.mxu0 %v5298_v0 }
 0xcad   :  { %4170 = vmatmul.mubr.msk.f32.gmra.mrb[26].mxu0 %vm391_vm8, %v1466_v20 }
 0xcae   :  { %1626 = vmatprep.mubr.f32.mxu0 %v5298_v0 }
 0xcb1   :  { %4171 = vmatmul.mubr.msk.f32.gmra.mrb[28].mxu0 %vm391_vm8, %v1467_v23 }
 0xcb2   :  { %1994 = vmatprep.mubr.f32.mxu0 %v5298_v0 }
 0xcc3   :  { %v1733_v52 = vpop.f32.mrb[18].mxu1 }
 0xcc4   :  { %v1735_v24 = vpop.f32.mrb[19].mxu1 }
 0xd68   :  { %v1586_v27 = vpop.f32.mrb[14].mxu0 }
 0xd69   :  { %v1587_v31 = vadd.f32 %v1586_v27, %v1489_v60  ;;  %v1588_v32 = vpop.f32.mrb[15].mxu0  ;;  %v1785_v27 = vld [vmem:[#allocation5] sm:$0xff] }
 0xd6a   :  { %v5960_v33 = vadd.f32 %v1588_v32, %v1493_v28  ;;  %vm1786_vm1 = vcmp.gt.f32.partialorder %v1785_v27, 0.0 }
 0xd6b   :  { %v1738_v22 = vadd.f32 %v1733_v52, %v1587_v31 }
 0xd6c   :  { %v1592_v39 = vpop.f32.mrb[16].mxu0 }
 0xd6d   :  { %v4172_v29 = vmul.f32 -1.442695, %v1738_v22  ;;  %v5962_v30 = vadd.f32 %v1592_v39, %v1489_v60  ;;  %v1594_v36 = vpop.f32.mrb[17].mxu0 }
 0xd6e   :  { %v5964_v48 = vadd.f32 %v1594_v36, %v1493_v28 }
 0xd6f   :  { %4852 = vpow2.f32 %v4172_v29 }
 0xd70   :  { %v1598_v40 = vpop.f32.mrb[18].mxu0  ;;  %4854 = vtanh.f32 %v1738_v22 }
 0xd71   :  { %v5966_v42 = vadd.f32 %v1598_v40, %v1489_v60  ;;  %v1600_v34 = vpop.f32.mrb[19].mxu0 }
 0xd72   :  { %v5968_v44 = vadd.f32 %v1600_v34, %v1493_v28 }
 0xd74   :  { %v1604_v47 = vpop.f32.mrb[20].mxu0 }
 0xd75   :  { %v5970_v58 = vadd.f32 %v1604_v47, %v1489_v60  ;;  %v1606_v38 = vpop.f32.mrb[21].mxu0 }
 0xd76   :  { %v5972_v35 = vadd.f32 %v1606_v38, %v1493_v28 }
 0xd78   :  { %v1610_v57 = vpop.f32.mrb[22].mxu0 }
 0xd79   :  { %v4853_v63 = vpop.eup %4852  ;;  %v5974_v2 = vadd.f32 %v1610_v57, %v1489_v60  ;;  %v1612_v4 = vpop.f32.mrb[23].mxu0 }
 0xd7a   :  { %v1748_v43 = vadd.f32 1.0, %v4853_v63  ;;  %v5976_v5 = vadd.f32 %v1612_v4, %v1493_v28  ;;  %v4855_v10 = vpop.eup %4854 }
 0xd7c   :  { %4856 = vrcp.f32 %v1748_v43  ;;  %v1616_v6 = vpop.f32.mrb[24].mxu0 }
 0xd7d   :  { %v5978_v55 = vadd.f32 %v1616_v6, %v1489_v60  ;;  %v1618_v56 = vpop.f32.mrb[25].mxu0 }
 0xd7e   :  { %v5980_v62 = vadd.f32 %v1618_v56, %v1493_v28 }
 0xd80   :  { %v1622_v46 = vpop.f32.mrb[26].mxu0 }
 0xd81   :  { %v5982_v8 = vadd.f32 %v1622_v46, %v1489_v60  ;;  %v1624_v15 = vpop.f32.mrb[27].mxu0 }
 0xd82   :  { %v1625_v61 = vadd.f32 %v1624_v15, %v1493_v28 }
 0xd84   :  { %v1628_v9 = vpop.f32.mrb[28].mxu0 }
 0xd85   :  { %v5984_v45 = vadd.f32 %v1628_v9, %v1489_v60  ;;  %v1630_v11 = vpop.f32.mrb[29].mxu0 }
 0xd86   :  { %v4857_v13 = vpop.eup %4856  ;;  %v1631_v7 = vadd.f32 %v1630_v11, %v1493_v28 }
 0xd87   :  { %v1754_v59 = vsel %vm5606_vm5, %v4855_v10, %v4857_v13 }
 0xd88   :  { %v1739_v41 = vadd.f32 %v1735_v24, %v1631_v7  ;;  %1762 = vrot.lane.b32.xlu1 %v1754_v59, %s5301_s14 }
 0xd8a   :  { %v4173_v16 = vmul.f32 -1.442695, %v1739_v41 }
 0xd8c   :  { %4858 = vpow2.f32 %v4173_v16 }
 0xd8d   :  { %4860 = vtanh.f32 %v1739_v41 }
 0xd96   :  { %v4859_v49 = vpop.eup %4858 }
 0xd97   :  { %v1749_v18 = vadd.f32 1.0, %v4859_v49  ;;  %v4861_v19 = vpop.eup %4860 }
 0xd99   :  { %4862 = vrcp.f32 %v1749_v18 }
 0xda3   :  { %v4863_v20 = vpop.eup %4862 }
 0xda4   :  { %v1755_v23 = vsel %vm5610_vm6, %v4861_v19, %v4863_v20 }
 0xda5   :  { %1769 = vrot.lane.b32.xlu1 %v1755_v23, %s5301_s14  ;;  %1757 = vrot.lane.b32.xlu0 %v1755_v23, %s5300_s5 }
 0xda9   :  { %1776 = vrot.lane.b32.xlu1 %v1755_v23, %s5299_s4  ;;  %1766 = vrot.lane.b32.xlu0 %v1754_v59, %s5299_s4 }
 0xdad   :  { %1773 = vrot.lane.b32.xlu0 %v1754_v59, %s5300_s5 }
 0xdfa   :  { %v1763_v52 = vpop.permute.xlu1 %1762 }
 0xdfb   :  { %v1765_v25 = vsel %vm213_vm0, %v1763_v52, %v1755_v23 }
 0xdfc   :  { %v1780_v22 = vmul.f32 0.0, %v1765_v25 }
 0xe17   :  { %v1758_v24 = vpop.permute.xlu0 %1757  ;;  %v1770_v60 = vpop.permute.xlu1 %1769 }
 0xe18   :  { %v1760_v31 = vsel %vm213_vm0, %v1754_v59, %v1758_v24  ;;  %v1916_v24 = vld [vmem:[#allocation5 + $0x8] sm:$0xff] }
 0xe19   :  { %vm1917_vm2 = vcmp.gt.f32.partialorder %v1916_v24, 0.0 }
 0xe1b   :  { %v1767_v28 = vpop.permute.xlu0 %1766  ;;  %v1777_v34 = vpop.permute.xlu1 %1776 }
 0xe1c   :  { %v1772_v32 = vsel %vm213_vm0, %v1767_v28, %v1770_v60 }
 0xe1d   :  { %v1781_v39 = vmul.f32 %v1772_v32, %v1760_v31 }
 0xe1f   :  { %v1782_v29 = vadd.f32 %v1781_v39, %v1780_v22  ;;  %v1774_v40 = vpop.permute.xlu0 %1773 }
 0xe20   :  { %v1779_v38 = vsel %vm213_vm0, %v1774_v40, %v1777_v34 }
 0xe21   :  { %4864 = vtanh.f32 %v1782_v29  ;;  %v1788_v36 = vsel %vm1786_vm1, %v1782_v29, 0.0 }
 0xe2b   :  { %v4865_v47 = vpop.eup %4864 }
 0xe2c   :  { %v1784_v57 = vmul.f32 %v4865_v47, %v1779_v38 }
 0xe2e   :  { %v1787_v63 = vsel %vm1786_vm1, %v1784_v57, 0.0  ;;  %v1789_v4 = vmul.f32 %v1785_v27, %v1784_v57 }
 0xe2f   :  { %4174 = vmatmul.mubr.msk.f32.vlgmr.msra.gmra.mrb[20].mxu1 %vm391_vm8, %v1787_v63 }
 0xe30   :  { %1790 = vst.msk [vmem:[#allocation4] sm:$0xff] %vm213_vm0, %v1789_v4  ;;  %4482 = vmatpush1.bf16.msra.mxu1 %v5887_v17  ;;  %2126 = vmatprep.mubr.f32.mxu1 %v5298_v0 }
 0xe31   :  { %1792 = vst.msk [vmem:[#allocation4 + $0x38] sm:$0xff] %vm520_vm9, %v1789_v4  ;;  %4484 = vmatprep.subr.bf16.mxu1 %v5893_v26 }
 0xe34   :  { %4486 = vmatpush1.bf16.msra.mxu1 %v5897_v21 }
 0xe35   :  { %4488 = vmatprep.subr.bf16.mxu1 %v5901_v37 }
 0xe38   :  { %4490 = vmatpush1.bf16.msra.mxu1 %v5903_v51 }
 0xe39   :  { %4492 = vmatprep.subr.bf16.mxu1 %v5907_v1 }
 0xe3c   :  { %4494 = vmatpush1.bf16.msra.mxu1 %v5909_v3 }
 0xe3d   :  { %4512 = vmatprep.subr.bf16.mxu1 %v5883_v53 }
 0xf02   :  { %v1864_v43 = vpop.f32.mrb[20].mxu1 }
 0xf03   :  { %v1869_v6 = vadd.f32 %v1864_v43, %v5962_v30  ;;  %v1866_v56 = vpop.f32.mrb[21].mxu1 }
 0xf04   :  { %v1870_v46 = vadd.f32 %v1866_v56, %v1625_v61 }
 0xf05   :  { %v4175_v15 = vmul.f32 -1.442695, %v1869_v6 }
 0xf06   :  { %v4176_v9 = vmul.f32 -1.442695, %v1870_v46 }
 0xf07   :  { %4866 = vpow2.f32 %v4175_v15 }
 0xf08   :  { %4868 = vpow2.f32 %v4176_v9 }
 0xf09   :  { %4870 = vtanh.f32 %v1869_v6 }
 0xf0a   :  { %4872 = vtanh.f32 %v1870_v46 }
 0xf11   :  { %v4867_v10 = vpop.eup %4866 }
 0xf12   :  { %v4869_v11 = vpop.eup %4868  ;;  %v1879_v13 = vadd.f32 1.0, %v4867_v10 }
 0xf13   :  { %v1880_v7 = vadd.f32 1.0, %v4869_v11  ;;  %v4871_v59 = vpop.eup %4870 }
 0xf14   :  { %4874 = vrcp.f32 %v1879_v13  ;;  %v4873_v41 = vpop.eup %4872 }
 0xf15   :  { %4876 = vrcp.f32 %v1880_v7 }
 0xf1e   :  { %v4875_v16 = vpop.eup %4874 }
 0xf1f   :  { %v4877_v49 = vpop.eup %4876  ;;  %v1885_v30 = vsel %vm5606_vm5, %v4871_v59, %v4875_v16 }
 0xf20   :  { %1893 = vrot.lane.b32.xlu1 %v1885_v30, %s5301_s14  ;;  %v1886_v61 = vsel %vm5610_vm6, %v4873_v41, %v4877_v49 }
 0xf21   :  { %1888 = vrot.lane.b32.xlu0 %v1886_v61, %s5300_s5 }
 0xf24   :  { %1900 = vrot.lane.b32.xlu1 %v1886_v61, %s5301_s14 }
 0xf25   :  { %1897 = vrot.lane.b32.xlu0 %v1885_v30, %s5299_s4 }
 0xf28   :  { %1907 = vrot.lane.b32.xlu1 %v1886_v61, %s5299_s4 }
 0xf29   :  { %1904 = vrot.lane.b32.xlu0 %v1885_v30, %s5300_s5 }
 0xf92   :  { %v1894_v18 = vpop.permute.xlu1 %1893 }
 0xf93   :  { %v1889_v19 = vpop.permute.xlu0 %1888  ;;  %v1896_v20 = vsel %vm213_vm0, %v1894_v18, %v1886_v61  ;;  %v2048_v61 = vld [vmem:[#allocation5 + $0x10] sm:$0xff] }
 0xf94   :  { %v1891_v25 = vsel %vm213_vm0, %v1885_v30, %v1889_v19  ;;  %v1911_v28 = vmul.f32 %v1896_v20, %v1788_v36  ;;  %vm2049_vm3 = vcmp.gt.f32.partialorder %v2048_v61, 0.0 }
 0xf96   :  { %v1901_v23 = vpop.permute.xlu1 %1900 }
 0xf97   :  { %v1898_v52 = vpop.permute.xlu0 %1897 }
 0xf98   :  { %v1903_v60 = vsel %vm213_vm0, %v1898_v52, %v1901_v23 }
 0xf99   :  { %v1912_v27 = vmul.f32 %v1903_v60, %v1891_v25 }
 0xf9a   :  { %v1908_v22 = vpop.permute.xlu1 %1907 }
 0xf9b   :  { %v1913_v31 = vadd.f32 %v1912_v27, %v1911_v28  ;;  %v1905_v39 = vpop.permute.xlu0 %1904 }
 0xf9c   :  { %v1910_v40 = vsel %vm213_vm0, %v1905_v39, %v1908_v22 }
 0xf9d   :  { %4878 = vtanh.f32 %v1913_v31  ;;  %v1919_v32 = vsel %vm1917_vm2, %v1913_v31, %v1788_v36 }
 0xfa7   :  { %v4879_v29 = vpop.eup %4878 }
 0xfa8   :  { %v1915_v34 = vmul.f32 %v4879_v29, %v1910_v40 }
 0xfaa   :  { %v6027_v47 = vsel %vm1917_vm2, %v1915_v34, %v1787_v63  ;;  %v1920_v38 = vmul.f32 %v1916_v24, %v1915_v34 }
 0xfab   :  { %4177 = vmatmul.mubr.msk.f32.vlgmr.msra.gmra.mrb[30].mxu0 %vm391_vm8, %v6027_v47 }
 0xfac   :  { %1922 = vst.msk [vmem:[#allocation4 + $0x8] sm:$0xff] %vm213_vm0, %v1920_v38  ;;  %4498 = vmatpush1.bf16.msra.mxu0 %v5887_v17  ;;  %2258 = vmatprep.mubr.f32.mxu0 %v5298_v0 }
 0xfad   :  { %1924 = vst.msk [vmem:[#allocation4 + $0x30] sm:$0xff] %vm520_vm9, %v1920_v38  ;;  %4500 = vmatprep.subr.bf16.mxu0 %v5893_v26 }
 0xfb0   :  { %4502 = vmatpush1.bf16.msra.mxu0 %v5897_v21 }
 0xfb1   :  { %4504 = vmatprep.subr.bf16.mxu0 %v5901_v37 }
 0xfb4   :  { %4506 = vmatpush1.bf16.msra.mxu0 %v5903_v51 }
 0xfb5   :  { %4508 = vmatprep.subr.bf16.mxu0 %v5907_v1 }
 0xfb8   :  { %4510 = vmatpush1.bf16.msra.mxu0 %v5909_v3 }
 0xfb9   :  { %4528 = vmatprep.subr.bf16.mxu0 %v5883_v53 }
0x107e   :  { %v1996_v36 = vpop.f32.mrb[30].mxu0 }
0x107f   :  { %v2001_v57 = vadd.f32 %v1996_v36, %v5966_v42  ;;  %v1998_v63 = vpop.f32.mrb[31].mxu0 }
0x1080   :  { %v2002_v4 = vadd.f32 %v1998_v63, %v5980_v62 }
0x1081   :  { %v4178_v43 = vmul.f32 -1.442695, %v2001_v57 }
0x1082   :  { %v4179_v6 = vmul.f32 -1.442695, %v2002_v4 }
0x1083   :  { %4880 = vpow2.f32 %v4178_v43 }
0x1084   :  { %4882 = vpow2.f32 %v4179_v6 }
0x1085   :  { %4884 = vtanh.f32 %v2001_v57 }
0x1086   :  { %4886 = vtanh.f32 %v2002_v4 }
0x108d   :  { %v4881_v56 = vpop.eup %4880 }
0x108e   :  { %v4883_v46 = vpop.eup %4882  ;;  %v2011_v15 = vadd.f32 1.0, %v4881_v56 }
0x108f   :  { %v2012_v9 = vadd.f32 1.0, %v4883_v46  ;;  %v4885_v10 = vpop.eup %4884 }
0x1090   :  { %4888 = vrcp.f32 %v2011_v15  ;;  %v4887_v11 = vpop.eup %4886 }
0x1091   :  { %4890 = vrcp.f32 %v2012_v9 }
0x109a   :  { %v4889_v13 = vpop.eup %4888 }
0x109b   :  { %v4891_v7 = vpop.eup %4890  ;;  %v2017_v42 = vsel %vm5606_vm5, %v4885_v10, %v4889_v13  ;;  %v2180_v13 = vld [vmem:[#allocation5 + $0x18] sm:$0xff] }
0x109c   :  { %2025 = vrot.lane.b32.xlu1 %v2017_v42, %s5301_s14  ;;  %v2018_v62 = vsel %vm5610_vm6, %v4887_v11, %v4891_v7  ;;  %vm2181_vm4 = vcmp.gt.f32.partialorder %v2180_v13, 0.0 }
0x109d   :  { %2020 = vrot.lane.b32.xlu0 %v2018_v62, %s5300_s5 }
0x10a0   :  { %2032 = vrot.lane.b32.xlu1 %v2018_v62, %s5301_s14 }
0x10a1   :  { %2029 = vrot.lane.b32.xlu0 %v2017_v42, %s5299_s4 }
0x10a4   :  { %2039 = vrot.lane.b32.xlu1 %v2018_v62, %s5299_s4 }
0x10a5   :  { %2036 = vrot.lane.b32.xlu0 %v2017_v42, %s5300_s5 }
0x110e   :  { %v2026_v59 = vpop.permute.xlu1 %2025 }
0x110f   :  { %v2021_v41 = vpop.permute.xlu0 %2020  ;;  %v2028_v16 = vsel %vm213_vm0, %v2026_v59, %v2018_v62 }
0x1110   :  { %v2023_v18 = vsel %vm213_vm0, %v2017_v42, %v2021_v41  ;;  %v2043_v20 = vmul.f32 %v2028_v16, %v1919_v32 }
0x1112   :  { %v2033_v49 = vpop.permute.xlu1 %2032 }
0x1113   :  { %v2030_v30 = vpop.permute.xlu0 %2029 }
0x1114   :  { %v2035_v19 = vsel %vm213_vm0, %v2030_v30, %v2033_v49 }
0x1115   :  { %v2044_v23 = vmul.f32 %v2035_v19, %v2023_v18 }
0x1116   :  { %v2040_v25 = vpop.permute.xlu1 %2039 }
0x1117   :  { %v2045_v52 = vadd.f32 %v2044_v23, %v2043_v20  ;;  %v2037_v60 = vpop.permute.xlu0 %2036 }
0x1118   :  { %v2042_v27 = vsel %vm213_vm0, %v2037_v60, %v2040_v25 }
0x1119   :  { %4892 = vtanh.f32 %v2045_v52  ;;  %v2051_v24 = vsel %vm2049_vm3, %v2045_v52, %v1919_v32 }
0x1123   :  { %v4893_v28 = vpop.eup %4892 }
0x1124   :  { %v2047_v31 = vmul.f32 %v4893_v28, %v2042_v27 }
0x1126   :  { %v2052_v22 = vmul.f32 %v2048_v61, %v2047_v31  ;;  %v2050_v39 = vsel %vm2049_vm3, %v2047_v31, %v6027_v47 }
0x1127   :  { %4180 = vmatmul.mubr.msk.f32.vlgmr.msra.gmra.mrb[22].mxu1 %vm391_vm8, %v2050_v39 }
0x1128   :  { %2054 = vst.msk [vmem:[#allocation4 + $0x10] sm:$0xff] %vm213_vm0, %v2052_v22  ;;  %4514 = vmatpush1.bf16.msra.mxu1 %v5887_v17  ;;  %2388 = vmatprep.mubr.f32.mxu1 %v5298_v0 }
0x1129   :  { %2056 = vst.msk [vmem:[#allocation4 + $0x28] sm:$0xff] %vm520_vm9, %v2052_v22  ;;  %4516 = vmatprep.subr.bf16.mxu1 %v5893_v26 }
0x112c   :  { %4518 = vmatpush1.bf16.msra.mxu1 %v5897_v21 }
0x112d   :  { %4520 = vmatprep.subr.bf16.mxu1 %v5901_v37 }
0x1130   :  { %4522 = vmatpush1.bf16.msra.mxu1 %v5903_v51 }
0x1131   :  { %4524 = vmatprep.subr.bf16.mxu1 %v5907_v1 }
0x1134   :  { %4526 = vmatpush1.bf16.msra.mxu1 %v5909_v3 }
0x1135   :  { %4544 = vmatprep.subr.bf16.mxu1 %v5883_v53 }
0x11fa   :  { %v2128_v32 = vpop.f32.mrb[22].mxu1 }
0x11fb   :  { %v2133_v29 = vadd.f32 %v2128_v32, %v5970_v58  ;;  %v2130_v40 = vpop.f32.mrb[23].mxu1 }
0x11fc   :  { %v2134_v34 = vadd.f32 %v2130_v40, %v5976_v5 }
0x11fd   :  { %v4181_v47 = vmul.f32 -1.442695, %v2133_v29 }
0x11fe   :  { %v4182_v38 = vmul.f32 -1.442695, %v2134_v34 }
0x11ff   :  { %4894 = vpow2.f32 %v4181_v47 }
0x1200   :  { %4896 = vpow2.f32 %v4182_v38 }
0x1201   :  { %4898 = vtanh.f32 %v2133_v29 }
0x1202   :  { %4900 = vtanh.f32 %v2134_v34 }
0x1209   :  { %v4895_v36 = vpop.eup %4894 }
0x120a   :  { %v4897_v57 = vpop.eup %4896  ;;  %v2143_v63 = vadd.f32 1.0, %v4895_v36 }
0x120b   :  { %v2144_v4 = vadd.f32 1.0, %v4897_v57  ;;  %v4899_v43 = vpop.eup %4898 }
0x120c   :  { %4902 = vrcp.f32 %v2143_v63  ;;  %v4901_v53 = vpop.eup %4900 }
0x120d   :  { %4904 = vrcp.f32 %v2144_v4 }
0x1216   :  { %v4903_v6 = vpop.eup %4902 }
0x1217   :  { %v4905_v56 = vpop.eup %4904  ;;  %v2149_v58 = vsel %vm5606_vm5, %v4899_v43, %v4903_v6  ;;  %v2312_v43 = vld [vmem:[#allocation5 + $0x20] sm:$0xff] }
0x1218   :  { %2157 = vrot.lane.b32.xlu1 %v2149_v58, %s5301_s14  ;;  %v2150_v5 = vsel %vm5610_vm6, %v4901_v53, %v4905_v56  ;;  %vm2313_vm7 = vcmp.gt.f32.partialorder %v2312_v43, 0.0 }
0x1219   :  { %2152 = vrot.lane.b32.xlu0 %v2150_v5, %s5300_s5 }
0x121c   :  { %2164 = vrot.lane.b32.xlu1 %v2150_v5, %s5301_s14 }
0x121d   :  { %2161 = vrot.lane.b32.xlu0 %v2149_v58, %s5299_s4 }
0x1220   :  { %2171 = vrot.lane.b32.xlu1 %v2150_v5, %s5299_s4 }
0x1221   :  { %2168 = vrot.lane.b32.xlu0 %v2149_v58, %s5300_s5 }
0x128a   :  { %v2158_v46 = vpop.permute.xlu1 %2157 }
0x128b   :  { %v2153_v15 = vpop.permute.xlu0 %2152  ;;  %v2160_v9 = vsel %vm213_vm0, %v2158_v46, %v2150_v5 }
0x128c   :  { %v2155_v7 = vsel %vm213_vm0, %v2149_v58, %v2153_v15  ;;  %v2175_v62 = vmul.f32 %v2160_v9, %v2051_v24 }
0x128e   :  { %v2165_v10 = vpop.permute.xlu1 %2164 }
0x128f   :  { %v2162_v11 = vpop.permute.xlu0 %2161 }
0x1290   :  { %v2167_v42 = vsel %vm213_vm0, %v2162_v11, %v2165_v10 }
0x1291   :  { %v2176_v59 = vmul.f32 %v2167_v42, %v2155_v7 }
0x1292   :  { %v2172_v49 = vpop.permute.xlu1 %2171 }
0x1293   :  { %v2177_v41 = vadd.f32 %v2176_v59, %v2175_v62  ;;  %v2169_v30 = vpop.permute.xlu0 %2168 }
0x1294   :  { %v2174_v18 = vsel %vm213_vm0, %v2169_v30, %v2172_v49 }
0x1295   :  { %4906 = vtanh.f32 %v2177_v41  ;;  %v2183_v16 = vsel %vm2181_vm4, %v2177_v41, %v2051_v24 }
0x129f   :  { %v4907_v61 = vpop.eup %4906 }
0x12a0   :  { %v2179_v19 = vmul.f32 %v4907_v61, %v2174_v18 }
0x12a2   :  { %v2184_v20 = vmul.f32 %v2180_v13, %v2179_v19  ;;  %v2182_v23 = vsel %vm2181_vm4, %v2179_v19, %v2050_v39 }
0x12a3   :  { %4183 = vmatmul.mubr.msk.f32.vlgmr.msra.gmra.mrb[32].mxu0 %vm391_vm8, %v2182_v23 }
0x12a4   :  { %2186 = vst.msk [vmem:[#allocation4 + $0x18] sm:$0xff] %vm213_vm0, %v2184_v20  ;;  %4530 = vmatpush1.bf16.msra.mxu0 %v5887_v17  ;;  %2518 = vmatprep.mubr.f32.mxu0 %v5298_v0 }
0x12a5   :  { %2188 = vst.msk [vmem:[#allocation4 + $0x20] sm:$0xff] %vm520_vm9, %v2184_v20  ;;  %4532 = vmatprep.subr.bf16.mxu0 %v5893_v26 }
0x12a8   :  { %4534 = vmatpush1.bf16.msra.mxu0 %v5897_v21 }
0x12a9   :  { %4536 = vmatprep.subr.bf16.mxu0 %v5901_v37 }
0x12ac   :  { %4538 = vmatpush1.bf16.msra.mxu0 %v5903_v51 }
0x12ad   :  { %4540 = vmatprep.subr.bf16.mxu0 %v5907_v1 }
0x12b0   :  { %4542 = vmatpush1.bf16.msra.mxu0 %v5909_v3 }
0x1376   :  { %v2260_v52 = vpop.f32.mrb[32].mxu0 }
0x1377   :  { %v2265_v24 = vadd.f32 %v2260_v52, %v5974_v2  ;;  %v2262_v25 = vpop.f32.mrb[33].mxu0 }
0x1378   :  { %v2266_v60 = vadd.f32 %v2262_v25, %v5972_v35 }
0x1379   :  { %v4184_v28 = vmul.f32 -1.442695, %v2265_v24 }
0x137a   :  { %v4185_v27 = vmul.f32 -1.442695, %v2266_v60 }
0x137b   :  { %4908 = vpow2.f32 %v4184_v28 }
0x137c   :  { %4910 = vpow2.f32 %v4185_v27 }
0x137d   :  { %4912 = vtanh.f32 %v2265_v24  ;;  %v2442_v24 = vld [vmem:[#allocation5 + $0x28] sm:$0xff] }
0x137e   :  { %4914 = vtanh.f32 %v2266_v60  ;;  %vm2443_vm10 = vcmp.gt.f32.partialorder %v2442_v24, 0.0 }
0x1385   :  { %v4909_v31 = vpop.eup %4908 }
0x1386   :  { %v4911_v22 = vpop.eup %4910  ;;  %v2275_v39 = vadd.f32 1.0, %v4909_v31 }
0x1387   :  { %v2276_v32 = vadd.f32 1.0, %v4911_v22  ;;  %v4913_v29 = vpop.eup %4912 }
0x1388   :  { %4916 = vrcp.f32 %v2275_v39  ;;  %v4915_v40 = vpop.eup %4914 }
0x1389   :  { %4918 = vrcp.f32 %v2276_v32 }
0x1392   :  { %v4917_v34 = vpop.eup %4916 }
0x1393   :  { %v4919_v47 = vpop.eup %4918  ;;  %v2281_v2 = vsel %vm5606_vm5, %v4913_v29, %v4917_v34 }
0x1394   :  { %2289 = vrot.lane.b32.xlu1 %v2281_v2, %s5301_s14  ;;  %v2282_v35 = vsel %vm5610_vm6, %v4915_v40, %v4919_v47 }
0x1395   :  { %2284 = vrot.lane.b32.xlu0 %v2282_v35, %s5300_s5 }
0x1398   :  { %2296 = vrot.lane.b32.xlu1 %v2282_v35, %s5301_s14 }
0x1399   :  { %2293 = vrot.lane.b32.xlu0 %v2281_v2, %s5299_s4 }
0x139c   :  { %2303 = vrot.lane.b32.xlu1 %v2282_v35, %s5299_s4 }
0x139d   :  { %2300 = vrot.lane.b32.xlu0 %v2281_v2, %s5300_s5 }
0x1406   :  { %v2290_v38 = vpop.permute.xlu1 %2289 }
0x1407   :  { %v2285_v36 = vpop.permute.xlu0 %2284  ;;  %v2292_v57 = vsel %vm213_vm0, %v2290_v38, %v2282_v35 }
0x1408   :  { %v2287_v53 = vsel %vm213_vm0, %v2281_v2, %v2285_v36  ;;  %v2307_v56 = vmul.f32 %v2292_v57, %v2183_v16 }
0x140a   :  { %v2297_v63 = vpop.permute.xlu1 %2296 }
0x140b   :  { %v2294_v4 = vpop.permute.xlu0 %2293 }
0x140c   :  { %v2299_v6 = vsel %vm213_vm0, %v2294_v4, %v2297_v63 }
0x140d   :  { %v2308_v58 = vmul.f32 %v2299_v6, %v2287_v53 }
0x140e   :  { %v2304_v15 = vpop.permute.xlu1 %2303 }
0x140f   :  { %v2309_v5 = vadd.f32 %v2308_v58, %v2307_v56  ;;  %v2301_v9 = vpop.permute.xlu0 %2300 }
0x1410   :  { %v2306_v11 = vsel %vm213_vm0, %v2301_v9, %v2304_v15 }
0x1411   :  { %4920 = vtanh.f32 %v2309_v5  ;;  %v2315_v46 = vsel %vm2313_vm7, %v2309_v5, %v2183_v16 }
0x141b   :  { %v4921_v10 = vpop.eup %4920 }
0x141c   :  { %v2311_v13 = vmul.f32 %v4921_v10, %v2306_v11 }
0x141e   :  { %v2316_v7 = vmul.f32 %v2312_v43, %v2311_v13  ;;  %v2314_v42 = vsel %vm2313_vm7, %v2311_v13, %v2182_v23 }
0x141f   :  { %4186 = vmatmul.mubr.msk.f32.vlgmr.msra.gmra.mrb[24].mxu1 %vm391_vm8, %v2314_v42 }
0x1420   :  { %2317 = vst.msk [vmem:[#allocation4 + $0x20] sm:$0xff] %vm213_vm0, %v2316_v7  ;;  %4546 = vmatpush1.bf16.msra.mxu1 %v5887_v17  ;;  %2648 = vmatprep.mubr.f32.mxu1 %v5298_v0 }
0x1421   :  { %2318 = vst.msk [vmem:[#allocation4 + $0x18] sm:$0xff] %vm520_vm9, %v2316_v7  ;;  %4548 = vmatprep.subr.bf16.mxu1 %v5893_v26 }
0x1424   :  { %4550 = vmatpush1.bf16.msra.mxu1 %v5897_v21 }
0x1425   :  { %4552 = vmatprep.subr.bf16.mxu1 %v5901_v37 }
0x1428   :  { %4554 = vmatpush1.bf16.msra.mxu1 %v5903_v51 }
0x1429   :  { %4556 = vmatprep.subr.bf16.mxu1 %v5907_v1 }
0x142c   :  { %4558 = vmatpush1.bf16.msra.mxu1 %v5909_v3 }
0x14f2   :  { %v2390_v62 = vpop.f32.mrb[24].mxu1 }
0x14f3   :  { %v2395_v59 = vadd.f32 %v2390_v62, %v5978_v55  ;;  %v2392_v41 = vpop.f32.mrb[25].mxu1 }
0x14f4   :  { %v2396_v17 = vadd.f32 %v2392_v41, %v5968_v44 }
0x14f5   :  { %v4187_v16 = vmul.f32 -1.442695, %v2395_v59 }
0x14f6   :  { %v4188_v49 = vmul.f32 -1.442695, %v2396_v17 }
0x14f7   :  { %4922 = vpow2.f32 %v4187_v16 }
0x14f8   :  { %4924 = vpow2.f32 %v4188_v49 }
0x14f9   :  { %4926 = vtanh.f32 %v2395_v59 }
0x14fa   :  { %4928 = vtanh.f32 %v2396_v17 }
0x1501   :  { %v4923_v26 = vpop.eup %4922 }
0x1502   :  { %v4925_v21 = vpop.eup %4924  ;;  %v2405_v37 = vadd.f32 1.0, %v4923_v26 }
0x1503   :  { %v2406_v51 = vadd.f32 1.0, %v4925_v21  ;;  %v4927_v1 = vpop.eup %4926 }
0x1504   :  { %4930 = vrcp.f32 %v2405_v37  ;;  %v4929_v3 = vpop.eup %4928 }
0x1505   :  { %4932 = vrcp.f32 %v2406_v51 }
0x150e   :  { %v4931_v30 = vpop.eup %4930 }
0x150f   :  { %v4933_v61 = vpop.eup %4932  ;;  %v2411_v55 = vsel %vm5606_vm5, %v4927_v1, %v4931_v30 }
0x1510   :  { %2419 = vrot.lane.b32.xlu1 %v2411_v55, %s5301_s14  ;;  %v2412_v44 = vsel %vm5610_vm6, %v4929_v3, %v4933_v61 }
0x1511   :  { %2414 = vrot.lane.b32.xlu0 %v2412_v44, %s5300_s5 }
0x1514   :  { %2426 = vrot.lane.b32.xlu1 %v2412_v44, %s5301_s14 }
0x1515   :  { %2423 = vrot.lane.b32.xlu0 %v2411_v55, %s5299_s4 }
0x1518   :  { %2433 = vrot.lane.b32.xlu1 %v2412_v44, %s5299_s4 }
0x1519   :  { %2430 = vrot.lane.b32.xlu0 %v2411_v55, %s5300_s5 }
0x1582   :  { %v2420_v18 = vpop.permute.xlu1 %2419 }
0x1583   :  { %v2415_v19 = vpop.permute.xlu0 %2414  ;;  %v2422_v20 = vsel %vm213_vm0, %v2420_v18, %v2412_v44 }
0x1584   :  { %v2417_v25 = vsel %vm213_vm0, %v2411_v55, %v2415_v19  ;;  %v2437_v28 = vmul.f32 %v2422_v20, %v2315_v46 }
0x1586   :  { %v2427_v23 = vpop.permute.xlu1 %2426 }
0x1587   :  { %v2424_v52 = vpop.permute.xlu0 %2423 }
0x1588   :  { %v2429_v60 = vsel %vm213_vm0, %v2424_v52, %v2427_v23 }
0x1589   :  { %v2438_v27 = vmul.f32 %v2429_v60, %v2417_v25 }
0x158a   :  { %v2434_v39 = vpop.permute.xlu1 %2433 }
0x158b   :  { %v2439_v31 = vadd.f32 %v2438_v27, %v2437_v28  ;;  %v2431_v32 = vpop.permute.xlu0 %2430 }
0x158c   :  { %v2436_v40 = vsel %vm213_vm0, %v2431_v32, %v2434_v39  ;;  %v2717_v39 = vld [vmem:[#allocation16 + $0x18] sm:$0xff] }
0x158d   :  { %4934 = vtanh.f32 %v2439_v31  ;;  %v2445_v22 = vsel %vm2443_vm10, %v2439_v31, %v2315_v46 }
0x1597   :  { %v4935_v29 = vpop.eup %4934 }
0x1598   :  { %v2441_v34 = vmul.f32 %v4935_v29, %v2436_v40  ;;  %v2714_v29 = vld [vmem:[#allocation16] sm:$0xff]  ;;  %v2716_v40 = vld [vmem:[#allocation16 + $0x10] sm:$0xff] }
0x159a   :  { %v2446_v47 = vmul.f32 %v2442_v24, %v2441_v34  ;;  %v2444_v2 = vsel %vm2443_vm10, %v2441_v34, %v2314_v42  ;;  %v2572_v42 = vld [vmem:[#allocation5 + $0x30] sm:$0xff]  ;;  %v4561_v34 = vpack.c.bf16 %v2716_v40, %v2714_v29 }
0x159b   :  { %4189 = vmatmul.mubr.msk.f32.vlgmr.msra.gmra.mrb[34].mxu0 %vm391_vm8, %v2444_v2  ;;  %vm2573_vm11 = vcmp.gt.f32.partialorder %v2572_v42, 0.0 }
0x159c   :  { %2447 = vst.msk [vmem:[#allocation4 + $0x28] sm:$0xff] %vm213_vm0, %v2446_v47  ;;  %2830 = vmatprep.mubr.f32.mxu0 %v5298_v0 }
0x159d   :  { %2448 = vst.msk [vmem:[#allocation4 + $0x10] sm:$0xff] %vm520_vm9, %v2446_v47  ;;  %v2896_v47 = vld [vmem:[%s6570_s9 + $0x8] sm:$0xff] }
0x166e   :  { %v2520_v35 = vpop.f32.mrb[34].mxu0 }
0x166f   :  { %v2525_v38 = vadd.f32 %v2520_v35, %v5982_v8  ;;  %v2522_v36 = vpop.f32.mrb[35].mxu0 }
0x1670   :  { %v2526_v57 = vadd.f32 %v2522_v36, %v5964_v48  ;;  %v2897_v36 = vld [vmem:[%s6570_s9 + $0x10] sm:$0xff] }
0x1671   :  { %v4190_v63 = vmul.f32 -1.442695, %v2525_v38 }
0x1672   :  { %v4191_v4 = vmul.f32 -1.442695, %v2526_v57 }
0x1673   :  { %4936 = vpow2.f32 %v4190_v63  ;;  %v2719_v63 = vld [vmem:[#allocation16 + $0x28] sm:$0xff] }
0x1674   :  { %4938 = vpow2.f32 %v4191_v4  ;;  %v2721_v4 = vld [vmem:[#allocation16 + $0x38] sm:$0xff] }
0x1675   :  { %4940 = vtanh.f32 %v2525_v38  ;;  %v2895_v38 = vld [vmem:[%s6570_s9] sm:$0xff] }
0x1676   :  { %4942 = vtanh.f32 %v2526_v57  ;;  %v6199_v57 = vpack.c.bf16 %v2897_v36, %v2895_v38  ;;  %v2708_v38 = vld [vmem:[#allocation4 + $0x10] sm:$0xff]  ;;  %v2709_v36 = vld [vmem:[#allocation4 + $0x18] sm:$0xff] }
0x167d   :  { %v4937_v43 = vpop.eup %4936 }
0x167e   :  { %v4939_v53 = vpop.eup %4938  ;;  %v2535_v6 = vadd.f32 1.0, %v4937_v43  ;;  %v4563_v43 = vpack.c.bf16 %v2721_v4, %v2719_v63  ;;  %v2710_v63 = vld [vmem:[#allocation4 + $0x20] sm:$0xff]  ;;  %v2711_v4 = vld [vmem:[#allocation4 + $0x28] sm:$0xff] }
0x167f   :  { %v2536_v56 = vadd.f32 1.0, %v4939_v53  ;;  %v4941_v58 = vpop.eup %4940  ;;  %v2718_v53 = vld [vmem:[#allocation16 + $0x20] sm:$0xff] }
0x1680   :  { %4944 = vrcp.f32 %v2535_v6  ;;  %v4943_v5 = vpop.eup %4942  ;;  %v2720_v6 = vld [vmem:[#allocation16 + $0x30] sm:$0xff] }
0x1681   :  { %4946 = vrcp.f32 %v2536_v56  ;;  %v4565_v56 = vpack.c.bf16 %v2720_v6, %v2718_v53 }
0x168a   :  { %v4945_v46 = vpop.eup %4944 }
0x168b   :  { %v4947_v15 = vpop.eup %4946  ;;  %v2541_v8 = vsel %vm5606_vm5, %v4941_v58, %v4945_v46  ;;  %v2900_v58 = vld [vmem:[%s6570_s9 + $0x28] sm:$0xff] }
0x168c   :  { %2549 = vrot.lane.b32.xlu1 %v2541_v8, %s5301_s14  ;;  %v2542_v48 = vsel %vm5610_vm6, %v4943_v5, %v4947_v15  ;;  %v2902_v5 = vld [vmem:[%s6570_s9 + $0x38] sm:$0xff]  ;;  %v2899_v15 = vld [vmem:[%s6570_s9 + $0x20] sm:$0xff] }
0x168d   :  { %2544 = vrot.lane.b32.xlu0 %v2542_v48, %s5300_s5  ;;  %v6211_v46 = vpack.c.bf16 %v2902_v5, %v2900_v58  ;;  %v2730_v58 = vld [vmem:[%s6571_s10] sm:$0x3] }
0x168e   :  { %v2735_v5 = vrot.slane %v2730_v58, %v5585_v50 }
0x1690   :  { %2556 = vrot.lane.b32.xlu1 %v2542_v48, %s5301_s14 }
0x1691   :  { %2553 = vrot.lane.b32.xlu0 %v2541_v8, %s5299_s4 }
0x1694   :  { %2563 = vrot.lane.b32.xlu1 %v2542_v48, %s5299_s4 }
0x1695   :  { %2560 = vrot.lane.b32.xlu0 %v2541_v8, %s5300_s5 }
0x16fe   :  { %v2550_v9 = vpop.permute.xlu1 %2549 }
0x16ff   :  { %v2545_v10 = vpop.permute.xlu0 %2544  ;;  %v2552_v11 = vsel %vm213_vm0, %v2550_v9, %v2542_v48  ;;  %v2723_v9 = vld [vmem:[#allocation16 + $0x48] sm:$0xff] }
0x1700   :  { %v2547_v62 = vsel %vm213_vm0, %v2541_v8, %v2545_v10  ;;  %v2567_v41 = vmul.f32 %v2552_v11, %v2445_v22  ;;  %v2901_v8 = vld [vmem:[%s6570_s9 + $0x30] sm:$0xff]  ;;  %v2725_v10 = vld [vmem:[#allocation16 + $0x58] sm:$0xff] }
0x1701   :  { %v6221_v48 = vpack.c.bf16 %v2901_v8, %v2899_v15  ;;  %v4567_v11 = vpack.c.bf16 %v2725_v10, %v2723_v9  ;;  %v2739_v15 = vrot.slane %v2730_v58, %v5594_v54 }
0x1702   :  { %v2557_v13 = vpop.permute.xlu1 %2556 }
0x1703   :  { %v2554_v7 = vpop.permute.xlu0 %2553 }
0x1704   :  { %v2559_v59 = vsel %vm213_vm0, %v2554_v7, %v2557_v13  ;;  %v2722_v13 = vld [vmem:[#allocation16 + $0x40] sm:$0xff]  ;;  %v2724_v7 = vld [vmem:[#allocation16 + $0x50] sm:$0xff] }
0x1705   :  { %v2568_v17 = vmul.f32 %v2559_v59, %v2547_v62  ;;  %v2904_v62 = vld [vmem:[%s6570_s9 + $0x48] sm:$0xff]  ;;  %v2906_v59 = vld [vmem:[%s6570_s9 + $0x58] sm:$0xff] }
0x1706   :  { %v2564_v26 = vpop.permute.xlu1 %2563 }
0x1707   :  { %v2569_v16 = vadd.f32 %v2568_v17, %v2567_v41  ;;  %v2561_v21 = vpop.permute.xlu0 %2560  ;;  %v6231_v41 = vpack.c.bf16 %v2906_v59, %v2904_v62  ;;  %v2903_v17 = vld [vmem:[%s6570_s9 + $0x40] sm:$0xff] }
0x1708   :  { %v2566_v51 = vsel %vm213_vm0, %v2561_v21, %v2564_v26  ;;  %v2727_v26 = vld [vmem:[#allocation16 + $0x68] sm:$0xff] }
0x1709   :  { %4948 = vtanh.f32 %v2569_v16  ;;  %v6160_v49 = vsel %vm2573_vm11, %v2569_v16, %v2445_v22  ;;  %v2715_v22 = vld [vmem:[#allocation16 + $0x8] sm:$0xff] }
0x170a   :  { %v4559_v32 = vpack.c.bf16 %v2717_v39, %v2715_v22  ;;  %v2905_v16 = vld [vmem:[%s6570_s9 + $0x50] sm:$0xff] }
0x170b   :  { %v6239_v21 = vpack.c.bf16 %v2905_v16, %v2903_v17 }
0x170c   :  { %4560 = vmatprep.subr.bf16.mxu0 %v4559_v32 }
0x170d   :  { %4562 = vmatpush1.bf16.msra.mxu0 %v4561_v34  ;;  %v2702_v34 = vld [vmem:[#allocation5 + $0x38] sm:$0xff] }
0x170e   :  { %4564 = vmatprep.subr.bf16.mxu0 %v4563_v43 }
0x1711   :  { %4566 = vmatpush1.bf16.msra.mxu0 %v4565_v56 }
0x1712   :  { %4568 = vmatprep.subr.bf16.mxu0 %v4567_v11 }
0x1713   :  { %v4949_v37 = vpop.eup %4948 }
0x1714   :  { %v2571_v1 = vmul.f32 %v4949_v37, %v2566_v51  ;;  %v2729_v37 = vld [vmem:[#allocation16 + $0x78] sm:$0xff]  ;;  %v2726_v51 = vld [vmem:[#allocation16 + $0x60] sm:$0xff] }
0x1716   :  { %v2576_v3 = vmul.f32 %v2572_v42, %v2571_v1  ;;  %v2574_v30 = vsel %vm2573_vm11, %v2571_v1, %v2444_v2  ;;  %v2898_v2 = vld [vmem:[%s6570_s9 + $0x18] sm:$0xff]  ;;  %v4569_v42 = vpack.c.bf16 %v2724_v7, %v2722_v13 }
0x1717   :  { %4192 = vmatmul.mubr.msk.f32.vlgmr.msra.gmra.mrb[26].mxu1 %vm391_vm8, %v2574_v30  ;;  %v6189_v35 = vpack.c.bf16 %v2898_v2, %v2896_v47  ;;  %v2728_v1 = vld [vmem:[#allocation16 + $0x70] sm:$0xff] }
0x1718   :  { %2577 = vst.msk [vmem:[#allocation4 + $0x30] sm:$0xff] %vm213_vm0, %v2576_v3  ;;  %2977 = vmatprep.mubr.f32.mxu1 %v5298_v0  ;;  %4570 = vmatpush1.bf16.msra.mxu0 %v4569_v42  ;;  %v4573_v30 = vpack.c.bf16 %v2728_v1, %v2726_v51 }
0x1719   :  { %2578 = vst.msk [vmem:[#allocation4 + $0x8] sm:$0xff] %vm520_vm9, %v2576_v3  ;;  %4576 = vmatprep.subr.bf16.mxu1 %v6189_v35  ;;  %v4571_v3 = vpack.c.bf16 %v2729_v37, %v2727_v26 }
0x171a   :  { %4578 = vmatpush1.bf16.msra.mxu1 %v6199_v57 }
0x171b   :  { %4580 = vmatprep.subr.bf16.mxu1 %v6211_v46  ;;  %4572 = vmatprep.subr.bf16.mxu0 %v4571_v3 }
0x171c   :  { %4574 = vmatpush1.bf16.msra.mxu0 %v4573_v30 }
0x171d   :  { %4608 = vmatprep.subr.bf16.mxu0 %v6189_v35 }
0x171e   :  { %4582 = vmatpush1.bf16.msra.mxu1 %v6221_v48 }
0x171f   :  { %4584 = vmatprep.subr.bf16.mxu1 %v6231_v41  ;;  %v2712_v43 = vld [vmem:[#allocation4 + $0x30] sm:$0xff] }
0x1722   :  { %4586 = vmatpush1.bf16.msra.mxu1 %v6239_v21 }
0x17ea   :  { %v2650_v61 = vpop.f32.mrb[26].mxu1 }
0x17eb   :  { %v2655_v55 = vadd.f32 %v2650_v61, %v5984_v45  ;;  %v2652_v44 = vpop.f32.mrb[27].mxu1  ;;  %v2908_v61 = vld [vmem:[%s6570_s9 + $0x68] sm:$0xff] }
0x17ec   :  { %v2656_v18 = vadd.f32 %v2652_v44, %v5960_v33  ;;  %v2907_v44 = vld [vmem:[%s6570_s9 + $0x60] sm:$0xff] }
0x17ed   :  { %v4193_v19 = vmul.f32 -1.442695, %v2655_v55 }
0x17ee   :  { %v4194_v20 = vmul.f32 -1.442695, %v2656_v18 }
0x17ef   :  { %4950 = vpow2.f32 %v4193_v19  ;;  %v2909_v19 = vld [vmem:[%s6570_s9 + $0x70] sm:$0xff] }
0x17f0   :  { %4952 = vpow2.f32 %v4194_v20  ;;  %v6257_v20 = vpack.c.bf16 %v2909_v19, %v2907_v44 }
0x17f1   :  { %4954 = vtanh.f32 %v2655_v55  ;;  %v2910_v55 = vld [vmem:[%s6570_s9 + $0x78] sm:$0xff] }
0x17f2   :  { %4956 = vtanh.f32 %v2656_v18  ;;  %v6252_v18 = vpack.c.bf16 %v2910_v55, %v2908_v61 }
0x17f4   :  { %4588 = vmatprep.subr.bf16.mxu1 %v6252_v18 }
0x17f5   :  { %4590 = vmatpush1.bf16.msra.mxu1 %v6257_v20 }
0x17f6   :  { %4592 = vmatprep.subr.bf16.mxu1 %v6189_v35 }
0x17f8   :  { %2978 = vmatmul.mubr.f32.vlgmr.msra.gmra.mrb[28].mxu1 %v5298_v0 }
0x17f9   :  { %v4951_v23 = vpop.eup %4950  ;;  %4594 = vmatpush1.bf16.msra.mxu1 %v6199_v57  ;;  %3107 = vmatprep.mubr.f32.mxu1 %v5298_v0 }
0x17fa   :  { %v4953_v52 = vpop.eup %4952  ;;  %v2665_v24 = vadd.f32 1.0, %v4951_v23  ;;  %4596 = vmatprep.subr.bf16.mxu1 %v6211_v46 }
0x17fb   :  { %v2666_v25 = vadd.f32 1.0, %v4953_v52  ;;  %v4955_v60 = vpop.eup %4954 }
0x17fc   :  { %4958 = vrcp.f32 %v2665_v24  ;;  %v4957_v28 = vpop.eup %4956 }
0x17fd   :  { %4960 = vrcp.f32 %v2666_v25  ;;  %4598 = vmatpush1.bf16.msra.mxu1 %v6221_v48 }
0x17fe   :  { %4600 = vmatprep.subr.bf16.mxu1 %v6231_v41 }
0x1801   :  { %4602 = vmatpush1.bf16.msra.mxu1 %v6239_v21 }
0x1802   :  { %4604 = vmatprep.subr.bf16.mxu1 %v6252_v18 }
0x1805   :  { %4606 = vmatpush1.bf16.msra.mxu1 %v6257_v20 }
0x1806   :  { %v4959_v27 = vpop.eup %4958  ;;  %4624 = vmatprep.subr.bf16.mxu1 %v6189_v35 }
0x1807   :  { %v4961_v31 = vpop.eup %4960  ;;  %v6171_v45 = vsel %vm5606_vm5, %v4955_v60, %v4959_v27 }
0x1808   :  { %2679 = vrot.lane.b32.xlu1 %v6171_v45, %s5301_s14  ;;  %v6177_v33 = vsel %vm5610_vm6, %v4957_v28, %v4961_v31 }
0x1809   :  { %2674 = vrot.lane.b32.xlu0 %v6177_v33, %s5300_s5 }
0x180c   :  { %2686 = vrot.lane.b32.xlu1 %v6177_v33, %s5301_s14 }
0x180d   :  { %2683 = vrot.lane.b32.xlu0 %v6171_v45, %s5299_s4 }
0x1810   :  { %2693 = vrot.lane.b32.xlu1 %v6177_v33, %s5299_s4 }
0x1811   :  { %2690 = vrot.lane.b32.xlu0 %v6171_v45, %s5300_s5 }
0x187a   :  { %v2680_v23 = vpop.permute.xlu1 %2679 }
0x187b   :  { %v2675_v52 = vpop.permute.xlu0 %2674  ;;  %v2682_v24 = vsel %vm213_vm0, %v2680_v23, %v6177_v33 }
0x187c   :  { %v2677_v28 = vsel %vm213_vm0, %v6171_v45, %v2675_v52  ;;  %v2697_v31 = vmul.f32 %v2682_v24, %v6160_v49  ;;  %v2707_v49 = vld [vmem:[#allocation4 + $0x8] sm:$0xff] }
0x187e   :  { %v2687_v25 = vpop.permute.xlu1 %2686 }
0x187f   :  { %v2684_v60 = vpop.permute.xlu0 %2683 }
0x1880   :  { %v2689_v27 = vsel %vm213_vm0, %v2684_v60, %v2687_v25 }
0x1881   :  { %v2698_v22 = vmul.f32 %v2689_v27, %v2677_v28 }
0x1882   :  { %v2694_v32 = vpop.permute.xlu1 %2693 }
0x1883   :  { %v2699_v39 = vadd.f32 %v2698_v22, %v2697_v31  ;;  %v2691_v29 = vpop.permute.xlu0 %2690 }
0x1884   :  { %v2696_v47 = vsel %vm213_vm0, %v2691_v29, %v2694_v32 }
0x1885   :  { %4962 = vtanh.f32 %v2699_v39 }
0x188f   :  { %v4963_v40 = vpop.eup %4962 }
0x1890   :  { %v2701_v2 = vmul.f32 %v4963_v40, %v2696_v47 }
0x1892   :  { %v2703_v33 = vmul.f32 %v2702_v34, %v2701_v2 }
0x1894   :  { %2704 = vst.msk [vmem:[#allocation4 + $0x38] sm:$0xff] %vm213_vm0, %v2703_v33 }
0x1895   :  { %2705 = vst.msk [vmem:[#allocation4] sm:$0xff] %vm520_vm9, %v2703_v33 }
0x189b   :  { %v2713_v53 = vld [vmem:[#allocation4 + $0x38] sm:$0xff] }
0x189c   :  { %v2706_v45 = vld [vmem:[#allocation4] sm:$0xff] }
0x189d   :  { %4195 = vmatmul.mubr.msk.f32.vlgmr.msra.gmra.mrb[36].mxu0 %vm391_vm8, %v2706_v45 }
0x189e   :  { %2836 = vmatprep.mubr.f32.mxu0 %v5298_v0  ;;  %4610 = vmatpush1.bf16.msra.mxu0 %v6199_v57 }
0x189f   :  { %4612 = vmatprep.subr.bf16.mxu0 %v6211_v46 }
0x18a1   :  { %4196 = vmatmul.mubr.msk.f32.gmra.mrb[38].mxu0 %vm391_vm8, %v2707_v49 }
0x18a2   :  { %2842 = vmatprep.mubr.f32.mxu0 %v5298_v0  ;;  %4614 = vmatpush1.bf16.msra.mxu0 %v6221_v48 }
0x18a3   :  { %4616 = vmatprep.subr.bf16.mxu0 %v6231_v41 }
0x18a5   :  { %4197 = vmatmul.mubr.msk.f32.gmra.mrb[40].mxu0 %vm391_vm8, %v2708_v38 }
0x18a6   :  { %2848 = vmatprep.mubr.f32.mxu0 %v5298_v0  ;;  %4618 = vmatpush1.bf16.msra.mxu0 %v6239_v21 }
0x18a7   :  { %4620 = vmatprep.subr.bf16.mxu0 %v6252_v18 }
0x18a9   :  { %4198 = vmatmul.mubr.msk.f32.gmra.mrb[42].mxu0 %vm391_vm8, %v2709_v36 }
0x18aa   :  { %2854 = vmatprep.mubr.f32.mxu0 %v5298_v0  ;;  %4622 = vmatpush1.bf16.msra.mxu0 %v6257_v20 }
0x18ab   :  { %4640 = vmatprep.subr.bf16.mxu0 %v6189_v35 }
0x18ad   :  { %4199 = vmatmul.mubr.msk.f32.gmra.mrb[44].mxu0 %vm391_vm8, %v2710_v63 }
0x18ae   :  { %2860 = vmatprep.mubr.f32.mxu0 %v5298_v0 }
0x18b1   :  { %4200 = vmatmul.mubr.msk.f32.gmra.mrb[46].mxu0 %vm391_vm8, %v2711_v4 }
0x18b2   :  { %2866 = vmatprep.mubr.f32.mxu0 %v5298_v0 }
0x18b5   :  { %4201 = vmatmul.mubr.msk.f32.gmra.mrb[48].mxu0 %vm391_vm8, %v2712_v43 }
0x18b6   :  { %2872 = vmatprep.mubr.f32.mxu0 %v5298_v0 }
0x18b9   :  { %4202 = vmatmul.mubr.msk.f32.gmra.mrb[50].mxu0 %vm391_vm8, %v2713_v53 }
0x18ba   :  { %3237 = vmatprep.mubr.f32.mxu0 %v5298_v0 }
0x18cb   :  { %v2979_v6 = vpop.f32.mrb[28].mxu1 }
0x18cc   :  { %v2981_v56 = vpop.f32.mrb[29].mxu1 }
0x1970   :  { %v2832_v8 = vpop.f32.mrb[36].mxu0 }
0x1971   :  { %v2833_v9 = vadd.f32 %v2832_v8, %v2735_v5  ;;  %v2834_v10 = vpop.f32.mrb[37].mxu0 }
0x1972   :  { %v6311_v11 = vadd.f32 %v2834_v10, %v2739_v15 }
0x1973   :  { %v2984_v13 = vadd.f32 %v2979_v6, %v2833_v9 }
0x1974   :  { %v2838_v7 = vpop.f32.mrb[38].mxu0 }
0x1975   :  { %v4203_v42 = vmul.f32 -1.442695, %v2984_v13  ;;  %v6313_v62 = vadd.f32 %v2838_v7, %v2735_v5  ;;  %v2840_v59 = vpop.f32.mrb[39].mxu0 }
0x1976   :  { %v6315_v17 = vadd.f32 %v2840_v59, %v2739_v15 }
0x1977   :  { %4964 = vpow2.f32 %v4203_v42 }
0x1978   :  { %v2844_v16 = vpop.f32.mrb[40].mxu0  ;;  %4966 = vtanh.f32 %v2984_v13 }
0x1979   :  { %v6317_v26 = vadd.f32 %v2844_v16, %v2735_v5  ;;  %v2846_v50 = vpop.f32.mrb[41].mxu0 }
0x197a   :  { %v6319_v37 = vadd.f32 %v2846_v50, %v2739_v15 }
0x197c   :  { %v2850_v54 = vpop.f32.mrb[42].mxu0 }
0x197d   :  { %v6321_v51 = vadd.f32 %v2850_v54, %v2735_v5  ;;  %v2852_v1 = vpop.f32.mrb[43].mxu0 }
0x197e   :  { %v6323_v3 = vadd.f32 %v2852_v1, %v2739_v15 }
0x1980   :  { %v2856_v30 = vpop.f32.mrb[44].mxu0 }
0x1981   :  { %v4965_v61 = vpop.eup %4964  ;;  %v6325_v55 = vadd.f32 %v2856_v30, %v2735_v5  ;;  %v2858_v44 = vpop.f32.mrb[45].mxu0 }
0x1982   :  { %v2994_v19 = vadd.f32 1.0, %v4965_v61  ;;  %v6327_v23 = vadd.f32 %v2858_v44, %v2739_v15  ;;  %v4967_v32 = vpop.eup %4966 }
0x1984   :  { %4968 = vrcp.f32 %v2994_v19  ;;  %v2862_v52 = vpop.f32.mrb[46].mxu0 }
0x1985   :  { %v6329_v24 = vadd.f32 %v2862_v52, %v2735_v5  ;;  %v2864_v25 = vpop.f32.mrb[47].mxu0 }
0x1986   :  { %v6331_v60 = vadd.f32 %v2864_v25, %v2739_v15 }
0x1988   :  { %v2868_v28 = vpop.f32.mrb[48].mxu0 }
0x1989   :  { %v6333_v27 = vadd.f32 %v2868_v28, %v2735_v5  ;;  %v2870_v31 = vpop.f32.mrb[49].mxu0 }
0x198a   :  { %v2871_v22 = vadd.f32 %v2870_v31, %v2739_v15 }
0x198c   :  { %v2874_v39 = vpop.f32.mrb[50].mxu0 }
0x198d   :  { %v6335_v29 = vadd.f32 %v2874_v39, %v2735_v5  ;;  %v2876_v40 = vpop.f32.mrb[51].mxu0  ;;  %v3031_v5 = vld [vmem:[#allocation5] sm:$0xff] }
0x198e   :  { %v4969_v34 = vpop.eup %4968  ;;  %v2877_v47 = vadd.f32 %v2876_v40, %v2739_v15  ;;  %vm3032_vm12 = vcmp.gt.f32.partialorder %v3031_v5, 0.0 }
0x198f   :  { %v3000_v2 = vsel %vm5606_vm5, %v4967_v32, %v4969_v34 }
0x1990   :  { %v2985_v33 = vadd.f32 %v2981_v56, %v2877_v47  ;;  %3008 = vrot.lane.b32.xlu1 %v3000_v2, %s5301_s14 }
0x1992   :  { %v4204_v45 = vmul.f32 -1.442695, %v2985_v33 }
0x1994   :  { %4970 = vpow2.f32 %v4204_v45 }
0x1995   :  { %4972 = vtanh.f32 %v2985_v33 }
0x199e   :  { %v4971_v49 = vpop.eup %4970 }
0x199f   :  { %v2995_v38 = vadd.f32 1.0, %v4971_v49  ;;  %v4973_v36 = vpop.eup %4972 }
0x19a1   :  { %4974 = vrcp.f32 %v2995_v38 }
0x19ab   :  { %v4975_v63 = vpop.eup %4974 }
0x19ac   :  { %v3001_v4 = vsel %vm5610_vm6, %v4973_v36, %v4975_v63 }
0x19ad   :  { %3015 = vrot.lane.b32.xlu1 %v3001_v4, %s5301_s14  ;;  %3003 = vrot.lane.b32.xlu0 %v3001_v4, %s5300_s5 }
0x19b1   :  { %3022 = vrot.lane.b32.xlu1 %v3001_v4, %s5299_s4  ;;  %3012 = vrot.lane.b32.xlu0 %v3000_v2, %s5299_s4 }
0x19b5   :  { %3019 = vrot.lane.b32.xlu0 %v3000_v2, %s5300_s5 }
0x1a02   :  { %v3009_v43 = vpop.permute.xlu1 %3008 }
0x1a03   :  { %v3011_v6 = vsel %vm213_vm0, %v3009_v43, %v3001_v4  ;;  %v3161_v4 = vld [vmem:[#allocation5 + $0x8] sm:$0xff] }
0x1a04   :  { %v3026_v9 = vmul.f32 0.0, %v3011_v6  ;;  %vm3162_vm13 = vcmp.gt.f32.partialorder %v3161_v4, 0.0 }
0x1a1f   :  { %v3004_v53 = vpop.permute.xlu0 %3003  ;;  %v3016_v56 = vpop.permute.xlu1 %3015 }
0x1a20   :  { %v3006_v15 = vsel %vm213_vm0, %v3000_v2, %v3004_v53 }
0x1a23   :  { %v3013_v58 = vpop.permute.xlu0 %3012  ;;  %v3023_v59 = vpop.permute.xlu1 %3022 }
0x1a24   :  { %v3018_v8 = vsel %vm213_vm0, %v3013_v58, %v3016_v56 }
0x1a25   :  { %v3027_v10 = vmul.f32 %v3018_v8, %v3006_v15 }
0x1a27   :  { %v3028_v13 = vadd.f32 %v3027_v10, %v3026_v9  ;;  %v3020_v42 = vpop.permute.xlu0 %3019 }
0x1a28   :  { %v3025_v50 = vsel %vm213_vm0, %v3020_v42, %v3023_v59 }
0x1a29   :  { %4976 = vtanh.f32 %v3028_v13  ;;  %v3034_v7 = vsel %vm3032_vm12, %v3028_v13, 0.0 }
0x1a33   :  { %v4977_v16 = vpop.eup %4976 }
0x1a34   :  { %v3030_v54 = vmul.f32 %v4977_v16, %v3025_v50 }
0x1a36   :  { %v3033_v1 = vsel %vm3032_vm12, %v3030_v54, 0.0  ;;  %v3035_v30 = vmul.f32 %v3031_v5, %v3030_v54 }
0x1a37   :  { %4205 = vmatmul.mubr.msk.f32.vlgmr.msra.gmra.mrb[30].mxu1 %vm391_vm8, %v3033_v1 }
0x1a38   :  { %3036 = vst.msk [vmem:[#allocation3] sm:$0xff] %vm213_vm0, %v3035_v30  ;;  %4626 = vmatpush1.bf16.msra.mxu1 %v6199_v57  ;;  %3367 = vmatprep.mubr.f32.mxu1 %v5298_v0 }
0x1a39   :  { %3037 = vst.msk [vmem:[#allocation3 + $0x38] sm:$0xff] %vm520_vm9, %v3035_v30  ;;  %4628 = vmatprep.subr.bf16.mxu1 %v6211_v46 }
0x1a3c   :  { %4630 = vmatpush1.bf16.msra.mxu1 %v6221_v48 }
0x1a3d   :  { %4632 = vmatprep.subr.bf16.mxu1 %v6231_v41 }
0x1a40   :  { %4634 = vmatpush1.bf16.msra.mxu1 %v6239_v21 }
0x1a41   :  { %4636 = vmatprep.subr.bf16.mxu1 %v6252_v18 }
0x1a44   :  { %4638 = vmatpush1.bf16.msra.mxu1 %v6257_v20 }
0x1a45   :  { %4656 = vmatprep.subr.bf16.mxu1 %v6189_v35 }
0x1b0a   :  { %v3109_v61 = vpop.f32.mrb[30].mxu1 }
0x1b0b   :  { %v3114_v44 = vadd.f32 %v3109_v61, %v6313_v62  ;;  %v3111_v19 = vpop.f32.mrb[31].mxu1 }
0x1b0c   :  { %v3115_v52 = vadd.f32 %v3111_v19, %v2871_v22 }
0x1b0d   :  { %v4206_v25 = vmul.f32 -1.442695, %v3114_v44 }
0x1b0e   :  { %v4207_v28 = vmul.f32 -1.442695, %v3115_v52 }
0x1b0f   :  { %4978 = vpow2.f32 %v4206_v25 }
0x1b10   :  { %4980 = vpow2.f32 %v4207_v28 }
0x1b11   :  { %4982 = vtanh.f32 %v3114_v44 }
0x1b12   :  { %4984 = vtanh.f32 %v3115_v52 }
0x1b19   :  { %v4979_v31 = vpop.eup %4978 }
0x1b1a   :  { %v4981_v39 = vpop.eup %4980  ;;  %v3124_v32 = vadd.f32 1.0, %v4979_v31 }
0x1b1b   :  { %v3125_v40 = vadd.f32 1.0, %v4981_v39  ;;  %v4983_v34 = vpop.eup %4982 }
0x1b1c   :  { %4986 = vrcp.f32 %v3124_v32  ;;  %v4985_v47 = vpop.eup %4984 }
0x1b1d   :  { %4988 = vrcp.f32 %v3125_v40 }
0x1b26   :  { %v4987_v2 = vpop.eup %4986 }
0x1b27   :  { %v4989_v33 = vpop.eup %4988  ;;  %v3130_v62 = vsel %vm5606_vm5, %v4983_v34, %v4987_v2 }
0x1b28   :  { %3138 = vrot.lane.b32.xlu1 %v3130_v62, %s5301_s14  ;;  %v3131_v22 = vsel %vm5610_vm6, %v4985_v47, %v4989_v33  ;;  %v3291_v33 = vld [vmem:[#allocation5 + $0x10] sm:$0xff] }
0x1b29   :  { %3133 = vrot.lane.b32.xlu0 %v3131_v22, %s5300_s5  ;;  %vm3292_vm14 = vcmp.gt.f32.partialorder %v3291_v33, 0.0 }
0x1b2c   :  { %3145 = vrot.lane.b32.xlu1 %v3131_v22, %s5301_s14 }
0x1b2d   :  { %3142 = vrot.lane.b32.xlu0 %v3130_v62, %s5299_s4 }
0x1b30   :  { %3152 = vrot.lane.b32.xlu1 %v3131_v22, %s5299_s4 }
0x1b31   :  { %3149 = vrot.lane.b32.xlu0 %v3130_v62, %s5300_s5 }
0x1b9a   :  { %v3139_v45 = vpop.permute.xlu1 %3138 }
0x1b9b   :  { %v3134_v49 = vpop.permute.xlu0 %3133  ;;  %v3141_v38 = vsel %vm213_vm0, %v3139_v45, %v3131_v22 }
0x1b9c   :  { %v3136_v43 = vsel %vm213_vm0, %v3130_v62, %v3134_v49  ;;  %v3156_v6 = vmul.f32 %v3141_v38, %v3034_v7 }
0x1b9e   :  { %v3146_v36 = vpop.permute.xlu1 %3145 }
0x1b9f   :  { %v3143_v63 = vpop.permute.xlu0 %3142 }
0x1ba0   :  { %v3148_v53 = vsel %vm213_vm0, %v3143_v63, %v3146_v36 }
0x1ba1   :  { %v3157_v56 = vmul.f32 %v3148_v53, %v3136_v43 }
0x1ba2   :  { %v3153_v15 = vpop.permute.xlu1 %3152 }
0x1ba3   :  { %v3158_v58 = vadd.f32 %v3157_v56, %v3156_v6  ;;  %v3150_v8 = vpop.permute.xlu0 %3149 }
0x1ba4   :  { %v3155_v10 = vsel %vm213_vm0, %v3150_v8, %v3153_v15 }
0x1ba5   :  { %4990 = vtanh.f32 %v3158_v58  ;;  %v3164_v5 = vsel %vm3162_vm13, %v3158_v58, %v3034_v7 }
0x1baf   :  { %v4991_v9 = vpop.eup %4990 }
0x1bb0   :  { %v3160_v13 = vmul.f32 %v4991_v9, %v3155_v10 }
0x1bb2   :  { %v6378_v42 = vsel %vm3162_vm13, %v3160_v13, %v3033_v1  ;;  %v3165_v59 = vmul.f32 %v3161_v4, %v3160_v13 }
0x1bb3   :  { %4208 = vmatmul.mubr.msk.f32.vlgmr.msra.gmra.mrb[52].mxu0 %vm391_vm8, %v6378_v42 }
0x1bb4   :  { %3166 = vst.msk [vmem:[#allocation3 + $0x8] sm:$0xff] %vm213_vm0, %v3165_v59  ;;  %4642 = vmatpush1.bf16.msra.mxu0 %v6199_v57  ;;  %3497 = vmatprep.mubr.f32.mxu0 %v5298_v0 }
0x1bb5   :  { %3167 = vst.msk [vmem:[#allocation3 + $0x30] sm:$0xff] %vm520_vm9, %v3165_v59  ;;  %4644 = vmatprep.subr.bf16.mxu0 %v6211_v46 }
0x1bb8   :  { %4646 = vmatpush1.bf16.msra.mxu0 %v6221_v48 }
0x1bb9   :  { %4648 = vmatprep.subr.bf16.mxu0 %v6231_v41 }
0x1bbc   :  { %4650 = vmatpush1.bf16.msra.mxu0 %v6239_v21 }
0x1bbd   :  { %4652 = vmatprep.subr.bf16.mxu0 %v6252_v18 }
0x1bc0   :  { %4654 = vmatpush1.bf16.msra.mxu0 %v6257_v20 }
0x1bc1   :  { %4672 = vmatprep.subr.bf16.mxu0 %v6189_v35 }
0x1c86   :  { %v3239_v7 = vpop.f32.mrb[52].mxu0 }
0x1c87   :  { %v3244_v16 = vadd.f32 %v3239_v7, %v6317_v26  ;;  %v3241_v50 = vpop.f32.mrb[53].mxu0 }
0x1c88   :  { %v3245_v54 = vadd.f32 %v3241_v50, %v6331_v60 }
0x1c89   :  { %v4209_v1 = vmul.f32 -1.442695, %v3244_v16 }
0x1c8a   :  { %v4210_v30 = vmul.f32 -1.442695, %v3245_v54 }
0x1c8b   :  { %4992 = vpow2.f32 %v4209_v1 }
0x1c8c   :  { %4994 = vpow2.f32 %v4210_v30 }
0x1c8d   :  { %4996 = vtanh.f32 %v3244_v16 }
0x1c8e   :  { %4998 = vtanh.f32 %v3245_v54 }
0x1c95   :  { %v4993_v61 = vpop.eup %4992 }
0x1c96   :  { %v4995_v44 = vpop.eup %4994  ;;  %v3254_v19 = vadd.f32 1.0, %v4993_v61 }
0x1c97   :  { %v3255_v52 = vadd.f32 1.0, %v4995_v44  ;;  %v4997_v25 = vpop.eup %4996 }
0x1c98   :  { %5000 = vrcp.f32 %v3254_v19  ;;  %v4999_v28 = vpop.eup %4998 }
0x1c99   :  { %5002 = vrcp.f32 %v3255_v52 }
0x1ca2   :  { %v5001_v31 = vpop.eup %5000 }
0x1ca3   :  { %v5003_v39 = vpop.eup %5002  ;;  %v3260_v26 = vsel %vm5606_vm5, %v4997_v25, %v5001_v31  ;;  %v3421_v25 = vld [vmem:[#allocation5 + $0x18] sm:$0xff] }
0x1ca4   :  { %3268 = vrot.lane.b32.xlu1 %v3260_v26, %s5301_s14  ;;  %v3261_v60 = vsel %vm5610_vm6, %v4999_v28, %v5003_v39  ;;  %vm3422_vm15 = vcmp.gt.f32.partialorder %v3421_v25, 0.0 }
0x1ca5   :  { %3263 = vrot.lane.b32.xlu0 %v3261_v60, %s5300_s5 }
0x1ca8   :  { %3275 = vrot.lane.b32.xlu1 %v3261_v60, %s5301_s14 }
0x1ca9   :  { %3272 = vrot.lane.b32.xlu0 %v3260_v26, %s5299_s4 }
0x1cac   :  { %3282 = vrot.lane.b32.xlu1 %v3261_v60, %s5299_s4 }
0x1cad   :  { %3279 = vrot.lane.b32.xlu0 %v3260_v26, %s5300_s5 }
0x1d16   :  { %v3269_v32 = vpop.permute.xlu1 %3268 }
0x1d17   :  { %v3264_v40 = vpop.permute.xlu0 %3263  ;;  %v3271_v34 = vsel %vm213_vm0, %v3269_v32, %v3261_v60 }
0x1d18   :  { %v3266_v62 = vsel %vm213_vm0, %v3260_v26, %v3264_v40  ;;  %v3286_v45 = vmul.f32 %v3271_v34, %v3164_v5 }
0x1d1a   :  { %v3276_v47 = vpop.permute.xlu1 %3275 }
0x1d1b   :  { %v3273_v2 = vpop.permute.xlu0 %3272 }
0x1d1c   :  { %v3278_v22 = vsel %vm213_vm0, %v3273_v2, %v3276_v47 }
0x1d1d   :  { %v3287_v49 = vmul.f32 %v3278_v22, %v3266_v62 }
0x1d1e   :  { %v3283_v63 = vpop.permute.xlu1 %3282 }
0x1d1f   :  { %v3288_v38 = vadd.f32 %v3287_v49, %v3286_v45  ;;  %v3280_v4 = vpop.permute.xlu0 %3279 }
0x1d20   :  { %v3285_v53 = vsel %vm213_vm0, %v3280_v4, %v3283_v63 }
0x1d21   :  { %5004 = vtanh.f32 %v3288_v38  ;;  %v3294_v36 = vsel %vm3292_vm14, %v3288_v38, %v3164_v5 }
0x1d2b   :  { %v5005_v43 = vpop.eup %5004 }
0x1d2c   :  { %v3290_v6 = vmul.f32 %v5005_v43, %v3285_v53 }
0x1d2e   :  { %v3295_v56 = vmul.f32 %v3291_v33, %v3290_v6  ;;  %v3293_v58 = vsel %vm3292_vm14, %v3290_v6, %v6378_v42 }
0x1d2f   :  { %4211 = vmatmul.mubr.msk.f32.vlgmr.msra.gmra.mrb[32].mxu1 %vm391_vm8, %v3293_v58 }
0x1d30   :  { %3296 = vst.msk [vmem:[#allocation3 + $0x10] sm:$0xff] %vm213_vm0, %v3295_v56  ;;  %4658 = vmatpush1.bf16.msra.mxu1 %v6199_v57  ;;  %3627 = vmatprep.mubr.f32.mxu1 %v5298_v0 }
0x1d31   :  { %3297 = vst.msk [vmem:[#allocation3 + $0x28] sm:$0xff] %vm520_vm9, %v3295_v56  ;;  %4660 = vmatprep.subr.bf16.mxu1 %v6211_v46 }
0x1d34   :  { %4662 = vmatpush1.bf16.msra.mxu1 %v6221_v48 }
0x1d35   :  { %4664 = vmatprep.subr.bf16.mxu1 %v6231_v41 }
0x1d38   :  { %4666 = vmatpush1.bf16.msra.mxu1 %v6239_v21 }
0x1d39   :  { %4668 = vmatprep.subr.bf16.mxu1 %v6252_v18 }
0x1d3c   :  { %4670 = vmatpush1.bf16.msra.mxu1 %v6257_v20 }
0x1d3d   :  { %4688 = vmatprep.subr.bf16.mxu1 %v6189_v35 }
0x1e02   :  { %v3369_v5 = vpop.f32.mrb[32].mxu1 }
0x1e03   :  { %v3374_v15 = vadd.f32 %v3369_v5, %v6321_v51  ;;  %v3371_v8 = vpop.f32.mrb[33].mxu1 }
0x1e04   :  { %v3375_v9 = vadd.f32 %v3371_v8, %v6327_v23 }
0x1e05   :  { %v4212_v10 = vmul.f32 -1.442695, %v3374_v15 }
0x1e06   :  { %v4213_v13 = vmul.f32 -1.442695, %v3375_v9 }
0x1e07   :  { %5006 = vpow2.f32 %v4212_v10 }
0x1e08   :  { %5008 = vpow2.f32 %v4213_v13 }
0x1e09   :  { %5010 = vtanh.f32 %v3374_v15 }
0x1e0a   :  { %5012 = vtanh.f32 %v3375_v9 }
0x1e11   :  { %v5007_v42 = vpop.eup %5006 }
0x1e12   :  { %v5009_v59 = vpop.eup %5008  ;;  %v3384_v7 = vadd.f32 1.0, %v5007_v42 }
0x1e13   :  { %v3385_v16 = vadd.f32 1.0, %v5009_v59  ;;  %v5011_v50 = vpop.eup %5010 }
0x1e14   :  { %5014 = vrcp.f32 %v3384_v7  ;;  %v5013_v35 = vpop.eup %5012  ;;  %v3551_v7 = vld [vmem:[#allocation5 + $0x20] sm:$0xff] }
0x1e15   :  { %5016 = vrcp.f32 %v3385_v16  ;;  %vm3552_vm1 = vcmp.gt.f32.partialorder %v3551_v7, 0.0 }
0x1e1e   :  { %v5015_v54 = vpop.eup %5014 }
0x1e1f   :  { %v5017_v1 = vpop.eup %5016  ;;  %v3390_v51 = vsel %vm5606_vm5, %v5011_v50, %v5015_v54 }
0x1e20   :  { %3398 = vrot.lane.b32.xlu1 %v3390_v51, %s5301_s14  ;;  %v3391_v23 = vsel %vm5610_vm6, %v5013_v35, %v5017_v1 }
0x1e21   :  { %3393 = vrot.lane.b32.xlu0 %v3391_v23, %s5300_s5 }
0x1e24   :  { %3405 = vrot.lane.b32.xlu1 %v3391_v23, %s5301_s14 }
0x1e25   :  { %3402 = vrot.lane.b32.xlu0 %v3390_v51, %s5299_s4 }
0x1e28   :  { %3412 = vrot.lane.b32.xlu1 %v3391_v23, %s5299_s4 }
0x1e29   :  { %3409 = vrot.lane.b32.xlu0 %v3390_v51, %s5300_s5 }
0x1e92   :  { %v3399_v30 = vpop.permute.xlu1 %3398 }
0x1e93   :  { %v3394_v61 = vpop.permute.xlu0 %3393  ;;  %v3401_v44 = vsel %vm213_vm0, %v3399_v30, %v3391_v23 }
0x1e94   :  { %v3396_v28 = vsel %vm213_vm0, %v3390_v51, %v3394_v61  ;;  %v3416_v39 = vmul.f32 %v3401_v44, %v3294_v36 }
0x1e96   :  { %v3406_v19 = vpop.permute.xlu1 %3405 }
0x1e97   :  { %v3403_v52 = vpop.permute.xlu0 %3402 }
0x1e98   :  { %v3408_v31 = vsel %vm213_vm0, %v3403_v52, %v3406_v19 }
0x1e99   :  { %v3417_v26 = vmul.f32 %v3408_v31, %v3396_v28 }
0x1e9a   :  { %v3413_v40 = vpop.permute.xlu1 %3412 }
0x1e9b   :  { %v3418_v60 = vadd.f32 %v3417_v26, %v3416_v39  ;;  %v3410_v34 = vpop.permute.xlu0 %3409 }
0x1e9c   :  { %v3415_v2 = vsel %vm213_vm0, %v3410_v34, %v3413_v40 }
0x1e9d   :  { %5018 = vtanh.f32 %v3418_v60  ;;  %v3424_v32 = vsel %vm3422_vm15, %v3418_v60, %v3294_v36 }
0x1ea7   :  { %v5019_v47 = vpop.eup %5018 }
0x1ea8   :  { %v3420_v33 = vmul.f32 %v5019_v47, %v3415_v2 }
0x1eaa   :  { %v3425_v62 = vmul.f32 %v3421_v25, %v3420_v33  ;;  %v3423_v22 = vsel %vm3422_vm15, %v3420_v33, %v3293_v58 }
0x1eab   :  { %4214 = vmatmul.mubr.msk.f32.vlgmr.msra.gmra.mrb[54].mxu0 %vm391_vm8, %v3423_v22 }
0x1eac   :  { %3426 = vst.msk [vmem:[#allocation3 + $0x18] sm:$0xff] %vm213_vm0, %v3425_v62  ;;  %4674 = vmatpush1.bf16.msra.mxu0 %v6199_v57  ;;  %3757 = vmatprep.mubr.f32.mxu0 %v5298_v0 }
0x1ead   :  { %3427 = vst.msk [vmem:[#allocation3 + $0x20] sm:$0xff] %vm520_vm9, %v3425_v62  ;;  %4676 = vmatprep.subr.bf16.mxu0 %v6211_v46  ;;  %v3681_v62 = vld [vmem:[#allocation5 + $0x28] sm:$0xff] }
0x1eae   :  { %vm3682_vm2 = vcmp.gt.f32.partialorder %v3681_v62, 0.0 }
0x1eb0   :  { %4678 = vmatpush1.bf16.msra.mxu0 %v6221_v48 }
0x1eb1   :  { %4680 = vmatprep.subr.bf16.mxu0 %v6231_v41 }
0x1eb4   :  { %4682 = vmatpush1.bf16.msra.mxu0 %v6239_v21 }
0x1eb5   :  { %4684 = vmatprep.subr.bf16.mxu0 %v6252_v18 }
0x1eb8   :  { %4686 = vmatpush1.bf16.msra.mxu0 %v6257_v20 }
0x1f7e   :  { %v3499_v45 = vpop.f32.mrb[54].mxu0 }
0x1f7f   :  { %v3504_v49 = vadd.f32 %v3499_v45, %v6325_v55  ;;  %v3501_v38 = vpop.f32.mrb[55].mxu0 }
0x1f80   :  { %v3505_v36 = vadd.f32 %v3501_v38, %v6323_v3 }
0x1f81   :  { %v4215_v63 = vmul.f32 -1.442695, %v3504_v49 }
0x1f82   :  { %v4216_v4 = vmul.f32 -1.442695, %v3505_v36 }
0x1f83   :  { %5020 = vpow2.f32 %v4215_v63 }
0x1f84   :  { %5022 = vpow2.f32 %v4216_v4 }
0x1f85   :  { %5024 = vtanh.f32 %v3504_v49 }
0x1f86   :  { %5026 = vtanh.f32 %v3505_v36 }
0x1f8d   :  { %v5021_v43 = vpop.eup %5020 }
0x1f8e   :  { %v5023_v53 = vpop.eup %5022  ;;  %v3514_v6 = vadd.f32 1.0, %v5021_v43 }
0x1f8f   :  { %v3515_v56 = vadd.f32 1.0, %v5023_v53  ;;  %v5025_v58 = vpop.eup %5024 }
0x1f90   :  { %5028 = vrcp.f32 %v3514_v6  ;;  %v5027_v5 = vpop.eup %5026 }
0x1f91   :  { %5030 = vrcp.f32 %v3515_v56 }
0x1f9a   :  { %v5029_v15 = vpop.eup %5028 }
0x1f9b   :  { %v5031_v8 = vpop.eup %5030  ;;  %v3520_v55 = vsel %vm5606_vm5, %v5025_v58, %v5029_v15 }
0x1f9c   :  { %3528 = vrot.lane.b32.xlu1 %v3520_v55, %s5301_s14  ;;  %v3521_v3 = vsel %vm5610_vm6, %v5027_v5, %v5031_v8 }
0x1f9d   :  { %3523 = vrot.lane.b32.xlu0 %v3521_v3, %s5300_s5 }
0x1fa0   :  { %3535 = vrot.lane.b32.xlu1 %v3521_v3, %s5301_s14 }
0x1fa1   :  { %3532 = vrot.lane.b32.xlu0 %v3520_v55, %s5299_s4 }
0x1fa4   :  { %3542 = vrot.lane.b32.xlu1 %v3521_v3, %s5299_s4 }
0x1fa5   :  { %3539 = vrot.lane.b32.xlu0 %v3520_v55, %s5300_s5 }
0x200e   :  { %v3529_v9 = vpop.permute.xlu1 %3528 }
0x200f   :  { %v3524_v10 = vpop.permute.xlu0 %3523  ;;  %v3531_v13 = vsel %vm213_vm0, %v3529_v9, %v3521_v3 }
0x2010   :  { %v3526_v16 = vsel %vm213_vm0, %v3520_v55, %v3524_v10  ;;  %v3546_v35 = vmul.f32 %v3531_v13, %v3424_v32 }
0x2012   :  { %v3536_v42 = vpop.permute.xlu1 %3535 }
0x2013   :  { %v3533_v59 = vpop.permute.xlu0 %3532 }
0x2014   :  { %v3538_v50 = vsel %vm213_vm0, %v3533_v59, %v3536_v42 }
0x2015   :  { %v3547_v54 = vmul.f32 %v3538_v50, %v3526_v16 }
0x2016   :  { %v3543_v23 = vpop.permute.xlu1 %3542 }
0x2017   :  { %v3548_v1 = vadd.f32 %v3547_v54, %v3546_v35  ;;  %v3540_v30 = vpop.permute.xlu0 %3539 }
0x2018   :  { %v3545_v44 = vsel %vm213_vm0, %v3540_v30, %v3543_v23 }
0x2019   :  { %5032 = vtanh.f32 %v3548_v1  ;;  %v3554_v51 = vsel %vm3552_vm1, %v3548_v1, %v3424_v32 }
0x2023   :  { %v5033_v61 = vpop.eup %5032 }
0x2024   :  { %v3550_v19 = vmul.f32 %v5033_v61, %v3545_v44  ;;  %v3811_v44 = vld [vmem:[#allocation5 + $0x30] sm:$0xff] }
0x2025   :  { %vm3812_vm3 = vcmp.gt.f32.partialorder %v3811_v44, 0.0 }
0x2026   :  { %v3555_v52 = vmul.f32 %v3551_v7, %v3550_v19  ;;  %v3553_v25 = vsel %vm3552_vm1, %v3550_v19, %v3423_v22 }
0x2027   :  { %4217 = vmatmul.mubr.msk.f32.vlgmr.msra.gmra.mrb[34].mxu1 %vm391_vm8, %v3553_v25 }
0x2028   :  { %3556 = vst.msk [vmem:[#allocation3 + $0x20] sm:$0xff] %vm213_vm0, %v3555_v52  ;;  %4690 = vmatpush1.bf16.msra.mxu1 %v6199_v57  ;;  %3887 = vmatprep.mubr.f32.mxu1 %v5298_v0 }
0x2029   :  { %3557 = vst.msk [vmem:[#allocation3 + $0x18] sm:$0xff] %vm520_vm9, %v3555_v52  ;;  %4692 = vmatprep.subr.bf16.mxu1 %v6211_v46 }
0x202c   :  { %4694 = vmatpush1.bf16.msra.mxu1 %v6221_v48 }
0x202d   :  { %4696 = vmatprep.subr.bf16.mxu1 %v6231_v41 }
0x2030   :  { %4698 = vmatpush1.bf16.msra.mxu1 %v6239_v21 }
0x2031   :  { %4700 = vmatprep.subr.bf16.mxu1 %v6252_v18 }
0x2034   :  { %4702 = vmatpush1.bf16.msra.mxu1 %v6257_v20 }
0x20fa   :  { %v3629_v28 = vpop.f32.mrb[34].mxu1 }
0x20fb   :  { %v3634_v31 = vadd.f32 %v3629_v28, %v6329_v24  ;;  %v3631_v39 = vpop.f32.mrb[35].mxu1 }
0x20fc   :  { %v3635_v57 = vadd.f32 %v3631_v39, %v6319_v37 }
0x20fd   :  { %v4218_v26 = vmul.f32 -1.442695, %v3634_v31 }
0x20fe   :  { %v4219_v0 = vmul.f32 -1.442695, %v3635_v57 }
0x20ff   :  { %5034 = vpow2.f32 %v4218_v26 }
0x2100   :  { %5036 = vpow2.f32 %v4219_v0 }
0x2101   :  { %5038 = vtanh.f32 %v3634_v31 }
0x2102   :  { %5040 = vtanh.f32 %v3635_v57 }
0x2109   :  { %v5035_v46 = vpop.eup %5034 }
0x210a   :  { %v5037_v48 = vpop.eup %5036  ;;  %v3644_v41 = vadd.f32 1.0, %v5035_v46 }
0x210b   :  { %v3645_v21 = vadd.f32 1.0, %v5037_v48  ;;  %v5039_v18 = vpop.eup %5038 }
0x210c   :  { %5042 = vrcp.f32 %v3644_v41  ;;  %v5041_v20 = vpop.eup %5040 }
0x210d   :  { %5044 = vrcp.f32 %v3645_v21 }
0x2116   :  { %v5043_v60 = vpop.eup %5042 }
0x2117   :  { %v5045_v32 = vpop.eup %5044  ;;  %v3650_v24 = vsel %vm5606_vm5, %v5039_v18, %v5043_v60 }
0x2118   :  { %3658 = vrot.lane.b32.xlu1 %v3650_v24, %s5301_s14  ;;  %v3651_v37 = vsel %vm5610_vm6, %v5041_v20, %v5045_v32 }
0x2119   :  { %3653 = vrot.lane.b32.xlu0 %v3651_v37, %s5300_s5 }
0x211c   :  { %3665 = vrot.lane.b32.xlu1 %v3651_v37, %s5301_s14 }
0x211d   :  { %3662 = vrot.lane.b32.xlu0 %v3650_v24, %s5299_s4 }
0x2120   :  { %3672 = vrot.lane.b32.xlu1 %v3651_v37, %s5299_s4 }
0x2121   :  { %3669 = vrot.lane.b32.xlu0 %v3650_v24, %s5300_s5 }
0x218a   :  { %v3659_v40 = vpop.permute.xlu1 %3658 }
0x218b   :  { %v3654_v34 = vpop.permute.xlu0 %3653  ;;  %v3661_v47 = vsel %vm213_vm0, %v3659_v40, %v3651_v37 }
0x218c   :  { %v3656_v22 = vsel %vm213_vm0, %v3650_v24, %v3654_v34  ;;  %v3676_v49 = vmul.f32 %v3661_v47, %v3554_v51 }
0x218e   :  { %v3666_v2 = vpop.permute.xlu1 %3665 }
0x218f   :  { %v3663_v33 = vpop.permute.xlu0 %3662 }
0x2190   :  { %v3668_v45 = vsel %vm213_vm0, %v3663_v33, %v3666_v2 }
0x2191   :  { %v3677_v38 = vmul.f32 %v3668_v45, %v3656_v22 }
0x2192   :  { %v3673_v4 = vpop.permute.xlu1 %3672 }
0x2193   :  { %v3678_v36 = vadd.f32 %v3677_v38, %v3676_v49  ;;  %v3670_v43 = vpop.permute.xlu0 %3669  ;;  %v3953_v49 = vld [vmem:[#allocation17] sm:$0xff]  ;;  %v3954_v38 = vld [vmem:[#allocation17 + $0x8] sm:$0xff] }
0x2194   :  { %v3675_v6 = vsel %vm213_vm0, %v3670_v43, %v3673_v4  ;;  %v3956_v4 = vld [vmem:[#allocation17 + $0x18] sm:$0xff]  ;;  %v3958_v43 = vld [vmem:[#allocation17 + $0x28] sm:$0xff] }
0x2195   :  { %5046 = vtanh.f32 %v3678_v36  ;;  %v3684_v63 = vsel %vm3682_vm2, %v3678_v36, %v3554_v51  ;;  %v4703_v36 = vpack.c.bf16 %v3954_v38, %v3953_v49 }
0x2197   :  { %4704 = vmatprep.subr.bf16.mxu0 %v4703_v36 }
0x219f   :  { %v5047_v53 = vpop.eup %5046 }
0x21a0   :  { %v3680_v56 = vmul.f32 %v5047_v53, %v3675_v6  ;;  %v4711_v53 = vpack.c.bf16 %v3958_v43, %v3957_v14  ;;  %v3959_v6 = vld [vmem:[#allocation17 + $0x30] sm:$0xff] }
0x21a2   :  { %v3685_v58 = vmul.f32 %v3681_v62, %v3680_v56  ;;  %v3683_v5 = vsel %vm3682_vm2, %v3680_v56, %v3553_v25  ;;  %v3960_v56 = vld [vmem:[#allocation17 + $0x38] sm:$0xff] }
0x21a3   :  { %4220 = vmatmul.mubr.msk.f32.vlgmr.msra.gmra.mrb[56].mxu0 %vm391_vm8, %v3683_v5 }
0x21a4   :  { %3686 = vst.msk [vmem:[#allocation3 + $0x28] sm:$0xff] %vm213_vm0, %v3685_v58  ;;  %4706 = vmatpush3.bf16.msra.mxu0 %v4703_v36 }
0x21a5   :  { %3687 = vst.msk [vmem:[#allocation3 + $0x10] sm:$0xff] %vm520_vm9, %v3685_v58  ;;  %v4715_v58 = vpack.c.bf16 %v3960_v56, %v3959_v6 }
0x2276   :  { %v3759_v15 = vpop.f32.mrb[56].mxu0 }
0x2277   :  { %v3764_v8 = vadd.f32 %v3759_v15, %v6333_v27  ;;  %v3761_v55 = vpop.f32.mrb[57].mxu0 }
0x2278   :  { %v3765_v3 = vadd.f32 %v3761_v55, %v6315_v17 }
0x2279   :  { %v4221_v9 = vmul.f32 -1.442695, %v3764_v8 }
0x227a   :  { %v4222_v10 = vmul.f32 -1.442695, %v3765_v3 }
0x227b   :  { %5048 = vpow2.f32 %v4221_v9 }
0x227c   :  { %5050 = vpow2.f32 %v4222_v10 }
0x227d   :  { %5052 = vtanh.f32 %v3764_v8 }
0x227e   :  { %5054 = vtanh.f32 %v3765_v3 }
0x2285   :  { %v5049_v13 = vpop.eup %5048 }
0x2286   :  { %v5051_v42 = vpop.eup %5050  ;;  %v3774_v59 = vadd.f32 1.0, %v5049_v13 }
0x2287   :  { %v3775_v7 = vadd.f32 1.0, %v5051_v42  ;;  %v5053_v16 = vpop.eup %5052 }
0x2288   :  { %5056 = vrcp.f32 %v3774_v59  ;;  %v5055_v50 = vpop.eup %5054 }
0x2289   :  { %5058 = vrcp.f32 %v3775_v7 }
0x2292   :  { %v5057_v35 = vpop.eup %5056 }
0x2293   :  { %v5059_v54 = vpop.eup %5058  ;;  %v3780_v27 = vsel %vm5606_vm5, %v5053_v16, %v5057_v35  ;;  %v3941_v35 = vld [vmem:[#allocation5 + $0x38] sm:$0xff] }
0x2294   :  { %3788 = vrot.lane.b32.xlu1 %v3780_v27, %s5301_s14  ;;  %v3781_v17 = vsel %vm5610_vm6, %v5055_v50, %v5059_v54 }
0x2295   :  { %3783 = vrot.lane.b32.xlu0 %v3781_v17, %s5300_s5 }
0x2298   :  { %3795 = vrot.lane.b32.xlu1 %v3781_v17, %s5301_s14 }
0x2299   :  { %3792 = vrot.lane.b32.xlu0 %v3780_v27, %s5299_s4 }
0x229c   :  { %3802 = vrot.lane.b32.xlu1 %v3781_v17, %s5299_s4 }
0x229d   :  { %3799 = vrot.lane.b32.xlu0 %v3780_v27, %s5300_s5 }
0x2306   :  { %v3789_v1 = vpop.permute.xlu1 %3788 }
0x2307   :  { %v3784_v51 = vpop.permute.xlu0 %3783  ;;  %v3791_v23 = vsel %vm213_vm0, %v3789_v1, %v3781_v17 }
0x2308   :  { %v3786_v19 = vsel %vm213_vm0, %v3780_v27, %v3784_v51  ;;  %v3806_v25 = vmul.f32 %v3791_v23, %v3684_v63  ;;  %v3947_v23 = vld [vmem:[#allocation3 + $0x10] sm:$0xff] }
0x230a   :  { %v3796_v30 = vpop.permute.xlu1 %3795 }
0x230b   :  { %v3793_v61 = vpop.permute.xlu0 %3792 }
0x230c   :  { %v3798_v52 = vsel %vm213_vm0, %v3793_v61, %v3796_v30  ;;  %v3948_v30 = vld [vmem:[#allocation3 + $0x18] sm:$0xff]  ;;  %v3949_v61 = vld [vmem:[#allocation3 + $0x20] sm:$0xff] }
0x230d   :  { %v3807_v28 = vmul.f32 %v3798_v52, %v3786_v19 }
0x230e   :  { %v3803_v57 = vpop.permute.xlu1 %3802 }
0x230f   :  { %v3808_v31 = vadd.f32 %v3807_v28, %v3806_v25  ;;  %v3800_v26 = vpop.permute.xlu0 %3799  ;;  %v4226_v25 = vld [vmem:[%s6573_s12] ss:$0 sm:$0xff] }
0x2310   :  { %v3805_v46 = vsel %vm213_vm0, %v3800_v26, %v3803_v57 }
0x2311   :  { %5060 = vtanh.f32 %v3808_v31  ;;  %v6510_v39 = vsel %vm3812_vm3, %v3808_v31, %v3684_v63  ;;  %v3955_v63 = vld [vmem:[#allocation17 + $0x10] sm:$0xff] }
0x2312   :  { %v4707_v12 = vpack.c.bf16 %v3956_v4, %v3955_v63 }
0x2314   :  { %4708 = vmatprep.subr.bf16.mxu0 %v4707_v12 }
0x2315   :  { %4710 = vmatpush3.bf16.msra.mxu0 %v4707_v12 }
0x2316   :  { %4712 = vmatprep.subr.bf16.mxu0 %v4711_v53 }
0x2319   :  { %4714 = vmatpush3.bf16.msra.mxu0 %v4711_v53 }
0x231a   :  { %4716 = vmatprep.subr.bf16.mxu0 %v4715_v58 }
0x231b   :  { %v5061_v0 = vpop.eup %5060 }
0x231c   :  { %v3810_v48 = vmul.f32 %v5061_v0, %v3805_v46 }
0x231d   :  { %4718 = vmatpush3.bf16.msra.mxu0 %v4715_v58 }
0x231e   :  { %v3815_v41 = vmul.f32 %v3811_v44, %v3810_v48  ;;  %v3813_v21 = vsel %vm3812_vm3, %v3810_v48, %v3683_v5  ;;  %v3950_v44 = vld [vmem:[#allocation3 + $0x28] sm:$0xff] }
0x231f   :  { %4223 = vmatmul.mubr.msk.f32.vlgmr.msra.gmra.mrb[36].mxu1 %vm391_vm8, %v3813_v21 }
0x2320   :  { %3816 = vst.msk [vmem:[#allocation3 + $0x30] sm:$0xff] %vm213_vm0, %v3815_v41 }
0x2321   :  { %3817 = vst.msk [vmem:[#allocation3 + $0x8] sm:$0xff] %vm520_vm9, %v3815_v41 }
0x2327   :  { %v3951_v19 = vld [vmem:[#allocation3 + $0x30] sm:$0xff] }
0x2328   :  { %v3946_v51 = vld [vmem:[#allocation3 + $0x8] sm:$0xff] }
0x23f2   :  { %v3889_v18 = vpop.f32.mrb[36].mxu1 }
0x23f3   :  { %v3894_v20 = vadd.f32 %v3889_v18, %v6335_v29  ;;  %v3891_v60 = vpop.f32.mrb[37].mxu1 }
0x23f4   :  { %v3895_v32 = vadd.f32 %v3891_v60, %v6311_v11 }
0x23f5   :  { %v4224_v24 = vmul.f32 -1.442695, %v3894_v20 }
0x23f6   :  { %v4225_v37 = vmul.f32 -1.442695, %v3895_v32 }
0x23f7   :  { %5062 = vpow2.f32 %v4224_v24 }
0x23f8   :  { %5064 = vpow2.f32 %v4225_v37 }
0x23f9   :  { %5066 = vtanh.f32 %v3894_v20 }
0x23fa   :  { %5068 = vtanh.f32 %v3895_v32 }
0x2401   :  { %v5063_v40 = vpop.eup %5062 }
0x2402   :  { %v5065_v34 = vpop.eup %5064  ;;  %v3904_v47 = vadd.f32 1.0, %v5063_v40 }
0x2403   :  { %v3905_v2 = vadd.f32 1.0, %v5065_v34  ;;  %v5067_v33 = vpop.eup %5066 }
0x2404   :  { %5070 = vrcp.f32 %v3904_v47  ;;  %v5069_v62 = vpop.eup %5068 }
0x2405   :  { %5072 = vrcp.f32 %v3905_v2 }
0x240e   :  { %v5071_v22 = vpop.eup %5070 }
0x240f   :  { %v5073_v45 = vpop.eup %5072  ;;  %v3910_v29 = vsel %vm5606_vm5, %v5067_v33, %v5071_v22 }
0x2410   :  { %3918 = vrot.lane.b32.xlu1 %v3910_v29, %s5301_s14  ;;  %v3911_v11 = vsel %vm5610_vm6, %v5069_v62, %v5073_v45 }
0x2411   :  { %3913 = vrot.lane.b32.xlu0 %v3911_v11, %s5300_s5 }
0x2414   :  { %3925 = vrot.lane.b32.xlu1 %v3911_v11, %s5301_s14 }
0x2415   :  { %3922 = vrot.lane.b32.xlu0 %v3910_v29, %s5299_s4 }
0x2418   :  { %3932 = vrot.lane.b32.xlu1 %v3911_v11, %s5299_s4 }
0x2419   :  { %3929 = vrot.lane.b32.xlu0 %v3910_v29, %s5300_s5  ;;  %s5302_s5 = smov [#allocation19]  }
0x241a   :  { %s4110_s14 = sshll.u32 %s5302_s5, 4  ;;  %s4111_s14 = int_to_ptr.vmem [resolvable:$true] %s4110_s14 }
0x241b   :  { %s5252_s12 = scalar_lea.vmem %s4111_s14, 1024  ;;  %p5257_p9 = scmp.lt.s32.totalorder %s4111_s14, %s4111_s14 }
0x241c   :  { %p5253_p8 = scmp.ne.s32.totalorder %s4111_s14, %s5252_s12  ;;  %p5258_p10 = scmp.lt.s32.totalorder %s5252_s12, %s5252_s12 }
0x241e   :  { %p5259_p11 = por %p5258_p10, %p5257_p9 }
0x2420   :  { %p5260_p12 = pnand %p5259_p11, %p5253_p8 }
0x2482   :  { %v3919_v5 = vpop.permute.xlu1 %3918 }
0x2483   :  { %v3914_v15 = vpop.permute.xlu0 %3913  ;;  %v3921_v8 = vsel %vm213_vm0, %v3919_v5, %v3911_v11 }
0x2484   :  { %v3916_v9 = vsel %vm213_vm0, %v3910_v29, %v3914_v15  ;;  %v3936_v13 = vmul.f32 %v3921_v8, %v6510_v39 }
0x2486   :  { %v3926_v55 = vpop.permute.xlu1 %3925 }
0x2487   :  { %v3923_v3 = vpop.permute.xlu0 %3922 }
0x2488   :  { %v3928_v10 = vsel %vm213_vm0, %v3923_v3, %v3926_v55 }
0x2489   :  { %v3937_v42 = vmul.f32 %v3928_v10, %v3916_v9 }
0x248a   :  { %v3933_v7 = vpop.permute.xlu1 %3932 }
0x248b   :  { %v3938_v59 = vadd.f32 %v3937_v42, %v3936_v13  ;;  %v3930_v16 = vpop.permute.xlu0 %3929 }
0x248c   :  { %v3935_v54 = vsel %vm213_vm0, %v3930_v16, %v3933_v7 }
0x248d   :  { %5074 = vtanh.f32 %v3938_v59 }
0x2497   :  { %v5075_v50 = vpop.eup %5074 }
0x2498   :  { %v3940_v27 = vmul.f32 %v5075_v50, %v3935_v54 }
0x249a   :  { %v3942_v17 = vmul.f32 %v3941_v35, %v3940_v27 }
0x249c   :  { %3943 = vst.msk [vmem:[#allocation3 + $0x38] sm:$0xff] %vm213_vm0, %v3942_v17 }
0x249d   :  { %3944 = vst.msk [vmem:[#allocation3] sm:$0xff] %vm520_vm9, %v3942_v17 }
0x24a3   :  { %v3952_v52 = vld [vmem:[#allocation3 + $0x38] sm:$0xff] }
0x24a4   :  { %v3945_v1 = vld [vmem:[#allocation3] sm:$0xff] }
0x24a5   :  { %4267 = vmatprep.mubr.msk.f32.mxu0 %vm391_vm8, %v3945_v1 }
0x24a6   :  { %4268 = vmatmul.mubr.msk.f32.vlgmr.msra.gmra.mrb[58].mxu0 %vm391_vm8, %v3946_v51 }
0x24a7   :  { %4270 = vmatprep.mubr.msk.f32.mxu0 %vm391_vm8, %v3947_v23 }
0x24aa   :  { %4271 = vmatmul.mubr.msk.f32.gmra.mrb[60].mxu0 %vm391_vm8, %v3948_v30 }
0x24ab   :  { %4273 = vmatprep.mubr.msk.f32.mxu0 %vm391_vm8, %v3949_v61 }
0x24ae   :  { %4274 = vmatmul.mubr.msk.f32.gmra.mrb[62].mxu0 %vm391_vm8, %v3950_v44 }
0x24af   :  { %4276 = vmatprep.mubr.msk.f32.mxu0 %vm391_vm8, %v3951_v19 }
0x24b2   :  { %4277 = vmatmul.mubr.msk.f32.gmra.mrb[64].mxu0 %vm391_vm8, %v3952_v52 }
0x2579   :  { %v4269_v28 = vpop.f32.mrb[58].mxu0 }
0x257a   :  { %v4064_v31 = vadd.f32 %v4269_v28, %v4226_v25  ;;  %v4058_v39 = vpop.f32.mrb[59].mxu0 }
0x257b   :  { %v4059_v57 = vadd.f32 %v4226_v25, %v4058_v39 }
0x257c   :  { %4098 = vst [vmem:[#allocation19 + $0x8] sm:$0xff] %v4064_v31 }
0x257d   :  { %4097 = vst [vmem:[#allocation19] sm:$0xff] %v4059_v57  ;;  %v4272_v26 = vpop.f32.mrb[60].mxu0 }
0x257e   :  { %v4074_v0 = vadd.f32 %v4272_v26, %v4226_v25  ;;  %v4068_v46 = vpop.f32.mrb[61].mxu0 }
0x257f   :  { %v4069_v48 = vadd.f32 %v4226_v25, %v4068_v46 }
0x2580   :  { %4100 = vst [vmem:[#allocation19 + $0x18] sm:$0xff] %v4074_v0 }
0x2581   :  { %4099 = vst [vmem:[#allocation19 + $0x10] sm:$0xff] %v4069_v48  ;;  %v4275_v41 = vpop.f32.mrb[62].mxu0 }
0x2582   :  { %v4084_v21 = vadd.f32 %v4275_v41, %v4226_v25  ;;  %v4078_v18 = vpop.f32.mrb[63].mxu0 }
0x2583   :  { %v4079_v20 = vadd.f32 %v4226_v25, %v4078_v18 }
0x2584   :  { %4102 = vst [vmem:[#allocation19 + $0x28] sm:$0xff] %v4084_v21 }
0x2585   :  { %4101 = vst [vmem:[#allocation19 + $0x20] sm:$0xff] %v4079_v20  ;;  %v4278_v60 = vpop.f32.mrb[64].mxu0 }
0x2586   :  { %v4094_v32 = vadd.f32 %v4278_v60, %v4226_v25  ;;  %v4088_v24 = vpop.f32.mrb[65].mxu0 }
0x2587   :  { %v4089_v37 = vadd.f32 %v4226_v25, %v4088_v24 }
0x2588   :  { %4104 = vst [vmem:[#allocation19 + $0x38] sm:$0xff] %v4094_v32 }
0x2589   :  { %4103 = vst [vmem:[#allocation19 + $0x30] sm:$0xff] %v4089_v37 }
0x258a   :  { %5263 = shalt.err (!%p5260_p12)
}
0x258b   :  { %s5264_s29 = scalar_lea.hbm %s6574_s13, 1024 }
0x258c   :  { %p5265_p13 = scmp.ne.s32.totalorder %s6574_s13, %s5264_s29  ;;  %p5268_p0 = scmp.lt.u32.totalorder %s5264_s29, %s6574_s13 }
0x258e   :  { %p5270_p1 = pnand %p5268_p0, %p5265_p13 }
0x2590   :  { %5273 = shalt.err (!%p5270_p1)
}
0x2591   :  { %4116 = dma.vmem_to_hbm [thread:$0]  %s4111_s14, 1024, %s6574_s13, [#allocation7], %s5292_s7, %s5292_s7, %s5293_s25  }
0x2592   :  { %5284 = dma.done.wait [#allocation7], 1024  }
0x2593   :  { %5285 = vsyncadd [#allocation7], 4294966272 }
0x2594   :  { %4120 = vsyncpa [#allocation6], 1 }
0x2595   :  { %4121 = vsyncpa [#allocation9], 1 }
0x2596   :  { %4122 = vsyncpa [#allocation12], 1 }
0x2597   :  { %4123 = vsyncpa [#allocation15], 1 }
0x2598   :  { %4124 = vsyncpa [#allocation18], 1 }
0x2599   :  { %4125 = vsyncpa [#allocation7], 1 }

</bundles_post_ra>
